<compile_context>
chip_gen: v5e
topology: v5e:2x2
jax: 0.10.0
libtpu: 0.0.40
codegen_flags: <defaults>
</compile_context>

<pallas_src>
import functools

import numpy as np
import jax
import jax.numpy as jnp
from jax import lax
from jax.experimental import pallas as pl
from jax.experimental.pallas import tpu as pltpu


_LANE = 128
_STRIDES = (2, 1, 2, 2)


def _round_up(x, m):
    return ((x + m - 1) // m) * m


# ----------------------------------------------------------------------------
# Fused whole-network kernel
# ----------------------------------------------------------------------------
def _generator_kernel(z_ref,
                      w1_ref, s1_ref, m1_ref, mt1_ref, g1_ref, be1_ref,
                      w2_ref, s2_ref, m2_ref, mt2_ref, g2_ref, be2_ref,
                      w3_ref, s3_ref, m3_ref, mt3_ref, g3_ref, be3_ref,
                      w4_ref, s4_ref, bias4_ref,
                      o_ref, *, eps, inv_counts):

    def convt(x, w_ref, s_ref):
        # x:     (IH*N, in_cols) f32       rows (ih, n)
        # w_ref: (in_cols, K*OWC_pad) bf16 width + tap folded, lane-aligned per tap
        # s_ref: (K, out_rows, IH*N) bf16  0/1 height-scatter, one slab per tap
        k, _, _ = s_ref.shape
        owcp = w_ref.shape[1] // k                       # multiple of 128 lanes
        p = jnp.dot(x.astype(jnp.bfloat16), w_ref[...],
                    preferred_element_type=jnp.float32)  # (IH*N, K*OWC_pad) f32 acc
        p = p.astype(jnp.bfloat16)                       # bf16 operands for scatter dots
        y = jnp.dot(s_ref[0], p[:, :owcp], preferred_element_type=jnp.float32)
        for kh in range(1, k):                           # lane-aligned per-tap slices
            y = y + jnp.dot(s_ref[kh], p[:, kh * owcp:(kh + 1) * owcp],
                            preferred_element_type=jnp.float32)
        return y                                         # (out_rows, OWC_pad) f32

    def bn_relu(y, m_ref, mt_ref, g_ref, be_ref, inv_n):
        # y: (OH*N, OWC_pad) f32; m: (OWC_pad, C); mt: (C, OWC_pad); g/be: (1, C)
        # Pad columns of y are exactly zero and stay zero (Mt pad cols are zero).
        sum_v = jnp.sum(y, axis=0, keepdims=True)                  # (1, OWC_pad)
        sq_v = jnp.sum(y * y, axis=0, keepdims=True)               # (1, OWC_pad)
        stats = jnp.concatenate([sum_v, sq_v], axis=0)             # (2, OWC_pad)
        ch = jnp.dot(stats, m_ref[...], preferred_element_type=jnp.float32)  # (2, C)
        mean = ch[0:1] * inv_n
        var = ch[1:2] * inv_n - mean * mean                        # biased batch var
        scale_c = g_ref[...] * lax.rsqrt(var + eps)                # (1, C) f32
        shift_c = be_ref[...] - mean * scale_c
        aff = jnp.concatenate([scale_c, shift_c], axis=0)          # (2, C)
        sv = jnp.dot(aff, mt_ref[...], preferred_element_type=jnp.float32)   # (2, OWC_pad)
        return jnp.maximum(y * sv[0:1] + sv[1:2], 0.0)             # fused affine + ReLU

    x = z_ref[...]                                                 # (N, z_dim) == 1x1 map
    x = bn_relu(convt(x, w1_ref, s1_ref), m1_ref, mt1_ref, g1_ref, be1_ref, inv_counts[0])
    x = bn_relu(convt(x, w2_ref, s2_ref), m2_ref, mt2_ref, g2_ref, be2_ref, inv_counts[1])
    x = bn_relu(convt(x, w3_ref, s3_ref), m3_ref, mt3_ref, g3_ref, be3_ref, inv_counts[2])
    x = convt(x, w4_ref, s4_ref)                                   # (N*28, 128), rows (n, oh)
    o_ref[...] = x + bias4_ref[...]                                # ConvTranspose2d bias b4


# ----------------------------------------------------------------------------
# Host-side constant packing (done once at init, outside the hot path)
# ----------------------------------------------------------------------------
def _build_wcat(w, iw, stride, in_cols_pad, owc_pad):
    """(Cin,Cout,K,K) -> (in_cols_pad, K*owc_pad): width+taps folded, pad rows/cols zero."""
    w = np.asarray(w, np.float32)
    cin, cout, k, _ = w.shape
    wc = np.zeros((in_cols_pad, k * owc_pad), np.float32)
    for kh in range(k):
        for i in range(iw):
            for kw in range(k):
                o = i * stride + kw
                col0 = kh * owc_pad + o * cout
                wc[i * cin:(i + 1) * cin, col0:col0 + cout] = w[:, :, kh, kw]
    return wc


def _build_scat(ih, stride, k, n, row_order):
    """(K, out_rows, IH*N) 0/1 scatter: input row (ih,n) goes to oh = ih*stride + kh."""
    oh = (ih - 1) * stride + k
    s = np.zeros((k, oh * n, ih * n), np.float32)
    for kh in range(k):
        for i in range(ih):
            o = i * stride + kh
            for m in range(n):
                r = o * n + m if row_order == "hn" else m * oh + o
                s[kh, r, i * n + m] = 1.0
    return s


def _build_masks(ow, c, owc_pad):
    """M[(ow*c + ci), c2] = (ci == c2) on true cols, zero on pad; Mt = M.T."""
    m = np.zeros((owc_pad, c), np.float32)
    m[:ow * c, :] = np.tile(np.eye(c, dtype=np.float32), (ow, 1))
    return m, np.ascontiguousarray(m.T)


def prepare_generator_inputs(params, batch):
    """Re-pack PyTorch-layout parameters into the fused kernel's constant operands."""
    ws = (params["w1"], params["w2"], params["w3"], params["w4"])
    packed = []
    inv_counts = []
    isz = 1                                        # z viewed as a 1x1 spatial map
    in_cols = int(np.asarray(ws[0]).shape[0])      # layer-1 input columns = z_dim
    cout = 1
    for li, (w, stride) in enumerate(zip(ws, _STRIDES)):
        w_np = np.asarray(w, np.float32)
        cin, cout, k, _ = w_np.shape
        osz = (isz - 1) * stride + k
        owc = osz * cout
        owc_pad = _round_up(owc, _LANE)
        packed.append(jnp.asarray(_build_wcat(w_np, isz, stride, in_cols, owc_pad),
                                  jnp.bfloat16))
        row_order = "nh" if li == 3 else "hn"      # last layer emits (n, oh)-ordered rows
        packed.append(jnp.asarray(_build_scat(isz, stride, k, batch, row_order),
                                  jnp.bfloat16))
        if li < 3:
            m, mt = _build_masks(osz, cout, owc_pad)
            packed.append(jnp.asarray(m))                                   # f32
            packed.append(jnp.asarray(mt))                                  # f32
            packed.append(jnp.asarray(params[f"g{li + 1}"], jnp.float32).reshape(1, cout))
            packed.append(jnp.asarray(params[f"be{li + 1}"], jnp.float32).reshape(1, cout))
            inv_counts.append(1.0 / float(batch * osz * osz))               # true count
        else:
            b4 = np.zeros((1, owc_pad), np.float32)
            b4[0, :owc] = np.tile(np.asarray(params["b4"], np.float32).reshape(1, cout),
                                  (1, osz))
            packed.append(jnp.asarray(b4))
        isz = osz
        in_cols = owc_pad                          # next layer consumes padded columns
    meta = {"out_hw": isz, "img_dim": int(cout), "inv_counts": tuple(inv_counts)}
    return tuple(packed), meta


# ----------------------------------------------------------------------------
# Forward wrapper: one pallas_call for the whole network
# ----------------------------------------------------------------------------
def generator_forward(z, packed, meta, *, eps=1e-5):
    n = z.shape[0]
    out_hw = meta["out_hw"]
    img_dim = meta["img_dim"]
    owc = out_hw * img_dim
    owc_pad = _round_up(owc, _LANE)                # lane-dense output slab
    inputs = (z,) + tuple(packed)
    out = pl.pallas_call(
        functools.partial(_generator_kernel, eps=eps, inv_counts=meta["inv_counts"]),
        out_shape=jax.ShapeDtypeStruct((n * out_hw, owc_pad), jnp.float32),
        grid=(1,),
        in_specs=[pl.BlockSpec(a.shape, lambda i, nd=a.ndim: (0,) * nd) for a in inputs],
        out_specs=pl.BlockSpec((n * out_hw, owc_pad), lambda i: (0, 0)),
        compiler_params=pltpu.CompilerParams(dimension_semantics=("arbitrary",)),
    )(*inputs)
    x = out[:, :owc].reshape(n, out_hw, out_hw, img_dim)   # rows were (n, oh)-ordered
    if img_dim == 1:
        return x.reshape(n, 1, out_hw, out_hw)             # metadata-only NCHW conversion
    return jnp.transpose(x, (0, 3, 1, 2))


# ----------------------------------------------------------------------------
# Parameters + pure-JAX reference (for a correctness check)
# ----------------------------------------------------------------------------
def init_generator_params(key, z_dim, hidden_channel, img_dim):
    ks = jax.random.split(key, 5)
    h = hidden_channel

    def u(k, shape, fan_in):
        bound = 1.0 / np.sqrt(float(fan_in))
        return jax.random.uniform(k, shape, jnp.float32, -bound, bound)

    return {
        "w1": u(ks[0], (z_dim, 4 * h, 3, 3), z_dim * 9),
        "g1": jnp.ones((4 * h,), jnp.float32), "be1": jnp.zeros((4 * h,), jnp.float32),
        "w2": u(ks[1], (4 * h, 2 * h, 4, 4), 4 * h * 16),
        "g2": jnp.ones((2 * h,), jnp.float32), "be2": jnp.zeros((2 * h,), jnp.float32),
        "w3": u(ks[2], (2 * h, h, 3, 3), 2 * h * 9),
        "g3": jnp.ones((h,), jnp.float32), "be3": jnp.zeros((h,), jnp.float32),
        "w4": u(ks[3], (h, img_dim, 4, 4), h * 16),
        "b4": u(ks[4], (img_dim,), h * 16),
        # b1..b3 omitted: a per-channel bias before train-mode BatchNorm cancels exactly.
    }


def reference_forward(z, params, eps=1e-5):
    """Plain-JAX (XLA) reference with identical semantics, for validation only."""
    def convt(x, w, stride):            # x: NHWC, w: (Cin, Cout, K, K)
        n, ih, iw, cin = x.shape
        _, cout, k, _ = w.shape
        oh, ow = (ih - 1) * stride + k, (iw - 1) * stride + k
        col = jnp.einsum("nhwi,iokl->nhwokl", x, w)
        out = jnp.zeros((n, oh, ow, cout), jnp.float32)
        for kh in range(k):
            for kw in range(k):
                out = out.at[:, kh:kh + stride * ih:stride,
                             kw:kw + stride * iw:stride, :].add(col[..., kh, kw])
        return out

    def bn_relu(x, g, b):
        mean = jnp.mean(x, axis=(0, 1, 2), keepdims=True)
        var = jnp.mean((x - mean) ** 2, axis=(0, 1, 2), keepdims=True)
        return jnp.maximum(g * (x - mean) * lax.rsqrt(var + eps) + b, 0.0)

    x = z.reshape(z.shape[0], 1, 1, -1)
    x = bn_relu(convt(x, params["w1"], 2), params["g1"], params["be1"])
    x = bn_relu(convt(x, params["w2"], 1), params["g2"], params["be2"])
    x = bn_relu(convt(x, params["w3"], 2), params["g3"], params["be3"])
    x = convt(x, params["w4"], 2) + params["b4"]
    return jnp.transpose(x, (0, 3, 1, 2))


# ----------------------------------------------------------------------------
if __name__ == "__main__":
    Z_DIM = 32
    HIDDEN_CHANNEL = 16   # matches the module-level `hidden_channel = 16`
    IMG_DIM = 1
    BATCH = 2

    key = jax.random.PRNGKey(0)
    k_params, k_z = jax.random.split(key)
    params = init_generator_params(k_params, Z_DIM, HIDDEN_CHANNEL, IMG_DIM)
    z = jax.random.normal(k_z, (BATCH, Z_DIM), jnp.float32)

    packed, meta = prepare_generator_inputs(params, BATCH)

    fwd = jax.jit(lambda zz, pk: generator_forward(zz, pk, meta))
    out = jax.block_until_ready(fwd(z, packed))

    assert out.shape == (BATCH, IMG_DIM, 28, 28), out.shape
    assert bool(jnp.all(jnp.isfinite(out)))

    ref = jax.block_until_ready(jax.jit(reference_forward)(z, params))
    err = float(jnp.max(jnp.abs(out - ref)))
    assert err < 3e-2, f"max |pallas - reference| = {err}"

    print("KERNEL_OK")
</pallas_src>

<mosaic_0001>
module attributes {stable_mosaic.version = 11 : i64} {
  func.func @_generator_kernel(%arg0: i32, %arg1: memref<2x32xf32, #tpu.memory_space<vmem>>, %arg2: memref<32x768xbf16, #tpu.memory_space<vmem>>, %arg3: memref<3x6x2xbf16, #tpu.memory_space<vmem>>, %arg4: memref<256x64xf32, #tpu.memory_space<vmem>>, %arg5: memref<64x256xf32, #tpu.memory_space<vmem>>, %arg6: memref<1x64xf32, #tpu.memory_space<vmem>>, %arg7: memref<1x64xf32, #tpu.memory_space<vmem>>, %arg8: memref<256x1024xbf16, #tpu.memory_space<vmem>>, %arg9: memref<4x12x6xbf16, #tpu.memory_space<vmem>>, %arg10: memref<256x32xf32, #tpu.memory_space<vmem>>, %arg11: memref<32x256xf32, #tpu.memory_space<vmem>>, %arg12: memref<1x32xf32, #tpu.memory_space<vmem>>, %arg13: memref<1x32xf32, #tpu.memory_space<vmem>>, %arg14: memref<256x768xbf16, #tpu.memory_space<vmem>>, %arg15: memref<3x26x12xbf16, #tpu.memory_space<vmem>>, %arg16: memref<256x16xf32, #tpu.memory_space<vmem>>, %arg17: memref<16x256xf32, #tpu.memory_space<vmem>>, %arg18: memref<1x16xf32, #tpu.memory_space<vmem>>, %arg19: memref<1x16xf32, #tpu.memory_space<vmem>>, %arg20: memref<256x512xbf16, #tpu.memory_space<vmem>>, %arg21: memref<4x56x26xbf16, #tpu.memory_space<vmem>>, %arg22: memref<1x128xf32, #tpu.memory_space<vmem>>, %arg23: memref<56x128xf32, #tpu.memory_space<vmem>>) attributes {dimension_semantics = [#tpu.dimension_semantics<arbitrary>], iteration_bounds = array<i64: 1>, scalar_prefetch = 0 : i64, scratch_operands = 0 : i64, tpu.core_type = #tpu.core_type<tc>, window_params = [{pipeline_mode = #tpu.pipeline_mode<synchronous>, transform_indices = @transform_0, window_bounds = array<i64: 2, 32>}, {pipeline_mode = #tpu.pipeline_mode<synchronous>, transform_indices = @transform_1, window_bounds = array<i64: 32, 768>}, {pipeline_mode = #tpu.pipeline_mode<synchronous>, transform_indices = @transform_2, window_bounds = array<i64: 3, 6, 2>}, {pipeline_mode = #tpu.pipeline_mode<synchronous>, transform_indices = @transform_3, window_bounds = array<i64: 256, 64>}, {pipeline_mode = #tpu.pipeline_mode<synchronous>, transform_indices = @transform_4, window_bounds = array<i64: 64, 256>}, {pipeline_mode = #tpu.pipeline_mode<synchronous>, transform_indices = @transform_5, window_bounds = array<i64: 1, 64>}, {pipeline_mode = #tpu.pipeline_mode<synchronous>, transform_indices = @transform_6, window_bounds = array<i64: 1, 64>}, {pipeline_mode = #tpu.pipeline_mode<synchronous>, transform_indices = @transform_7, window_bounds = array<i64: 256, 1024>}, {pipeline_mode = #tpu.pipeline_mode<synchronous>, transform_indices = @transform_8, window_bounds = array<i64: 4, 12, 6>}, {pipeline_mode = #tpu.pipeline_mode<synchronous>, transform_indices = @transform_9, window_bounds = array<i64: 256, 32>}, {pipeline_mode = #tpu.pipeline_mode<synchronous>, transform_indices = @transform_10, window_bounds = array<i64: 32, 256>}, {pipeline_mode = #tpu.pipeline_mode<synchronous>, transform_indices = @transform_11, window_bounds = array<i64: 1, 32>}, {pipeline_mode = #tpu.pipeline_mode<synchronous>, transform_indices = @transform_12, window_bounds = array<i64: 1, 32>}, {pipeline_mode = #tpu.pipeline_mode<synchronous>, transform_indices = @transform_13, window_bounds = array<i64: 256, 768>}, {pipeline_mode = #tpu.pipeline_mode<synchronous>, transform_indices = @transform_14, window_bounds = array<i64: 3, 26, 12>}, {pipeline_mode = #tpu.pipeline_mode<synchronous>, transform_indices = @transform_15, window_bounds = array<i64: 256, 16>}, {pipeline_mode = #tpu.pipeline_mode<synchronous>, transform_indices = @transform_16, window_bounds = array<i64: 16, 256>}, {pipeline_mode = #tpu.pipeline_mode<synchronous>, transform_indices = @transform_17, window_bounds = array<i64: 1, 16>}, {pipeline_mode = #tpu.pipeline_mode<synchronous>, transform_indices = @transform_18, window_bounds = array<i64: 1, 16>}, {pipeline_mode = #tpu.pipeline_mode<synchronous>, transform_indices = @transform_19, window_bounds = array<i64: 256, 512>}, {pipeline_mode = #tpu.pipeline_mode<synchronous>, transform_indices = @transform_20, window_bounds = array<i64: 4, 56, 26>}, {pipeline_mode = #tpu.pipeline_mode<synchronous>, transform_indices = @transform_21, window_bounds = array<i64: 1, 128>}, {pipeline_mode = #tpu.pipeline_mode<synchronous>, transform_indices = @transform_22, window_bounds = array<i64: 56, 128>}]} {
    %c0 = arith.constant 0 : index
    %c0_0 = arith.constant 0 : index
    %0 = vector.load %arg1[%c0, %c0_0] : memref<2x32xf32, #tpu.memory_space<vmem>>, vector<2x32xf32>
    %1 = arith.truncf %0 : vector<2x32xf32> to vector<2x32xbf16>
    %c0_1 = arith.constant 0 : index
    %c0_2 = arith.constant 0 : index
    %2 = vector.load %arg2[%c0_1, %c0_2] : memref<32x768xbf16, #tpu.memory_space<vmem>>, vector<32x768xbf16>
    %cst = arith.constant dense<0.000000e+00> : vector<2x768xf32>
    %3 = tpu.matmul %1, %2, %cst {dimension_numbers = #tpu.dot_dimension_numbers<[1], [0], [0], [1], [0, 0, 1, 1], [], []>} : vector<2x32xbf16>, vector<32x768xbf16>, vector<2x768xf32> -> vector<2x768xf32>
    %4 = arith.truncf %3 : vector<2x768xf32> to vector<2x768xbf16>
    %c0_3 = arith.constant 0 : index
    %c0_4 = arith.constant 0 : index
    %c0_5 = arith.constant 0 : index
    %5 = vector.load %arg3[%c0_3, %c0_4, %c0_5] : memref<3x6x2xbf16, #tpu.memory_space<vmem>>, vector<1x6x2xbf16>
    %6 = vector.shape_cast %5 : vector<1x6x2xbf16> to vector<6x2xbf16>
    %7 = vector.extract_strided_slice %4 {offsets = [0, 0], sizes = [2, 256], strides = [1, 1]} : vector<2x768xbf16> to vector<2x256xbf16>
    %cst_6 = arith.constant dense<0.000000e+00> : vector<6x256xf32>
    %8 = tpu.matmul %6, %7, %cst_6 {dimension_numbers = #tpu.dot_dimension_numbers<[1], [0], [0], [1], [0, 0, 1, 1], [], []>} : vector<6x2xbf16>, vector<2x256xbf16>, vector<6x256xf32> -> vector<6x256xf32>
    %c1 = arith.constant 1 : index
    %c0_7 = arith.constant 0 : index
    %c0_8 = arith.constant 0 : index
    %9 = vector.load %arg3[%c1, %c0_7, %c0_8] : memref<3x6x2xbf16, #tpu.memory_space<vmem>>, vector<1x6x2xbf16>
    %10 = vector.shape_cast %9 : vector<1x6x2xbf16> to vector<6x2xbf16>
    %11 = vector.extract_strided_slice %4 {offsets = [0, 256], sizes = [2, 256], strides = [1, 1]} : vector<2x768xbf16> to vector<2x256xbf16>
    %cst_9 = arith.constant dense<0.000000e+00> : vector<6x256xf32>
    %12 = tpu.matmul %10, %11, %cst_9 {dimension_numbers = #tpu.dot_dimension_numbers<[1], [0], [0], [1], [0, 0, 1, 1], [], []>} : vector<6x2xbf16>, vector<2x256xbf16>, vector<6x256xf32> -> vector<6x256xf32>
    %13 = arith.addf %8, %12 : vector<6x256xf32>
    %c2 = arith.constant 2 : index
    %c0_10 = arith.constant 0 : index
    %c0_11 = arith.constant 0 : index
    %14 = vector.load %arg3[%c2, %c0_10, %c0_11] : memref<3x6x2xbf16, #tpu.memory_space<vmem>>, vector<1x6x2xbf16>
    %15 = vector.shape_cast %14 : vector<1x6x2xbf16> to vector<6x2xbf16>
    %16 = vector.extract_strided_slice %4 {offsets = [0, 512], sizes = [2, 256], strides = [1, 1]} : vector<2x768xbf16> to vector<2x256xbf16>
    %cst_12 = arith.constant dense<0.000000e+00> : vector<6x256xf32>
    %17 = tpu.matmul %15, %16, %cst_12 {dimension_numbers = #tpu.dot_dimension_numbers<[1], [0], [0], [1], [0, 0, 1, 1], [], []>} : vector<6x2xbf16>, vector<2x256xbf16>, vector<6x256xf32> -> vector<6x256xf32>
    %18 = arith.addf %13, %17 : vector<6x256xf32>
    %cst_13 = arith.constant dense<0.000000e+00> : vector<256xf32>
    %19 = vector.multi_reduction <add>, %18, %cst_13 [0] : vector<6x256xf32> to vector<256xf32>
    %20 = vector.shape_cast %19 : vector<256xf32> to vector<1x256xf32>
    %21 = arith.mulf %18, %18 : vector<6x256xf32>
    %cst_14 = arith.constant dense<0.000000e+00> : vector<256xf32>
    %22 = vector.multi_reduction <add>, %21, %cst_14 [0] : vector<6x256xf32> to vector<256xf32>
    %23 = vector.shape_cast %22 : vector<256xf32> to vector<1x256xf32>
    %24 = tpu.concatenate %20, %23 in 0 : vector<1x256xf32>, vector<1x256xf32> -> vector<2x256xf32>
    %c0_15 = arith.constant 0 : index
    %c0_16 = arith.constant 0 : index
    %25 = vector.load %arg4[%c0_15, %c0_16] : memref<256x64xf32, #tpu.memory_space<vmem>>, vector<256x64xf32>
    %cst_17 = arith.constant dense<0.000000e+00> : vector<2x64xf32>
    %26 = tpu.matmul %24, %25, %cst_17 {dimension_numbers = #tpu.dot_dimension_numbers<[1], [0], [0], [1], [0, 0, 1, 1], [], []>} : vector<2x256xf32>, vector<256x64xf32>, vector<2x64xf32> -> vector<2x64xf32>
    %27 = vector.extract_strided_slice %26 {offsets = [0, 0], sizes = [1, 64], strides = [1, 1]} : vector<2x64xf32> to vector<1x64xf32>
    %cst_18 = arith.constant 0.055555556 : f32
    %28 = vector.broadcast %cst_18 : f32 to vector<1x64xf32>
    %29 = arith.mulf %27, %28 : vector<1x64xf32>
    %30 = vector.extract_strided_slice %26 {offsets = [1, 0], sizes = [1, 64], strides = [1, 1]} : vector<2x64xf32> to vector<1x64xf32>
    %cst_19 = arith.constant 0.055555556 : f32
    %31 = vector.broadcast %cst_19 : f32 to vector<1x64xf32>
    %32 = arith.mulf %30, %31 : vector<1x64xf32>
    %33 = arith.mulf %29, %29 : vector<1x64xf32>
    %34 = arith.subf %32, %33 : vector<1x64xf32>
    %c0_20 = arith.constant 0 : index
    %c0_21 = arith.constant 0 : index
    %35 = vector.load %arg6[%c0_20, %c0_21] : memref<1x64xf32, #tpu.memory_space<vmem>>, vector<1x64xf32>
    %cst_22 = arith.constant 9.99999974E-6 : f32
    %36 = vector.broadcast %cst_22 : f32 to vector<1x64xf32>
    %37 = arith.addf %34, %36 : vector<1x64xf32>
    %38 = math.rsqrt %37 : vector<1x64xf32>
    %39 = arith.mulf %35, %38 : vector<1x64xf32>
    %c0_23 = arith.constant 0 : index
    %c0_24 = arith.constant 0 : index
    %40 = vector.load %arg7[%c0_23, %c0_24] : memref<1x64xf32, #tpu.memory_space<vmem>>, vector<1x64xf32>
    %41 = arith.mulf %29, %39 : vector<1x64xf32>
    %42 = arith.subf %40, %41 : vector<1x64xf32>
    %43 = tpu.concatenate %39, %42 in 0 : vector<1x64xf32>, vector<1x64xf32> -> vector<2x64xf32>
    %c0_25 = arith.constant 0 : index
    %c0_26 = arith.constant 0 : index
    %44 = vector.load %arg5[%c0_25, %c0_26] : memref<64x256xf32, #tpu.memory_space<vmem>>, vector<64x256xf32>
    %cst_27 = arith.constant dense<0.000000e+00> : vector<2x256xf32>
    %45 = tpu.matmul %43, %44, %cst_27 {dimension_numbers = #tpu.dot_dimension_numbers<[1], [0], [0], [1], [0, 0, 1, 1], [], []>} : vector<2x64xf32>, vector<64x256xf32>, vector<2x256xf32> -> vector<2x256xf32>
    %46 = vector.extract_strided_slice %45 {offsets = [0, 0], sizes = [1, 256], strides = [1, 1]} : vector<2x256xf32> to vector<1x256xf32>
    %47 = vector.broadcast %46 : vector<1x256xf32> to vector<6x256xf32>
    %48 = arith.mulf %18, %47 : vector<6x256xf32>
    %49 = vector.extract_strided_slice %45 {offsets = [1, 0], sizes = [1, 256], strides = [1, 1]} : vector<2x256xf32> to vector<1x256xf32>
    %50 = vector.broadcast %49 : vector<1x256xf32> to vector<6x256xf32>
    %51 = arith.addf %48, %50 : vector<6x256xf32>
    %cst_28 = arith.constant 0.000000e+00 : f32
    %52 = vector.broadcast %cst_28 : f32 to vector<6x256xf32>
    %53 = arith.maximumf %51, %52 : vector<6x256xf32>
    %54 = arith.truncf %53 : vector<6x256xf32> to vector<6x256xbf16>
    %c0_29 = arith.constant 0 : index
    %c0_30 = arith.constant 0 : index
    %55 = vector.load %arg8[%c0_29, %c0_30] : memref<256x1024xbf16, #tpu.memory_space<vmem>>, vector<256x1024xbf16>
    %cst_31 = arith.constant dense<0.000000e+00> : vector<6x1024xf32>
    %56 = tpu.matmul %54, %55, %cst_31 {dimension_numbers = #tpu.dot_dimension_numbers<[1], [0], [0], [1], [0, 0, 1, 1], [], []>} : vector<6x256xbf16>, vector<256x1024xbf16>, vector<6x1024xf32> -> vector<6x1024xf32>
    %57 = arith.truncf %56 : vector<6x1024xf32> to vector<6x1024xbf16>
    %c0_32 = arith.constant 0 : index
    %c0_33 = arith.constant 0 : index
    %c0_34 = arith.constant 0 : index
    %58 = vector.load %arg9[%c0_32, %c0_33, %c0_34] : memref<4x12x6xbf16, #tpu.memory_space<vmem>>, vector<1x12x6xbf16>
    %59 = vector.shape_cast %58 : vector<1x12x6xbf16> to vector<12x6xbf16>
    %60 = vector.extract_strided_slice %57 {offsets = [0, 0], sizes = [6, 256], strides = [1, 1]} : vector<6x1024xbf16> to vector<6x256xbf16>
    %cst_35 = arith.constant dense<0.000000e+00> : vector<12x256xf32>
    %61 = tpu.matmul %59, %60, %cst_35 {dimension_numbers = #tpu.dot_dimension_numbers<[1], [0], [0], [1], [0, 0, 1, 1], [], []>} : vector<12x6xbf16>, vector<6x256xbf16>, vector<12x256xf32> -> vector<12x256xf32>
    %c1_36 = arith.constant 1 : index
    %c0_37 = arith.constant 0 : index
    %c0_38 = arith.constant 0 : index
    %62 = vector.load %arg9[%c1_36, %c0_37, %c0_38] : memref<4x12x6xbf16, #tpu.memory_space<vmem>>, vector<1x12x6xbf16>
    %63 = vector.shape_cast %62 : vector<1x12x6xbf16> to vector<12x6xbf16>
    %64 = vector.extract_strided_slice %57 {offsets = [0, 256], sizes = [6, 256], strides = [1, 1]} : vector<6x1024xbf16> to vector<6x256xbf16>
    %cst_39 = arith.constant dense<0.000000e+00> : vector<12x256xf32>
    %65 = tpu.matmul %63, %64, %cst_39 {dimension_numbers = #tpu.dot_dimension_numbers<[1], [0], [0], [1], [0, 0, 1, 1], [], []>} : vector<12x6xbf16>, vector<6x256xbf16>, vector<12x256xf32> -> vector<12x256xf32>
    %66 = arith.addf %61, %65 : vector<12x256xf32>
    %c2_40 = arith.constant 2 : index
    %c0_41 = arith.constant 0 : index
    %c0_42 = arith.constant 0 : index
    %67 = vector.load %arg9[%c2_40, %c0_41, %c0_42] : memref<4x12x6xbf16, #tpu.memory_space<vmem>>, vector<1x12x6xbf16>
    %68 = vector.shape_cast %67 : vector<1x12x6xbf16> to vector<12x6xbf16>
    %69 = vector.extract_strided_slice %57 {offsets = [0, 512], sizes = [6, 256], strides = [1, 1]} : vector<6x1024xbf16> to vector<6x256xbf16>
    %cst_43 = arith.constant dense<0.000000e+00> : vector<12x256xf32>
    %70 = tpu.matmul %68, %69, %cst_43 {dimension_numbers = #tpu.dot_dimension_numbers<[1], [0], [0], [1], [0, 0, 1, 1], [], []>} : vector<12x6xbf16>, vector<6x256xbf16>, vector<12x256xf32> -> vector<12x256xf32>
    %71 = arith.addf %66, %70 : vector<12x256xf32>
    %c3 = arith.constant 3 : index
    %c0_44 = arith.constant 0 : index
    %c0_45 = arith.constant 0 : index
    %72 = vector.load %arg9[%c3, %c0_44, %c0_45] : memref<4x12x6xbf16, #tpu.memory_space<vmem>>, vector<1x12x6xbf16>
    %73 = vector.shape_cast %72 : vector<1x12x6xbf16> to vector<12x6xbf16>
    %74 = vector.extract_strided_slice %57 {offsets = [0, 768], sizes = [6, 256], strides = [1, 1]} : vector<6x1024xbf16> to vector<6x256xbf16>
    %cst_46 = arith.constant dense<0.000000e+00> : vector<12x256xf32>
    %75 = tpu.matmul %73, %74, %cst_46 {dimension_numbers = #tpu.dot_dimension_numbers<[1], [0], [0], [1], [0, 0, 1, 1], [], []>} : vector<12x6xbf16>, vector<6x256xbf16>, vector<12x256xf32> -> vector<12x256xf32>
    %76 = arith.addf %71, %75 : vector<12x256xf32>
    %cst_47 = arith.constant dense<0.000000e+00> : vector<256xf32>
    %77 = vector.multi_reduction <add>, %76, %cst_47 [0] : vector<12x256xf32> to vector<256xf32>
    %78 = vector.shape_cast %77 : vector<256xf32> to vector<1x256xf32>
    %79 = arith.mulf %76, %76 : vector<12x256xf32>
    %cst_48 = arith.constant dense<0.000000e+00> : vector<256xf32>
    %80 = vector.multi_reduction <add>, %79, %cst_48 [0] : vector<12x256xf32> to vector<256xf32>
    %81 = vector.shape_cast %80 : vector<256xf32> to vector<1x256xf32>
    %82 = tpu.concatenate %78, %81 in 0 : vector<1x256xf32>, vector<1x256xf32> -> vector<2x256xf32>
    %c0_49 = arith.constant 0 : index
    %c0_50 = arith.constant 0 : index
    %83 = vector.load %arg10[%c0_49, %c0_50] : memref<256x32xf32, #tpu.memory_space<vmem>>, vector<256x32xf32>
    %cst_51 = arith.constant dense<0.000000e+00> : vector<2x32xf32>
    %84 = tpu.matmul %82, %83, %cst_51 {dimension_numbers = #tpu.dot_dimension_numbers<[1], [0], [0], [1], [0, 0, 1, 1], [], []>} : vector<2x256xf32>, vector<256x32xf32>, vector<2x32xf32> -> vector<2x32xf32>
    %85 = vector.extract_strided_slice %84 {offsets = [0, 0], sizes = [1, 32], strides = [1, 1]} : vector<2x32xf32> to vector<1x32xf32>
    %cst_52 = arith.constant 0.013888889 : f32
    %86 = vector.broadcast %cst_52 : f32 to vector<1x32xf32>
    %87 = arith.mulf %85, %86 : vector<1x32xf32>
    %88 = vector.extract_strided_slice %84 {offsets = [1, 0], sizes = [1, 32], strides = [1, 1]} : vector<2x32xf32> to vector<1x32xf32>
    %cst_53 = arith.constant 0.013888889 : f32
    %89 = vector.broadcast %cst_53 : f32 to vector<1x32xf32>
    %90 = arith.mulf %88, %89 : vector<1x32xf32>
    %91 = arith.mulf %87, %87 : vector<1x32xf32>
    %92 = arith.subf %90, %91 : vector<1x32xf32>
    %c0_54 = arith.constant 0 : index
    %c0_55 = arith.constant 0 : index
    %93 = vector.load %arg12[%c0_54, %c0_55] : memref<1x32xf32, #tpu.memory_space<vmem>>, vector<1x32xf32>
    %cst_56 = arith.constant 9.99999974E-6 : f32
    %94 = vector.broadcast %cst_56 : f32 to vector<1x32xf32>
    %95 = arith.addf %92, %94 : vector<1x32xf32>
    %96 = math.rsqrt %95 : vector<1x32xf32>
    %97 = arith.mulf %93, %96 : vector<1x32xf32>
    %c0_57 = arith.constant 0 : index
    %c0_58 = arith.constant 0 : index
    %98 = vector.load %arg13[%c0_57, %c0_58] : memref<1x32xf32, #tpu.memory_space<vmem>>, vector<1x32xf32>
    %99 = arith.mulf %87, %97 : vector<1x32xf32>
    %100 = arith.subf %98, %99 : vector<1x32xf32>
    %101 = tpu.concatenate %97, %100 in 0 : vector<1x32xf32>, vector<1x32xf32> -> vector<2x32xf32>
    %c0_59 = arith.constant 0 : index
    %c0_60 = arith.constant 0 : index
    %102 = vector.load %arg11[%c0_59, %c0_60] : memref<32x256xf32, #tpu.memory_space<vmem>>, vector<32x256xf32>
    %cst_61 = arith.constant dense<0.000000e+00> : vector<2x256xf32>
    %103 = tpu.matmul %101, %102, %cst_61 {dimension_numbers = #tpu.dot_dimension_numbers<[1], [0], [0], [1], [0, 0, 1, 1], [], []>} : vector<2x32xf32>, vector<32x256xf32>, vector<2x256xf32> -> vector<2x256xf32>
    %104 = vector.extract_strided_slice %103 {offsets = [0, 0], sizes = [1, 256], strides = [1, 1]} : vector<2x256xf32> to vector<1x256xf32>
    %105 = vector.broadcast %104 : vector<1x256xf32> to vector<12x256xf32>
    %106 = arith.mulf %76, %105 : vector<12x256xf32>
    %107 = vector.extract_strided_slice %103 {offsets = [1, 0], sizes = [1, 256], strides = [1, 1]} : vector<2x256xf32> to vector<1x256xf32>
    %108 = vector.broadcast %107 : vector<1x256xf32> to vector<12x256xf32>
    %109 = arith.addf %106, %108 : vector<12x256xf32>
    %cst_62 = arith.constant 0.000000e+00 : f32
    %110 = vector.broadcast %cst_62 : f32 to vector<12x256xf32>
    %111 = arith.maximumf %109, %110 : vector<12x256xf32>
    %112 = arith.truncf %111 : vector<12x256xf32> to vector<12x256xbf16>
    %c0_63 = arith.constant 0 : index
    %c0_64 = arith.constant 0 : index
    %113 = vector.load %arg14[%c0_63, %c0_64] : memref<256x768xbf16, #tpu.memory_space<vmem>>, vector<256x768xbf16>
    %cst_65 = arith.constant dense<0.000000e+00> : vector<12x768xf32>
    %114 = tpu.matmul %112, %113, %cst_65 {dimension_numbers = #tpu.dot_dimension_numbers<[1], [0], [0], [1], [0, 0, 1, 1], [], []>} : vector<12x256xbf16>, vector<256x768xbf16>, vector<12x768xf32> -> vector<12x768xf32>
    %115 = arith.truncf %114 : vector<12x768xf32> to vector<12x768xbf16>
    %c0_66 = arith.constant 0 : index
    %c0_67 = arith.constant 0 : index
    %c0_68 = arith.constant 0 : index
    %116 = vector.load %arg15[%c0_66, %c0_67, %c0_68] : memref<3x26x12xbf16, #tpu.memory_space<vmem>>, vector<1x26x12xbf16>
    %117 = vector.shape_cast %116 : vector<1x26x12xbf16> to vector<26x12xbf16>
    %118 = vector.extract_strided_slice %115 {offsets = [0, 0], sizes = [12, 256], strides = [1, 1]} : vector<12x768xbf16> to vector<12x256xbf16>
    %cst_69 = arith.constant dense<0.000000e+00> : vector<26x256xf32>
    %119 = tpu.matmul %117, %118, %cst_69 {dimension_numbers = #tpu.dot_dimension_numbers<[1], [0], [0], [1], [0, 0, 1, 1], [], []>} : vector<26x12xbf16>, vector<12x256xbf16>, vector<26x256xf32> -> vector<26x256xf32>
    %c1_70 = arith.constant 1 : index
    %c0_71 = arith.constant 0 : index
    %c0_72 = arith.constant 0 : index
    %120 = vector.load %arg15[%c1_70, %c0_71, %c0_72] : memref<3x26x12xbf16, #tpu.memory_space<vmem>>, vector<1x26x12xbf16>
    %121 = vector.shape_cast %120 : vector<1x26x12xbf16> to vector<26x12xbf16>
    %122 = vector.extract_strided_slice %115 {offsets = [0, 256], sizes = [12, 256], strides = [1, 1]} : vector<12x768xbf16> to vector<12x256xbf16>
    %cst_73 = arith.constant dense<0.000000e+00> : vector<26x256xf32>
    %123 = tpu.matmul %121, %122, %cst_73 {dimension_numbers = #tpu.dot_dimension_numbers<[1], [0], [0], [1], [0, 0, 1, 1], [], []>} : vector<26x12xbf16>, vector<12x256xbf16>, vector<26x256xf32> -> vector<26x256xf32>
    %124 = arith.addf %119, %123 : vector<26x256xf32>
    %c2_74 = arith.constant 2 : index
    %c0_75 = arith.constant 0 : index
    %c0_76 = arith.constant 0 : index
    %125 = vector.load %arg15[%c2_74, %c0_75, %c0_76] : memref<3x26x12xbf16, #tpu.memory_space<vmem>>, vector<1x26x12xbf16>
    %126 = vector.shape_cast %125 : vector<1x26x12xbf16> to vector<26x12xbf16>
    %127 = vector.extract_strided_slice %115 {offsets = [0, 512], sizes = [12, 256], strides = [1, 1]} : vector<12x768xbf16> to vector<12x256xbf16>
    %cst_77 = arith.constant dense<0.000000e+00> : vector<26x256xf32>
    %128 = tpu.matmul %126, %127, %cst_77 {dimension_numbers = #tpu.dot_dimension_numbers<[1], [0], [0], [1], [0, 0, 1, 1], [], []>} : vector<26x12xbf16>, vector<12x256xbf16>, vector<26x256xf32> -> vector<26x256xf32>
    %129 = arith.addf %124, %128 : vector<26x256xf32>
    %cst_78 = arith.constant dense<0.000000e+00> : vector<256xf32>
    %130 = vector.multi_reduction <add>, %129, %cst_78 [0] : vector<26x256xf32> to vector<256xf32>
    %131 = vector.shape_cast %130 : vector<256xf32> to vector<1x256xf32>
    %132 = arith.mulf %129, %129 : vector<26x256xf32>
    %cst_79 = arith.constant dense<0.000000e+00> : vector<256xf32>
    %133 = vector.multi_reduction <add>, %132, %cst_79 [0] : vector<26x256xf32> to vector<256xf32>
    %134 = vector.shape_cast %133 : vector<256xf32> to vector<1x256xf32>
    %135 = tpu.concatenate %131, %134 in 0 : vector<1x256xf32>, vector<1x256xf32> -> vector<2x256xf32>
    %c0_80 = arith.constant 0 : index
    %c0_81 = arith.constant 0 : index
    %136 = vector.load %arg16[%c0_80, %c0_81] : memref<256x16xf32, #tpu.memory_space<vmem>>, vector<256x16xf32>
    %cst_82 = arith.constant dense<0.000000e+00> : vector<2x16xf32>
    %137 = tpu.matmul %135, %136, %cst_82 {dimension_numbers = #tpu.dot_dimension_numbers<[1], [0], [0], [1], [0, 0, 1, 1], [], []>} : vector<2x256xf32>, vector<256x16xf32>, vector<2x16xf32> -> vector<2x16xf32>
    %138 = vector.extract_strided_slice %137 {offsets = [0, 0], sizes = [1, 16], strides = [1, 1]} : vector<2x16xf32> to vector<1x16xf32>
    %cst_83 = arith.constant 2.958580e-03 : f32
    %139 = vector.broadcast %cst_83 : f32 to vector<1x16xf32>
    %140 = arith.mulf %138, %139 : vector<1x16xf32>
    %141 = vector.extract_strided_slice %137 {offsets = [1, 0], sizes = [1, 16], strides = [1, 1]} : vector<2x16xf32> to vector<1x16xf32>
    %cst_84 = arith.constant 2.958580e-03 : f32
    %142 = vector.broadcast %cst_84 : f32 to vector<1x16xf32>
    %143 = arith.mulf %141, %142 : vector<1x16xf32>
    %144 = arith.mulf %140, %140 : vector<1x16xf32>
    %145 = arith.subf %143, %144 : vector<1x16xf32>
    %c0_85 = arith.constant 0 : index
    %c0_86 = arith.constant 0 : index
    %146 = vector.load %arg18[%c0_85, %c0_86] : memref<1x16xf32, #tpu.memory_space<vmem>>, vector<1x16xf32>
    %cst_87 = arith.constant 9.99999974E-6 : f32
    %147 = vector.broadcast %cst_87 : f32 to vector<1x16xf32>
    %148 = arith.addf %145, %147 : vector<1x16xf32>
    %149 = math.rsqrt %148 : vector<1x16xf32>
    %150 = arith.mulf %146, %149 : vector<1x16xf32>
    %c0_88 = arith.constant 0 : index
    %c0_89 = arith.constant 0 : index
    %151 = vector.load %arg19[%c0_88, %c0_89] : memref<1x16xf32, #tpu.memory_space<vmem>>, vector<1x16xf32>
    %152 = arith.mulf %140, %150 : vector<1x16xf32>
    %153 = arith.subf %151, %152 : vector<1x16xf32>
    %154 = tpu.concatenate %150, %153 in 0 : vector<1x16xf32>, vector<1x16xf32> -> vector<2x16xf32>
    %c0_90 = arith.constant 0 : index
    %c0_91 = arith.constant 0 : index
    %155 = vector.load %arg17[%c0_90, %c0_91] : memref<16x256xf32, #tpu.memory_space<vmem>>, vector<16x256xf32>
    %cst_92 = arith.constant dense<0.000000e+00> : vector<2x256xf32>
    %156 = tpu.matmul %154, %155, %cst_92 {dimension_numbers = #tpu.dot_dimension_numbers<[1], [0], [0], [1], [0, 0, 1, 1], [], []>} : vector<2x16xf32>, vector<16x256xf32>, vector<2x256xf32> -> vector<2x256xf32>
    %157 = vector.extract_strided_slice %156 {offsets = [0, 0], sizes = [1, 256], strides = [1, 1]} : vector<2x256xf32> to vector<1x256xf32>
    %158 = vector.broadcast %157 : vector<1x256xf32> to vector<26x256xf32>
    %159 = arith.mulf %129, %158 : vector<26x256xf32>
    %160 = vector.extract_strided_slice %156 {offsets = [1, 0], sizes = [1, 256], strides = [1, 1]} : vector<2x256xf32> to vector<1x256xf32>
    %161 = vector.broadcast %160 : vector<1x256xf32> to vector<26x256xf32>
    %162 = arith.addf %159, %161 : vector<26x256xf32>
    %cst_93 = arith.constant 0.000000e+00 : f32
    %163 = vector.broadcast %cst_93 : f32 to vector<26x256xf32>
    %164 = arith.maximumf %162, %163 : vector<26x256xf32>
    %165 = arith.truncf %164 : vector<26x256xf32> to vector<26x256xbf16>
    %c0_94 = arith.constant 0 : index
    %c0_95 = arith.constant 0 : index
    %166 = vector.load %arg20[%c0_94, %c0_95] : memref<256x512xbf16, #tpu.memory_space<vmem>>, vector<256x512xbf16>
    %cst_96 = arith.constant dense<0.000000e+00> : vector<26x512xf32>
    %167 = tpu.matmul %165, %166, %cst_96 {dimension_numbers = #tpu.dot_dimension_numbers<[1], [0], [0], [1], [0, 0, 1, 1], [], []>} : vector<26x256xbf16>, vector<256x512xbf16>, vector<26x512xf32> -> vector<26x512xf32>
    %168 = arith.truncf %167 : vector<26x512xf32> to vector<26x512xbf16>
    %c0_97 = arith.constant 0 : index
    %c0_98 = arith.constant 0 : index
    %c0_99 = arith.constant 0 : index
    %169 = vector.load %arg21[%c0_97, %c0_98, %c0_99] : memref<4x56x26xbf16, #tpu.memory_space<vmem>>, vector<1x56x26xbf16>
    %170 = vector.shape_cast %169 : vector<1x56x26xbf16> to vector<56x26xbf16>
    %171 = vector.extract_strided_slice %168 {offsets = [0, 0], sizes = [26, 128], strides = [1, 1]} : vector<26x512xbf16> to vector<26x128xbf16>
    %cst_100 = arith.constant dense<0.000000e+00> : vector<56x128xf32>
    %172 = tpu.matmul %170, %171, %cst_100 {dimension_numbers = #tpu.dot_dimension_numbers<[1], [0], [0], [1], [0, 0, 1, 1], [], []>} : vector<56x26xbf16>, vector<26x128xbf16>, vector<56x128xf32> -> vector<56x128xf32>
    %c1_101 = arith.constant 1 : index
    %c0_102 = arith.constant 0 : index
    %c0_103 = arith.constant 0 : index
    %173 = vector.load %arg21[%c1_101, %c0_102, %c0_103] : memref<4x56x26xbf16, #tpu.memory_space<vmem>>, vector<1x56x26xbf16>
    %174 = vector.shape_cast %173 : vector<1x56x26xbf16> to vector<56x26xbf16>
    %175 = vector.extract_strided_slice %168 {offsets = [0, 128], sizes = [26, 128], strides = [1, 1]} : vector<26x512xbf16> to vector<26x128xbf16>
    %cst_104 = arith.constant dense<0.000000e+00> : vector<56x128xf32>
    %176 = tpu.matmul %174, %175, %cst_104 {dimension_numbers = #tpu.dot_dimension_numbers<[1], [0], [0], [1], [0, 0, 1, 1], [], []>} : vector<56x26xbf16>, vector<26x128xbf16>, vector<56x128xf32> -> vector<56x128xf32>
    %177 = arith.addf %172, %176 : vector<56x128xf32>
    %c2_105 = arith.constant 2 : index
    %c0_106 = arith.constant 0 : index
    %c0_107 = arith.constant 0 : index
    %178 = vector.load %arg21[%c2_105, %c0_106, %c0_107] : memref<4x56x26xbf16, #tpu.memory_space<vmem>>, vector<1x56x26xbf16>
    %179 = vector.shape_cast %178 : vector<1x56x26xbf16> to vector<56x26xbf16>
    %180 = vector.extract_strided_slice %168 {offsets = [0, 256], sizes = [26, 128], strides = [1, 1]} : vector<26x512xbf16> to vector<26x128xbf16>
    %cst_108 = arith.constant dense<0.000000e+00> : vector<56x128xf32>
    %181 = tpu.matmul %179, %180, %cst_108 {dimension_numbers = #tpu.dot_dimension_numbers<[1], [0], [0], [1], [0, 0, 1, 1], [], []>} : vector<56x26xbf16>, vector<26x128xbf16>, vector<56x128xf32> -> vector<56x128xf32>
    %182 = arith.addf %177, %181 : vector<56x128xf32>
    %c3_109 = arith.constant 3 : index
    %c0_110 = arith.constant 0 : index
    %c0_111 = arith.constant 0 : index
    %183 = vector.load %arg21[%c3_109, %c0_110, %c0_111] : memref<4x56x26xbf16, #tpu.memory_space<vmem>>, vector<1x56x26xbf16>
    %184 = vector.shape_cast %183 : vector<1x56x26xbf16> to vector<56x26xbf16>
    %185 = vector.extract_strided_slice %168 {offsets = [0, 384], sizes = [26, 128], strides = [1, 1]} : vector<26x512xbf16> to vector<26x128xbf16>
    %cst_112 = arith.constant dense<0.000000e+00> : vector<56x128xf32>
    %186 = tpu.matmul %184, %185, %cst_112 {dimension_numbers = #tpu.dot_dimension_numbers<[1], [0], [0], [1], [0, 0, 1, 1], [], []>} : vector<56x26xbf16>, vector<26x128xbf16>, vector<56x128xf32> -> vector<56x128xf32>
    %187 = arith.addf %182, %186 : vector<56x128xf32>
    %c0_113 = arith.constant 0 : index
    %c0_114 = arith.constant 0 : index
    %188 = vector.load %arg22[%c0_113, %c0_114] : memref<1x128xf32, #tpu.memory_space<vmem>>, vector<1x128xf32>
    %189 = vector.broadcast %188 : vector<1x128xf32> to vector<56x128xf32>
    %190 = arith.addf %187, %189 : vector<56x128xf32>
    %c0_115 = arith.constant 0 : index
    %c0_116 = arith.constant 0 : index
    %191 = vector.load %arg23[%c0_115, %c0_116] : memref<56x128xf32, #tpu.memory_space<vmem>>, vector<56x128xf32>
    tpu.vector_store %arg23[%c0_115, %c0_116], %190 {strides = array<i32>} : memref<56x128xf32, #tpu.memory_space<vmem>>, vector<56x128xf32>,
    return
  }
  func.func @transform_0(%arg0: i32) -> (i32, i32) {
    %c0_i32 = arith.constant 0 : i32
    %c0_i32_0 = arith.constant 0 : i32
    %c0_i32_1 = arith.constant 0 : i32
    return %c0_i32, %c0_i32_0 : i32, i32
  }
  func.func @transform_1(%arg0: i32) -> (i32, i32) {
    %c0_i32 = arith.constant 0 : i32
    %c0_i32_0 = arith.constant 0 : i32
    %c0_i32_1 = arith.constant 0 : i32
    return %c0_i32, %c0_i32_0 : i32, i32
  }
  func.func @transform_2(%arg0: i32) -> (i32, i32, i32) {
    %c0_i32 = arith.constant 0 : i32
    %c0_i32_0 = arith.constant 0 : i32
    %c0_i32_1 = arith.constant 0 : i32
    %c0_i32_2 = arith.constant 0 : i32
    return %c0_i32, %c0_i32_0, %c0_i32_1 : i32, i32, i32
  }
  func.func @transform_3(%arg0: i32) -> (i32, i32) {
    %c0_i32 = arith.constant 0 : i32
    %c0_i32_0 = arith.constant 0 : i32
    %c0_i32_1 = arith.constant 0 : i32
    return %c0_i32, %c0_i32_0 : i32, i32
  }
  func.func @transform_4(%arg0: i32) -> (i32, i32) {
    %c0_i32 = arith.constant 0 : i32
    %c0_i32_0 = arith.constant 0 : i32
    %c0_i32_1 = arith.constant 0 : i32
    return %c0_i32, %c0_i32_0 : i32, i32
  }
  func.func @transform_5(%arg0: i32) -> (i32, i32) {
    %c0_i32 = arith.constant 0 : i32
    %c0_i32_0 = arith.constant 0 : i32
    %c0_i32_1 = arith.constant 0 : i32
    return %c0_i32, %c0_i32_0 : i32, i32
  }
  func.func @transform_6(%arg0: i32) -> (i32, i32) {
    %c0_i32 = arith.constant 0 : i32
    %c0_i32_0 = arith.constant 0 : i32
    %c0_i32_1 = arith.constant 0 : i32
    return %c0_i32, %c0_i32_0 : i32, i32
  }
  func.func @transform_7(%arg0: i32) -> (i32, i32) {
    %c0_i32 = arith.constant 0 : i32
    %c0_i32_0 = arith.constant 0 : i32
    %c0_i32_1 = arith.constant 0 : i32
    return %c0_i32, %c0_i32_0 : i32, i32
  }
  func.func @transform_8(%arg0: i32) -> (i32, i32, i32) {
    %c0_i32 = arith.constant 0 : i32
    %c0_i32_0 = arith.constant 0 : i32
    %c0_i32_1 = arith.constant 0 : i32
    %c0_i32_2 = arith.constant 0 : i32
    return %c0_i32, %c0_i32_0, %c0_i32_1 : i32, i32, i32
  }
  func.func @transform_9(%arg0: i32) -> (i32, i32) {
    %c0_i32 = arith.constant 0 : i32
    %c0_i32_0 = arith.constant 0 : i32
    %c0_i32_1 = arith.constant 0 : i32
    return %c0_i32, %c0_i32_0 : i32, i32
  }
  func.func @transform_10(%arg0: i32) -> (i32, i32) {
    %c0_i32 = arith.constant 0 : i32
    %c0_i32_0 = arith.constant 0 : i32
    %c0_i32_1 = arith.constant 0 : i32
    return %c0_i32, %c0_i32_0 : i32, i32
  }
  func.func @transform_11(%arg0: i32) -> (i32, i32) {
    %c0_i32 = arith.constant 0 : i32
    %c0_i32_0 = arith.constant 0 : i32
    %c0_i32_1 = arith.constant 0 : i32
    return %c0_i32, %c0_i32_0 : i32, i32
  }
  func.func @transform_12(%arg0: i32) -> (i32, i32) {
    %c0_i32 = arith.constant 0 : i32
    %c0_i32_0 = arith.constant 0 : i32
    %c0_i32_1 = arith.constant 0 : i32
    return %c0_i32, %c0_i32_0 : i32, i32
  }
  func.func @transform_13(%arg0: i32) -> (i32, i32) {
    %c0_i32 = arith.constant 0 : i32
    %c0_i32_0 = arith.constant 0 : i32
    %c0_i32_1 = arith.constant 0 : i32
    return %c0_i32, %c0_i32_0 : i32, i32
  }
  func.func @transform_14(%arg0: i32) -> (i32, i32, i32) {
    %c0_i32 = arith.constant 0 : i32
    %c0_i32_0 = arith.constant 0 : i32
    %c0_i32_1 = arith.constant 0 : i32
    %c0_i32_2 = arith.constant 0 : i32
    return %c0_i32, %c0_i32_0, %c0_i32_1 : i32, i32, i32
  }
  func.func @transform_15(%arg0: i32) -> (i32, i32) {
    %c0_i32 = arith.constant 0 : i32
    %c0_i32_0 = arith.constant 0 : i32
    %c0_i32_1 = arith.constant 0 : i32
    return %c0_i32, %c0_i32_0 : i32, i32
  }
  func.func @transform_16(%arg0: i32) -> (i32, i32) {
    %c0_i32 = arith.constant 0 : i32
    %c0_i32_0 = arith.constant 0 : i32
    %c0_i32_1 = arith.constant 0 : i32
    return %c0_i32, %c0_i32_0 : i32, i32
  }
  func.func @transform_17(%arg0: i32) -> (i32, i32) {
    %c0_i32 = arith.constant 0 : i32
    %c0_i32_0 = arith.constant 0 : i32
    %c0_i32_1 = arith.constant 0 : i32
    return %c0_i32, %c0_i32_0 : i32, i32
  }
  func.func @transform_18(%arg0: i32) -> (i32, i32) {
    %c0_i32 = arith.constant 0 : i32
    %c0_i32_0 = arith.constant 0 : i32
    %c0_i32_1 = arith.constant 0 : i32
    return %c0_i32, %c0_i32_0 : i32, i32
  }
  func.func @transform_19(%arg0: i32) -> (i32, i32) {
    %c0_i32 = arith.constant 0 : i32
    %c0_i32_0 = arith.constant 0 : i32
    %c0_i32_1 = arith.constant 0 : i32
    return %c0_i32, %c0_i32_0 : i32, i32
  }
  func.func @transform_20(%arg0: i32) -> (i32, i32, i32) {
    %c0_i32 = arith.constant 0 : i32
    %c0_i32_0 = arith.constant 0 : i32
    %c0_i32_1 = arith.constant 0 : i32
    %c0_i32_2 = arith.constant 0 : i32
    return %c0_i32, %c0_i32_0, %c0_i32_1 : i32, i32, i32
  }
  func.func @transform_21(%arg0: i32) -> (i32, i32) {
    %c0_i32 = arith.constant 0 : i32
    %c0_i32_0 = arith.constant 0 : i32
    %c0_i32_1 = arith.constant 0 : i32
    return %c0_i32, %c0_i32_0 : i32, i32
  }
  func.func @transform_22(%arg0: i32) -> (i32, i32) {
    %c0_i32 = arith.constant 0 : i32
    %c0_i32_0 = arith.constant 0 : i32
    %c0_i32_1 = arith.constant 0 : i32
    return %c0_i32, %c0_i32_0 : i32, i32
  }
}

</mosaic_0001>

<bundles_post_ra>
// kernel: _lambda_.1
= control target key start
LH: loop header
LB: loop body
LE: loop exit
PB: predicated region body
PF: predicated region fallthrough
CT: control target
= control target key end

     0   :  { %s7330_s0 = inlined_call_operand.vmem [shape: f32[2,32], index: 0, kind: input, shape index: {}]   ;;  %s7331_s1 = inlined_call_operand.vmem [shape: bf16[32,768], index: 1, kind: input, shape index: {}]   ;;  %s7332_s2 = inlined_call_operand.vmem [shape: bf16[3,6,2], index: 2, kind: input, shape index: {}]   ;;  %s7333_s3 = inlined_call_operand.vmem [shape: f32[256,64], index: 3, kind: input, shape index: {}]   ;;  %s7334_s4 = inlined_call_operand.vmem [shape: f32[64,256], index: 4, kind: input, shape index: {}]   ;;  %s7335_s5 = inlined_call_operand.vmem [shape: f32[1,64], index: 5, kind: input, shape index: {}]   ;;  %s7336_s6 = inlined_call_operand.vmem [shape: f32[1,64], index: 6, kind: input, shape index: {}]   ;;  %s7337_s7 = inlined_call_operand.hbm [shape: bf16[256,1024], index: 7, kind: input, shape index: {}]   ;;  %s7338_s8 = inlined_call_operand.vmem [shape: bf16[4,12,6], index: 8, kind: input, shape index: {}]   ;;  %s7339_s9 = inlined_call_operand.vmem [shape: f32[256,32], index: 9, kind: input, shape index: {}]   ;;  %s7340_s10 = inlined_call_operand.vmem [shape: f32[32,256], index: 10, kind: input, shape index: {}]   ;;  %s7341_s11 = inlined_call_operand.vmem [shape: f32[1,32], index: 11, kind: input, shape index: {}]   ;;  %s7342_s12 = inlined_call_operand.vmem [shape: f32[1,32], index: 12, kind: input, shape index: {}]   ;;  %s7343_s13 = inlined_call_operand.hbm [shape: bf16[256,768], index: 13, kind: input, shape index: {}]   ;;  %s7344_s14 = inlined_call_operand.vmem [shape: bf16[3,26,12], index: 14, kind: input, shape index: {}]   ;;  %s7345_s15 = inlined_call_operand.vmem [shape: f32[256,16], index: 15, kind: input, shape index: {}]   ;;  %s7346_s16 = inlined_call_operand.vmem [shape: f32[16,256], index: 16, kind: input, shape index: {}]   ;;  %s7347_s17 = inlined_call_operand.vmem [shape: f32[1,16], index: 17, kind: input, shape index: {}]   ;;  %s7348_s18 = inlined_call_operand.vmem [shape: f32[1,16], index: 18, kind: input, shape index: {}]   ;;  %s7349_s19 = inlined_call_operand.vmem [shape: bf16[256,512], index: 19, kind: input, shape index: {}]   ;;  %s7350_s20 = inlined_call_operand.vmem [shape: bf16[4,56,26], index: 20, kind: input, shape index: {}]   ;;  %s7351_s21 = inlined_call_operand.vmem [shape: f32[1,128], index: 21, kind: input, shape index: {}]   ;;  %s7352_s22 = inlined_call_operand.hbm [shape: f32[56,128], index: 22, kind: output, shape index: {}]  }
   0x1   :  { %7357 = sst [smem:[#allocation11_spill]] %s7330_s0 }
   0x2   :  { %7358 = sst [smem:[#allocation12_spill]] %s7331_s1 }
   0x3   :  { %7359 = sst [smem:[#allocation13_spill]] %s7332_s2 }
   0x4   :  { %7360 = sst [smem:[#allocation14_spill]] %s7333_s3 }
   0x5   :  { %7361 = sst [smem:[#allocation15_spill]] %s7334_s4 }
   0x6   :  { %7362 = sst [smem:[#allocation16_spill]] %s7335_s5 }
   0x7   :  { %7363 = sst [smem:[#allocation17_spill]] %s7336_s6 }
   0x8   :  { %27 = vsyncpa [#allocation3], 0 }
   0x9   :  { %28 = vsyncpa [#allocation6], 0 }
   0xa   :  { %29 = vsyncpa [#allocation4], 0  ;;  %s48_s29 = sshll.u32 %s7337_s7, 4  ;;  %s5916_s30 = smov [#allocation2]   ;;  %s49_s29 = int_to_ptr.hbm [resolvable:$true] %s48_s29 }
   0xb   :  { %s50_s4 = sshll.u32 %s5916_s30, 4  ;;  %s71_s1 = sshll.u32 %s7343_s13, 4  ;;  %s51_s4 = int_to_ptr.vmem [resolvable:$true] %s50_s4  ;;  %s72_s1 = int_to_ptr.hbm [resolvable:$true] %s71_s1 }
   0xc   :  { %s5917_s5 = smov 512   ;;  %s5918_s24 = smov 32  }
   0xd   :  { %56 = dma.hbm_to_vmem [thread:$0]  %s49_s29, 16384, %s51_s4, [#allocation3], %s5917_s5, %s5917_s5, %s5918_s24  }
   0xe   :  { %s5919_s6 = smov [#allocation5]   ;;  %s5920_s26 = smov 384  }
   0xf   :  { %s73_s25 = sshll.u32 %s5919_s6, 4  ;;  %s5921_s2 = smov 24   ;;  %s74_s25 = int_to_ptr.vmem [resolvable:$true] %s73_s25 }
  0x10   :  { %79 = dma.hbm_to_vmem [thread:$0]  %s72_s1, 12288, %s74_s25, [#allocation6], %s5920_s26, %s5920_s26, %s5921_s2  }
  0x11   :  { %5910 = dma.done.wait [#allocation3], 16384  }
  0x12   :  { %5911 = vsyncadd [#allocation3], 4294950912 }
  0x13   :  { %5912 = dma.done.wait [#allocation6], 12288  }
  0x14   :  { %5913 = vsyncadd [#allocation6], 4294955008  ;;  %vm179_vm0 = vcmask 261120   ;;  %s7364_s3 = sld [smem:[#allocation12_spill]]  ;;  %vm276_vm1 = vcmask 1040384   ;;  %vm272_vm2 = vcmask 15360  }
  0x15   :  { %s7365_s13 = sld [smem:[#allocation11_spill]]  ;;  %vm393_vm3 = vcmask 1045504   ;;  %vm545_vm7 = vcmask 523264   ;;  %vm1600_vm8 = vcmask 1042432   ;;  %vm1596_vm9 = vcmask 48128   ;;  %s5923_s30 = smov 128  }
  0x16   :  { %s7366_s29 = sld [smem:[#allocation13_spill]]  ;;  %vm1790_vm10 = vcmask 1043456   ;;  %vm2778_vm14 = vcmask 97280   ;;  %vm2980_vm15 = vcmask 1041408  }
  0x17   :  { %s7367_s24 = sld [smem:[#allocation14_spill]] }
  0x18   :  { %s7368_s5 = sld [smem:[#allocation15_spill]] }
  0x19   :  { %s7371_s1 = sld [smem:[#allocation16_spill]] }
  0x1a   :  { %v4147_v0 = vld [vmem:[%s7364_s3 + $0x30] sm:$0xf]  ;;  %v5509_v1 = vld [vmem:[%s7364_s3 + $0x44] sm:$0xf0]  ;;  %v5506_v2 = vld [vmem:[%s7364_s3 + $0x34] sm:$0xf] }
  0x1b   :  { %v4148_v3 = vor.u32 %v5509_v1, %v4147_v0  ;;  %v4149_v4 = vld [vmem:[%s7364_s3 + $0x48] sm:$0xf0]  ;;  %v4155_v5 = vld [vmem:[%s7364_s3 + $0x38] sm:$0xf]  ;;  %v5510_v6 = vld [vmem:[%s7364_s3 + $0x4c] sm:$0xf0] }
  0x1c   :  { %v4152_v7 = vor.u32 %v5506_v2, %v4149_v4  ;;  %v4156_v8 = vor.u32 %v5510_v6, %v4155_v5  ;;  %v5507_v9 = vld [vmem:[%s7364_s3 + $0x3c] sm:$0xf]  ;;  %v4157_v10 = vld [vmem:[%s7364_s3 + $0x50] sm:$0xf0]  ;;  %v4123_v11 = vld [vmem:[%s7364_s3] sm:$0xf] }
  0x1d   :  { %189 = vmatpush.bf16.msra.mxu0 %v4148_v3  ;;  %v4160_v12 = vor.u32 %v5507_v9, %v4157_v10  ;;  %v5503_v13 = vld [vmem:[%s7364_s3 + $0x14] sm:$0xf0]  ;;  %v5500_v14 = vld [vmem:[%s7364_s3 + $0x4] sm:$0xf]  ;;  %v4125_v15 = vld [vmem:[%s7364_s3 + $0x18] sm:$0xf0] }
  0x1e   :  { %202 = vmatpush.bf16.msra.mxu1 %v4152_v7  ;;  %215 = vmatpush.bf16.msra.mxu2 %v4156_v8  ;;  %v4124_v16 = vor.u32 %v5503_v13, %v4123_v11  ;;  %v4128_v17 = vor.u32 %v5500_v14, %v4125_v15  ;;  %v4131_v18 = vld [vmem:[%s7364_s3 + $0x8] sm:$0xf]  ;;  %v5504_v19 = vld [vmem:[%s7364_s3 + $0x1c] sm:$0xf0]  ;;  %v5501_v20 = vld [vmem:[%s7364_s3 + $0xc] sm:$0xf] }
  0x1f   :  { %228 = vmatpush.bf16.msra.mxu3 %v4160_v12  ;;  %v4132_v21 = vor.u32 %v5504_v19, %v4131_v18  ;;  %v4133_v22 = vld [vmem:[%s7364_s3 + $0x20] sm:$0xf0]  ;;  %v105_v23 = vld [vmem:[%s7365_s13] sm:$0x3]  ;;  %v5511_v27 = vld [vmem:[%s7364_s3 + $0x54] sm:$0xf0] }
  0x20   :  { %v4163_v24 = vld [vmem:[%s7364_s3 + $0x40] sm:$0xf]  ;;  %v4136_v25 = vor.u32 %v5501_v20, %v4133_v22  ;;  %v106_v26 = vpack.c.bf16 %v105_v23, %v105_v23  ;;  %v5508_v28 = vld [vmem:[%s7364_s3 + $0x44] sm:$0xf]  ;;  %v4165_v29 = vld [vmem:[%s7364_s3 + $0x58] sm:$0xf0] }
  0x21   :  { %190 = vmatpush.bf16.msra.mxu0 %v4124_v16  ;;  %v4164_v30 = vor.u32 %v5511_v27, %v4163_v24  ;;  %v4168_v31 = vor.u32 %v5508_v28, %v4165_v29  ;;  %v4139_v32 = vld [vmem:[%s7364_s3 + $0x10] sm:$0xf]  ;;  %v5505_v33 = vld [vmem:[%s7364_s3 + $0x24] sm:$0xf0]  ;;  %v5502_v34 = vld [vmem:[%s7364_s3 + $0x14] sm:$0xf] }
  0x22   :  { %203 = vmatpush.bf16.msra.mxu1 %v4128_v17  ;;  %216 = vmatpush.bf16.msra.mxu2 %v4132_v21  ;;  %v4141_v35 = vld [vmem:[%s7364_s3 + $0x28] sm:$0xf0]  ;;  %v4140_v36 = vor.u32 %v5505_v33, %v4139_v32  ;;  %v264_v52 = vld [vmem:[%s7366_s29] sm:$0x7]  ;;  %v4175_v62 = vld [vmem:[%s7366_s29 + $0x4] sm:$0x7] }
  0x23   :  { %229 = vmatpush.bf16.msra.mxu3 %v4136_v25  ;;  %v4144_v37 = vor.u32 %v5502_v34, %v4141_v35  ;;  %v4180_v9 = vld [vmem:[%s7366_s29 + $0x8] sm:$0x7]  ;;  %v441_v10 = vld [vmem:[%s7367_s24 + $0x78] sm:$0xff]  ;;  %v440_v12 = vld [vmem:[%s7367_s24 + $0x70] sm:$0xff]  ;;  %s7372_s26 = sld [smem:[#allocation17_spill]] }
  0x24   :  { %4169 = vmatmul.msk.bf16.vlgmr.msra.gmra.mxu0 %vm179_vm0, %v106_v26  ;;  %v457_v11 = vld [vmem:[%s7367_s24 + $0xf8] sm:$0xff]  ;;  %v456_v13 = vld [vmem:[%s7367_s24 + $0xf0] sm:$0xff]  ;;  %v439_v14 = vld [vmem:[%s7367_s24 + $0x68] sm:$0xff] }
  0x25   :  { %241 = vmatpush.bf16.msrb.mxu0 %v4164_v30  ;;  %4170 = vmatmul.msk.bf16.vlgmr.msra.gmra.mxu1 %vm179_vm0, %v106_v26  ;;  %v455_v15 = vld [vmem:[%s7367_s24 + $0xe8] sm:$0xff]  ;;  %v438_v16 = vld [vmem:[%s7367_s24 + $0x60] sm:$0xff]  ;;  %v437_v18 = vld [vmem:[%s7367_s24 + $0x58] sm:$0xff] }
  0x26   :  { %254 = vmatpush.bf16.msrb.mxu1 %v4168_v31  ;;  %4171 = vmatmul.msk.bf16.vlgmr.msra.gmra.mxu2 %vm179_vm0, %v106_v26  ;;  %v454_v17 = vld [vmem:[%s7367_s24 + $0xe0] sm:$0xff]  ;;  %v453_v19 = vld [vmem:[%s7367_s24 + $0xd8] sm:$0xff]  ;;  %v436_v20 = vld [vmem:[%s7367_s24 + $0x50] sm:$0xff] }
  0x27   :  { %4172 = vmatmul.msk.bf16.vlgmr.msra.gmra.mxu3 %vm179_vm0, %v106_v26  ;;  %v452_v21 = vld [vmem:[%s7367_s24 + $0xd0] sm:$0xff]  ;;  %v435_v22 = vld [vmem:[%s7367_s24 + $0x48] sm:$0xff]  ;;  %v434_v24 = vld [vmem:[%s7367_s24 + $0x40] sm:$0xff] }
  0x28   :  { %v451_v23 = vld [vmem:[%s7367_s24 + $0xc8] sm:$0xff]  ;;  %v450_v25 = vld [vmem:[%s7367_s24 + $0xc0] sm:$0xff]  ;;  %v433_v28 = vld [vmem:[%s7367_s24 + $0x38] sm:$0xff] }
  0x29   :  { %242 = vmatpush.bf16.msrb.mxu0 %v4140_v36  ;;  %v449_v29 = vld [vmem:[%s7367_s24 + $0xb8] sm:$0xff]  ;;  %v432_v30 = vld [vmem:[%s7367_s24 + $0x30] sm:$0xff]  ;;  %v431_v32 = vld [vmem:[%s7367_s24 + $0x28] sm:$0xff] }
  0x2a   :  { %255 = vmatpush.bf16.msrb.mxu1 %v4144_v37  ;;  %v448_v31 = vld [vmem:[%s7367_s24 + $0xb0] sm:$0xff]  ;;  %v447_v33 = vld [vmem:[%s7367_s24 + $0xa8] sm:$0xff]  ;;  %v430_v34 = vld [vmem:[%s7367_s24 + $0x20] sm:$0xff] }
  0x2b   :  { %v446_v35 = vld [vmem:[%s7367_s24 + $0xa0] sm:$0xff]  ;;  %v429_v36 = vld [vmem:[%s7367_s24 + $0x18] sm:$0xff] }
  0x2c   :  { %v445_v37 = vld [vmem:[%s7367_s24 + $0x98] sm:$0xff] }
  0x34   :  { %4173 = vmatmul.msk.bf16.vlgmr.msrb.gmra.mxu0 %vm179_vm0, %v106_v26 }
  0x35   :  { %4174 = vmatmul.msk.bf16.vlgmr.msrb.gmra.mxu1 %vm179_vm0, %v106_v26 }
  0xa1   :  { %v192_v38 = vpop.f32.mrf.mxu0 }
  0xa2   :  { %v205_v39 = vpop.f32.mrf.mxu1 }
  0xa3   :  { %v261_v40 = vpack.c.bf16 %v205_v39, %v192_v38 }
  0xa5   :  { %v310_v41 = vunpack.c.l.b16 %v261_v40  ;;  %v311_v42 = vunpack.c.h.b16 %v261_v40  ;;  %v428_v40 = vld [vmem:[%s7367_s24 + $0x10] sm:$0xff] }
  0xa7   :  { %v312_v43 = vpack.c.b16 %v310_v41, %v310_v41  ;;  %v313_v44 = vpack.c.b16 %v311_v42, %v311_v42  ;;  %v444_v41 = vld [vmem:[%s7367_s24 + $0x90] sm:$0xff]  ;;  %v427_v42 = vld [vmem:[%s7367_s24 + $0x8] sm:$0xff] }
  0xa9   :  { %v218_v45 = vpop.f32.mrf.mxu2  ;;  %v194_v47 = vpop.f32.mrf.mxu0  ;;  %v318_v48 = vsel %vm276_vm1, %v312_v43, 0  ;;  %v321_v49 = vsel %vm276_vm1, %v313_v44, 0  ;;  %v443_v43 = vld [vmem:[%s7367_s24 + $0x88] sm:$0xff]  ;;  %v426_v44 = vld [vmem:[%s7367_s24] sm:$0xff] }
  0xaa   :  { %v231_v46 = vpop.f32.mrf.mxu3  ;;  %v207_v51 = vpop.f32.mrf.mxu1  ;;  %330 = vmatpush.bf16.msra.mxu0 %v318_v48  ;;  %343 = vmatpush.bf16.msra.mxu1 %v321_v49 }
  0xab   :  { %v262_v50 = vpack.c.bf16 %v231_v46, %v218_v45  ;;  %v442_v45 = vld [vmem:[%s7367_s24 + $0x80] sm:$0xff] }
  0xad   :  { %v268_v53 = vunpack.c.l.b16 %v262_v50  ;;  %v269_v54 = vunpack.c.h.b16 %v262_v50  ;;  %4178 = vmatmul.msk.bf16.vlgmr.msra.gmra.mxu0 %vm272_vm2, %v264_v52  ;;  %4179 = vmatmul.msk.bf16.vlgmr.msra.gmra.mxu1 %vm272_vm2, %v264_v52 }
  0xae   :  { %458 = vmatpush.msrb.mxu0 %v441_v10  ;;  %478 = vmatpush.msrb.mxu1 %v457_v11 }
  0xaf   :  { %v270_v55 = vpack.c.b16 %v268_v53, %v268_v53  ;;  %v271_v56 = vpack.c.b16 %v269_v54, %v269_v54 }
  0xb0   :  { %459 = vmatpush.msrb.mxu0 %v440_v12  ;;  %479 = vmatpush.msrb.mxu1 %v456_v13 }
  0xb1   :  { %v220_v57 = vpop.f32.mrf.mxu2  ;;  %v278_v58 = vsel %vm276_vm1, %v270_v55, 0  ;;  %v281_v59 = vsel %vm276_vm1, %v271_v56, 0  ;;  %v244_v61 = vpop.f32.mrf.mxu0 }
  0xb2   :  { %v233_v60 = vpop.f32.mrf.mxu3  ;;  %290 = vmatpush.bf16.msrb.mxu2 %v278_v58  ;;  %303 = vmatpush.bf16.msrb.mxu3 %v281_v59  ;;  %v257_v63 = vpop.f32.mrf.mxu1 }
  0xb3   :  { %v263_v0 = vpack.c.bf16 %v257_v63, %v244_v61  ;;  %460 = vmatpush.msrb.mxu0 %v439_v14  ;;  %480 = vmatpush.msrb.mxu1 %v455_v15 }
  0xb5   :  { %4176 = vmatmul.msk.bf16.vlgmr.msrb.gmra.mxu2 %vm272_vm2, %v4175_v62  ;;  %4177 = vmatmul.msk.bf16.vlgmr.msrb.gmra.mxu3 %vm272_vm2, %v4175_v62  ;;  %v352_v1 = vunpack.c.l.b16 %v263_v0  ;;  %v353_v2 = vunpack.c.h.b16 %v263_v0 }
  0xb6   :  { %461 = vmatpush.msrb.mxu0 %v438_v16  ;;  %481 = vmatpush.msrb.mxu1 %v454_v17 }
  0xb7   :  { %v354_v3 = vpack.c.b16 %v352_v1, %v352_v1  ;;  %v355_v4 = vpack.c.b16 %v353_v2, %v353_v2 }
  0xb8   :  { %462 = vmatpush.msrb.mxu0 %v437_v18  ;;  %482 = vmatpush.msrb.mxu1 %v453_v19 }
  0xb9   :  { %v246_v5 = vpop.f32.mrf.mxu0  ;;  %v360_v6 = vsel %vm276_vm1, %v354_v3, 0  ;;  %v363_v7 = vsel %vm276_vm1, %v355_v4, 0 }
  0xba   :  { %v259_v8 = vpop.f32.mrf.mxu1  ;;  %372 = vmatpush.bf16.msra.mxu2 %v360_v6  ;;  %385 = vmatpush.bf16.msra.mxu3 %v363_v7 }
  0xbb   :  { %463 = vmatpush.msrb.mxu0 %v436_v20  ;;  %483 = vmatpush.msrb.mxu1 %v452_v21 }
  0xbd   :  { %464 = vmatpush.msrb.mxu0 %v435_v22  ;;  %484 = vmatpush.msrb.mxu1 %v451_v23 }
  0xbf   :  { %465 = vmatpush.msrb.mxu0 %v434_v24  ;;  %485 = vmatpush.msrb.mxu1 %v450_v25 }
  0xc1   :  { %466 = vmatpush.msrb.mxu0 %v433_v28  ;;  %486 = vmatpush.msrb.mxu1 %v449_v29  ;;  %v543_v28 = vld [vmem:[%s7368_s5 + $0x70] sm:$0xff]  ;;  %v544_v29 = vld [vmem:[%s7368_s5 + $0x78] sm:$0xff] }
  0xc2   :  { %557 = vmatpush.msrb.mxu2 %v543_v28  ;;  %577 = vmatpush.msrb.mxu3 %v544_v29  ;;  %v5548_v29 = vld [vmem:[#allocation2 + $0x11c] sm:$0xf0] }
  0xc3   :  { %467 = vmatpush.msrb.mxu0 %v432_v30  ;;  %487 = vmatpush.msrb.mxu1 %v448_v31  ;;  %v541_v31 = vld [vmem:[%s7368_s5 + $0x60] sm:$0xff] }
  0xc4   :  { %558 = vmatpush.msrb.mxu2 %v541_v31  ;;  %v5612_v31 = vld [vmem:[#allocation2 + $0x31c] sm:$0xf0] }
  0xc5   :  { %4181 = vmatmul.msk.bf16.vlgmr.msra.gmra.mxu2 %vm272_vm2, %v4180_v9  ;;  %4182 = vmatmul.msk.bf16.vlgmr.msra.gmra.mxu3 %vm272_vm2, %v4180_v9 }
  0xc6   :  { %468 = vmatpush.msrb.mxu0 %v431_v32  ;;  %488 = vmatpush.msrb.mxu1 %v447_v33  ;;  %v542_v32 = vld [vmem:[%s7368_s5 + $0x68] sm:$0xff] }
  0xc7   :  { %578 = vmatpush.msrb.mxu3 %v542_v32 }
  0xc8   :  { %469 = vmatpush.msrb.mxu0 %v430_v34  ;;  %489 = vmatpush.msrb.mxu1 %v446_v35  ;;  %v539_v34 = vld [vmem:[%s7368_s5 + $0x50] sm:$0xff]  ;;  %v540_v35 = vld [vmem:[%s7368_s5 + $0x58] sm:$0xff] }
  0xc9   :  { %559 = vmatpush.msrb.mxu2 %v539_v34  ;;  %579 = vmatpush.msrb.mxu3 %v540_v35  ;;  %v5544_v34 = vld [vmem:[#allocation2 + $0x104] sm:$0xf] }
  0xca   :  { %470 = vmatpush.msrb.mxu0 %v429_v36  ;;  %490 = vmatpush.msrb.mxu1 %v445_v37  ;;  %v537_v37 = vld [vmem:[%s7368_s5 + $0x40] sm:$0xff]  ;;  %v4317_v35 = vld [vmem:[#allocation2 + $0x120] sm:$0xf0] }
  0xcb   :  { %560 = vmatpush.msrb.mxu2 %v537_v37 }
  0xcc   :  { %471 = vmatpush.msrb.mxu0 %v428_v40  ;;  %491 = vmatpush.msrb.mxu1 %v444_v41  ;;  %v535_v40 = vld [vmem:[%s7368_s5 + $0x30] sm:$0xff]  ;;  %v536_v41 = vld [vmem:[%s7368_s5 + $0x38] sm:$0xff] }
  0xcd   :  { %561 = vmatpush.msrb.mxu2 %v535_v40 }
  0xce   :  { %472 = vmatpush.msrb.mxu0 %v427_v42  ;;  %492 = vmatpush.msrb.mxu1 %v443_v43  ;;  %v533_v43 = vld [vmem:[%s7368_s5 + $0x20] sm:$0xff] }
  0xcf   :  { %562 = vmatpush.msrb.mxu2 %v533_v43  ;;  %v4283_v43 = vld [vmem:[#allocation2 + $0xc0] sm:$0xf] }
  0xd0   :  { %473 = vmatpush.msrb.mxu0 %v426_v44  ;;  %493 = vmatpush.msrb.mxu1 %v442_v45  ;;  %v534_v44 = vld [vmem:[%s7368_s5 + $0x28] sm:$0xff] }
 0x12a   :  { %v332_v26 = vpop.f32.mrf.mxu0  ;;  %v345_v27 = vpop.f32.mrf.mxu1 }
 0x132   :  { %v334_v38 = vpop.f32.mrf.mxu0  ;;  %v347_v39 = vpop.f32.mrf.mxu1 }
 0x133   :  { %v538_v38 = vld [vmem:[%s7368_s5 + $0x48] sm:$0xff] }
 0x134   :  { %580 = vmatpush.msrb.mxu3 %v538_v38  ;;  %v5608_v38 = vld [vmem:[#allocation2 + $0x304] sm:$0xf] }
 0x136   :  { %581 = vmatpush.msrb.mxu3 %v536_v41 }
 0x138   :  { %v292_v46 = vpop.f32.mrf.mxu2  ;;  %v305_v47 = vpop.f32.mrf.mxu3  ;;  %582 = vmatpush.msrb.mxu3 %v534_v44  ;;  %v5540_v44 = vld [vmem:[#allocation2 + $0xdc] sm:$0xf0] }
 0x139   :  { %v333_v50 = vadd.f32 %v332_v26, %v292_v46  ;;  %v346_v51 = vadd.f32 %v345_v27, %v305_v47  ;;  %v531_v46 = vld [vmem:[%s7368_s5 + $0x10] sm:$0xff]  ;;  %v532_v47 = vld [vmem:[%s7368_s5 + $0x18] sm:$0xff] }
 0x13a   :  { %563 = vmatpush.msrb.mxu2 %v531_v46  ;;  %583 = vmatpush.msrb.mxu3 %v532_v47  ;;  %v5604_v47 = vld [vmem:[#allocation2 + $0x2dc] sm:$0xf0] }
 0x140   :  { %v294_v48 = vpop.f32.mrf.mxu2  ;;  %v307_v49 = vpop.f32.mrf.mxu3 }
 0x141   :  { %v529_v48 = vld [vmem:[%s7368_s5] sm:$0xff]  ;;  %v530_v49 = vld [vmem:[%s7368_s5 + $0x8] sm:$0xff] }
 0x142   :  { %564 = vmatpush.msrb.mxu2 %v529_v48  ;;  %584 = vmatpush.msrb.mxu3 %v530_v49  ;;  %v5536_v48 = vld [vmem:[#allocation2 + $0xc4] sm:$0xf] }
 0x143   :  { %v4285_v49 = vld [vmem:[#allocation2 + $0xe0] sm:$0xf0] }
 0x148   :  { %v374_v52 = vpop.f32.mrf.mxu2  ;;  %v387_v53 = vpop.f32.mrf.mxu3 }
 0x149   :  { %v6244_v54 = vadd.f32 %v374_v52, %v333_v50  ;;  %v6246_v55 = vadd.f32 %v387_v53, %v346_v51  ;;  %v4411_v50 = vld [vmem:[#allocation2 + $0x1c0] sm:$0xf] }
 0x14a   :  { %v5572_v51 = vld [vmem:[#allocation2 + $0x1dc] sm:$0xf0] }
 0x14b   :  { %v394_v56 = vsel %vm393_vm3, %v6244_v54, 0.0  ;;  %v408_v57 = vmul.f32 %v6244_v54, %v6244_v54  ;;  %v401_v58 = vsel %vm393_vm3, %v6246_v55, 0.0  ;;  %v409_v59 = vmul.f32 %v6246_v55, %v6246_v55  ;;  %v4667_v52 = vld [vmem:[#allocation2 + $0x3c0] sm:$0xf] }
 0x14c   :  { %v395_v60 = vrot.slane %v394_v56, 4  ;;  %v402_v61 = vrot.slane %v401_v58, 4  ;;  %v4412_v53 = vor.u32 %v5572_v51, %v4411_v50  ;;  %v5600_v51 = vld [vmem:[#allocation2 + $0x2c4] sm:$0xf] }
 0x14d   :  { %v410_v62 = vsel %vm393_vm3, %v408_v57, 0.0  ;;  %v417_v63 = vsel %vm393_vm3, %v409_v59, 0.0  ;;  %v5568_v57 = vld [vmem:[#allocation2 + $0x1c4] sm:$0xf] }
 0x14e   :  { %v396_v0 = vadd.f32 %v395_v60, %v394_v56  ;;  %v411_v1 = vrot.slane %v410_v62, 4  ;;  %v403_v2 = vadd.f32 %v402_v61, %v401_v58  ;;  %v418_v3 = vrot.slane %v417_v63, 4  ;;  %v5636_v56 = vld [vmem:[#allocation2 + $0x3dc] sm:$0xf0]  ;;  %v4413_v58 = vld [vmem:[#allocation2 + $0x1e0] sm:$0xf0]  ;;  %1369 = vmatpush.bf16.msra.mxu2 %v4412_v53 }
 0x14f   :  { %v4668_v59 = vor.u32 %v5636_v56, %v4667_v52  ;;  %v4416_v60 = vor.u32 %v5568_v57, %v4413_v58  ;;  %v5632_v61 = vld [vmem:[#allocation2 + $0x3c4] sm:$0xf]  ;;  %v4284_v53 = vor.u32 %v5540_v44, %v4283_v43  ;;  %v4288_v57 = vor.u32 %v5536_v48, %v4285_v49  ;;  %v4251_v58 = vld [vmem:[#allocation2 + $0x80] sm:$0xf]  ;;  %v5633_v43 = vld [vmem:[#allocation2 + $0x3cc] sm:$0xf] }
 0x150   :  { %v397_v4 = vrot.slane %v396_v0, 2  ;;  %v412_v5 = vadd.f32 %v411_v1, %v410_v62  ;;  %v404_v6 = vrot.slane %v403_v2, 2  ;;  %v419_v7 = vadd.f32 %v418_v3, %v417_v63  ;;  %v376_v8 = vpop.f32.mrf.mxu2  ;;  %v389_v9 = vpop.f32.mrf.mxu3  ;;  %v4669_v62 = vld [vmem:[#allocation2 + $0x3e0] sm:$0xf0]  ;;  %v4379_v63 = vld [vmem:[#allocation2 + $0x180] sm:$0xf] }
 0x151   :  { %v4672_v1 = vor.u32 %v5632_v61, %v4669_v62  ;;  %v4635_v3 = vld [vmem:[#allocation2 + $0x380] sm:$0xf]  ;;  %1382 = vmatpush.bf16.msra.mxu3 %v4668_v59  ;;  %1395 = vmatpush.bf16.msra.mxu0 %v4416_v60  ;;  %v5560_v8 = vld [vmem:[#allocation2 + $0x184] sm:$0xf]  ;;  %v4677_v44 = vld [vmem:[#allocation2 + $0x3e8] sm:$0xf0] }
 0x152   :  { %v398_v10 = vadd.f32 %v397_v4, %v396_v0  ;;  %v413_v11 = vrot.slane %v412_v5, 2  ;;  %v405_v12 = vadd.f32 %v404_v6, %v403_v2  ;;  %v420_v13 = vrot.slane %v419_v7, 2  ;;  %v5564_v2 = vld [vmem:[#allocation2 + $0x19c] sm:$0xf0]  ;;  %v4381_v9 = vld [vmem:[#allocation2 + $0x1a0] sm:$0xf0] }
 0x153   :  { %v5628_v4 = vld [vmem:[#allocation2 + $0x39c] sm:$0xf0]  ;;  %v4380_v6 = vor.u32 %v5564_v2, %v4379_v63  ;;  %1408 = vmatpush.bf16.msra.mxu1 %v4672_v1  ;;  %v4541_v52 = vld [vmem:[#allocation2 + $0x2e0] sm:$0xf0] }
 0x154   :  { %v399_v14 = vrot.slane %v398_v10, 1  ;;  %v414_v15 = vadd.f32 %v413_v11, %v412_v5  ;;  %v406_v16 = vrot.slane %v405_v12, 1  ;;  %v421_v17 = vadd.f32 %v420_v13, %v419_v7  ;;  %v4347_v13 = vld [vmem:[#allocation2 + $0x140] sm:$0xf]  ;;  %v5528_v63 = vld [vmem:[#allocation2 + $0x84] sm:$0xf] }
 0x155   :  { %v4636_v7 = vor.u32 %v5628_v4, %v4635_v3  ;;  %v4384_v11 = vor.u32 %v5560_v8, %v4381_v9  ;;  %1370 = vmatpush.bf16.msra.mxu2 %v4380_v6  ;;  %v5532_v59 = vld [vmem:[#allocation2 + $0x9c] sm:$0xf0]  ;;  %v4544_v61 = vor.u32 %v5600_v51, %v4541_v52  ;;  %v4253_v1 = vld [vmem:[#allocation2 + $0xa0] sm:$0xf0]  ;;  %v5565_v51 = vld [vmem:[#allocation2 + $0x1a4] sm:$0xf0] }
 0x156   :  { %v415_v18 = vrot.slane %v414_v15, 1  ;;  %v422_v19 = vrot.slane %v421_v17, 1  ;;  %v400_v20 = vadd.f32 %v399_v14, %v398_v10  ;;  %v407_v22 = vadd.f32 %v406_v16, %v405_v12  ;;  %v5624_v10 = vld [vmem:[#allocation2 + $0x384] sm:$0xf]  ;;  %v5556_v16 = vld [vmem:[#allocation2 + $0x15c] sm:$0xf0] }
 0x157   :  { %v4637_v12 = vld [vmem:[#allocation2 + $0x3a0] sm:$0xf0]  ;;  %1383 = vmatpush.bf16.msra.mxu3 %v4636_v7  ;;  %1396 = vmatpush.bf16.msra.mxu0 %v4384_v11  ;;  %v4507_v60 = vld [vmem:[#allocation2 + $0x280] sm:$0xf]  ;;  %v4252_v4 = vor.u32 %v5532_v59, %v4251_v58  ;;  %v4256_v6 = vor.u32 %v5528_v63, %v4253_v1  ;;  %v4643_v52 = vld [vmem:[#allocation2 + $0x388] sm:$0xf] }
 0x158   :  { %v416_v21 = vadd.f32 %v415_v18, %v414_v15  ;;  %v423_v23 = vadd.f32 %v422_v19, %v421_v17  ;;  %v4640_v15 = vor.u32 %v5624_v10, %v4637_v12  ;;  %v4603_v17 = vld [vmem:[#allocation2 + $0x340] sm:$0xf]  ;;  %v4348_v19 = vor.u32 %v5556_v16, %v4347_v13  ;;  %v5592_v2 = vld [vmem:[#allocation2 + $0x284] sm:$0xf]  ;;  %v4389_v58 = vld [vmem:[#allocation2 + $0x1a8] sm:$0xf0] }
 0x159   :  { %v5620_v18 = vld [vmem:[#allocation2 + $0x35c] sm:$0xf0]  ;;  %v4509_v3 = vld [vmem:[#allocation2 + $0x2a0] sm:$0xf0]  ;;  %v5625_v59 = vld [vmem:[#allocation2 + $0x38c] sm:$0xf] }
 0x15a   :  { %v424_v24 = vsel %vm276_vm1, %v400_v20, %v416_v21  ;;  %v425_v25 = vsel %vm276_vm1, %v407_v22, %v423_v23  ;;  %v5552_v20 = vld [vmem:[#allocation2 + $0x144] sm:$0xf]  ;;  %1409 = vmatpush.bf16.msra.mxu1 %v4640_v15  ;;  %1371 = vmatpush.bf16.msra.mxu2 %v4348_v19  ;;  %v5596_v62 = vld [vmem:[#allocation2 + $0x29c] sm:$0xf0]  ;;  %v4512_v10 = vor.u32 %v5592_v2, %v4509_v3  ;;  %v522_v19 = vld [vmem:[%s7372_s26] sm:$0x1] }
 0x15b   :  { %474 = vmatmul.f32.vlgmr.msrb.gmra.mxu0 %v424_v24  ;;  %494 = vmatmul.f32.vlgmr.msrb.gmra.mxu1 %v425_v25  ;;  %v4349_v21 = vld [vmem:[#allocation2 + $0x160] sm:$0xf0]  ;;  %v4604_v24 = vor.u32 %v5620_v18, %v4603_v17  ;;  %v4219_v7 = vld [vmem:[#allocation2 + $0x40] sm:$0xf]  ;;  %v4355_v1 = vld [vmem:[#allocation2 + $0x148] sm:$0xf] }
 0x15c   :  { %v5616_v22 = vld [vmem:[#allocation2 + $0x344] sm:$0xf]  ;;  %v4352_v25 = vor.u32 %v5552_v20, %v4349_v21  ;;  %v5524_v8 = vld [vmem:[#allocation2 + $0x5c] sm:$0xf0]  ;;  %v5557_v2 = vld [vmem:[#allocation2 + $0x164] sm:$0xf0] }
 0x15d   :  { %1384 = vmatpush.bf16.msra.mxu3 %v4604_v24  ;;  %v4475_v9 = vld [vmem:[#allocation2 + $0x240] sm:$0xf]  ;;  %v5520_v12 = vld [vmem:[#allocation2 + $0x44] sm:$0xf]  ;;  %v4220_v18 = vor.u32 %v5524_v8, %v4219_v7  ;;  %v4611_v3 = vld [vmem:[#allocation2 + $0x348] sm:$0xf] }
 0x15e   :  { %1397 = vmatpush.bf16.msra.mxu0 %v4352_v25  ;;  %v5588_v11 = vld [vmem:[#allocation2 + $0x25c] sm:$0xf0]  ;;  %v4221_v13 = vld [vmem:[#allocation2 + $0x60] sm:$0xf0]  ;;  %v5617_v7 = vld [vmem:[#allocation2 + $0x34c] sm:$0xf] }
 0x15f   :  { %v5584_v15 = vld [vmem:[#allocation2 + $0x244] sm:$0xf]  ;;  %v4476_v20 = vor.u32 %v5588_v11, %v4475_v9  ;;  %v4224_v21 = vor.u32 %v5520_v12, %v4221_v13  ;;  %v4613_v8 = vld [vmem:[#allocation2 + $0x368] sm:$0xf0]  ;;  %v4356_v9 = vor.u32 %v5557_v2, %v4355_v1  ;;  %v4323_v12 = vld [vmem:[#allocation2 + $0x108] sm:$0xf] }
 0x160   :  { %v4477_v16 = vld [vmem:[#allocation2 + $0x260] sm:$0xf0]  ;;  %v5549_v13 = vld [vmem:[#allocation2 + $0x124] sm:$0xf0] }
 0x161   :  { %v4480_v25 = vor.u32 %v5584_v15, %v4477_v16  ;;  %v4616_v15 = vor.u32 %v5617_v7, %v4613_v8  ;;  %v5613_v16 = vld [vmem:[#allocation2 + $0x324] sm:$0xf0]  ;;  %v5577_v8 = vld [vmem:[#allocation2 + $0x20c] sm:$0xf] }
 0x162   :  { %v5517_v1 = vld [vmem:[#allocation2 + $0x24] sm:$0xf0] }
 0x163   :  { %v4451_v2 = vld [vmem:[#allocation2 + $0x208] sm:$0xf] }
 0x1d8   :  { %v475_v26 = vpop.f32.mrf.mxu0  ;;  %v495_v27 = vpop.f32.mrf.mxu1 }
 0x1d9   :  { %v496_v30 = vadd.f32 %v495_v27, %v475_v26  ;;  %v4605_v26 = vld [vmem:[#allocation2 + $0x360] sm:$0xf0]  ;;  %v4315_v27 = vld [vmem:[#allocation2 + $0x100] sm:$0xf] }
 0x1da   :  { %v4608_v28 = vor.u32 %v5616_v22, %v4605_v26  ;;  %v4316_v37 = vor.u32 %v5548_v29, %v4315_v27  ;;  %v4187_v22 = vld [vmem:[#allocation2] sm:$0xf]  ;;  %v4189_v29 = vld [vmem:[#allocation2 + $0x20] sm:$0xf0] }
 0x1db   :  { %v6272_v33 = vmul.f32 0.055555556, %v496_v30  ;;  %v4571_v30 = vld [vmem:[#allocation2 + $0x300] sm:$0xf] }
 0x1dc   :  { %v4572_v41 = vor.u32 %v5612_v31, %v4571_v30  ;;  %1410 = vmatpush.bf16.msra.mxu1 %v4608_v28  ;;  %1372 = vmatpush.bf16.msra.mxu2 %v4316_v37  ;;  %v4443_v26 = vld [vmem:[#allocation2 + $0x200] sm:$0xf]  ;;  %v5512_v28 = vld [vmem:[#allocation2 + $0x4] sm:$0xf]  ;;  %v4675_v37 = vld [vmem:[#allocation2 + $0x3c8] sm:$0xf] }
 0x1dd   :  { %v499_v36 = vmul.f32 %v6272_v33, %v6272_v33  ;;  %v5580_v27 = vld [vmem:[#allocation2 + $0x21c] sm:$0xf0]  ;;  %v5576_v30 = vld [vmem:[#allocation2 + $0x204] sm:$0xf] }
 0x1de   :  { %1385 = vmatpush.bf16.msra.mxu3 %v4572_v41  ;;  %v4445_v31 = vld [vmem:[#allocation2 + $0x220] sm:$0xf0]  ;;  %v4444_v41 = vor.u32 %v5580_v27, %v4443_v26  ;;  %v4547_v26 = vld [vmem:[#allocation2 + $0x2c8] sm:$0xf] }
 0x1df   :  { %v501_v39 = vrot.slane %v499_v36, 7  ;;  %v5573_v36 = vld [vmem:[#allocation2 + $0x1e4] sm:$0xf0] }
 0x1e0   :  { %1373 = vmatpush.bf16.msra.mxu2 %v4284_v53  ;;  %v4680_v53 = vor.u32 %v5633_v43, %v4677_v44  ;;  %v4261_v43 = vld [vmem:[#allocation2 + $0xa8] sm:$0xf0] }
 0x1e1   :  { %v503_v42 = vsub.f32 %v6272_v33, %v501_v39  ;;  %v4573_v39 = vld [vmem:[#allocation2 + $0x320] sm:$0xf0] }
 0x1e2   :  { %v4576_v46 = vor.u32 %v5608_v38, %v4573_v39  ;;  %v5637_v38 = vld [vmem:[#allocation2 + $0x3e4] sm:$0xf0]  ;;  %v5569_v39 = vld [vmem:[#allocation2 + $0x1cc] sm:$0xf] }
 0x1e3   :  { %v6301_v45 = vadd.f32 1e-05, %v503_v42  ;;  %v4320_v42 = vor.u32 %v5544_v34, %v4317_v35  ;;  %v4419_v35 = vld [vmem:[#allocation2 + $0x1c8] sm:$0xf]  ;;  %v4676_v48 = vor.u32 %v5637_v38, %v4675_v37 }
 0x1e4   :  { %1411 = vmatpush.bf16.msra.mxu1 %v4576_v46  ;;  %1374 = vmatpush.bf16.msra.mxu2 %v4252_v4  ;;  %v4420_v46 = vor.u32 %v5573_v36, %v4419_v35  ;;  %v5621_v4 = vld [vmem:[#allocation2 + $0x364] sm:$0xf0] }
 0x1e5   :  { %5832 = vrsqrt.f32 %v6301_v45  ;;  %vm512_vm5 = vweird.f32 %v6301_v45  ;;  %1398 = vmatpush.bf16.msra.mxu0 %v4320_v42  ;;  %v4192_v42 = vor.u32 %v5512_v28, %v4189_v29  ;;  %v5605_v28 = vld [vmem:[#allocation2 + $0x2e4] sm:$0xf0]  ;;  %v5537_v29 = vld [vmem:[#allocation2 + $0xcc] sm:$0xf] }
 0x1e6   :  { %v4548_v35 = vor.u32 %v5605_v28, %v4547_v26  ;;  %v4259_v38 = vld [vmem:[#allocation2 + $0x88] sm:$0xf]  ;;  %v4429_v26 = vld [vmem:[#allocation2 + $0x1f0] sm:$0xf0] }
 0x1e8   :  { %1412 = vmatpush.bf16.msra.mxu1 %v4544_v61  ;;  %1375 = vmatpush.bf16.msra.mxu2 %v4220_v18  ;;  %v4325_v18 = vld [vmem:[#allocation2 + $0x128] sm:$0xf0] }
 0x1e9   :  { %1399 = vmatpush.bf16.msra.mxu0 %v4288_v57  ;;  %v5561_v57 = vld [vmem:[#allocation2 + $0x18c] sm:$0xf] }
 0x1ea   :  { %v4392_v63 = vor.u32 %v5561_v57, %v4389_v58  ;;  %v4229_v57 = vld [vmem:[#allocation2 + $0x68] sm:$0xf0] }
 0x1eb   :  { %v6316_v0 = vpop.eup %5832 }
 0x1ec   :  { %v507_v5 = vmul.f32 %v6316_v0, %v6301_v45  ;;  %vm513_vm4 = vweird.f32 %v6316_v0  ;;  %v4539_v45 = vld [vmem:[#allocation2 + $0x2c0] sm:$0xf]  ;;  %1413 = vmatpush.bf16.msra.mxu1 %v4512_v10  ;;  %v4612_v10 = vor.u32 %v5621_v4, %v4611_v3  ;;  %v5513_v4 = vld [vmem:[#allocation2 + $0xc] sm:$0xf] }
 0x1ed   :  { %vm6325_vm6 = vmor %vm512_vm5, %vm513_vm4  ;;  %v4540_v56 = vor.u32 %v5604_v47, %v4539_v45  ;;  %1400 = vmatpush.bf16.msra.mxu0 %v4256_v6  ;;  %v4448_v45 = vor.u32 %v5576_v30, %v4445_v31  ;;  %v4357_v6 = vld [vmem:[#allocation2 + $0x168] sm:$0xf0]  ;;  %vm3136_vm4 = vcmask 130048   ;;  %vm3800_vm5 = vcmask 211968  }
 0x1ee   :  { %v508_v14 = vmul.f32 %v6316_v0, %v507_v5  ;;  %v4508_v5 = vor.u32 %v5596_v62, %v4507_v60  ;;  %v4645_v60 = vld [vmem:[#allocation2 + $0x3a8] sm:$0xf0] }
 0x1ef   :  { %1386 = vmatpush.bf16.msra.mxu3 %v4540_v56  ;;  %v5629_v56 = vld [vmem:[#allocation2 + $0x3a4] sm:$0xf0]  ;;  %v4293_v30 = vld [vmem:[#allocation2 + $0xe8] sm:$0xf0] }
 0x1f0   :  { %v509_v23 = vmul.f32 0.5, %v508_v14  ;;  %1414 = vmatpush.bf16.msra.mxu1 %v4480_v25  ;;  %v4644_v62 = vor.u32 %v5629_v56, %v4643_v52  ;;  %v5541_v25 = vld [vmem:[#allocation2 + $0xe4] sm:$0xf0]  ;;  %v5601_v31 = vld [vmem:[#allocation2 + $0x2cc] sm:$0xf]  ;;  %v4296_v36 = vor.u32 %v5537_v29, %v4293_v30 }
 0x1f1   :  { %1401 = vmatpush.bf16.msra.mxu0 %v4224_v21  ;;  %v4324_v21 = vor.u32 %v5549_v13, %v4323_v12  ;;  %v5521_v56 = vld [vmem:[#allocation2 + $0x4c] sm:$0xf]  ;;  %v5634_v29 = vld [vmem:[#allocation2 + $0x3d4] sm:$0xf] }
 0x1f2   :  { %v510_v32 = vsub.f32 1.5, %v509_v23  ;;  %v5516_v23 = vld [vmem:[#allocation2 + $0x1c] sm:$0xf0]  ;;  %v4685_v30 = vld [vmem:[#allocation2 + $0x3f0] sm:$0xf0] }
 0x1f3   :  { %1387 = vmatpush.bf16.msra.mxu3 %v4508_v5  ;;  %v4188_v34 = vor.u32 %v5516_v23, %v4187_v22  ;;  %v5553_v5 = vld [vmem:[#allocation2 + $0x14c] sm:$0xf] }
 0x1f4   :  { %v511_v40 = vmul.f32 %v6316_v0, %v510_v32  ;;  %1415 = vmatpush.bf16.msra.mxu1 %v4448_v45  ;;  %v4360_v11 = vor.u32 %v5553_v5, %v4357_v6  ;;  %v4197_v5 = vld [vmem:[#allocation2 + $0x28] sm:$0xf0] }
 0x1f5   :  { %1376 = vmatpush.bf16.msra.mxu2 %v4188_v34  ;;  %1402 = vmatpush.bf16.msra.mxu0 %v4192_v42  ;;  %v5529_v42 = vld [vmem:[#allocation2 + $0x8c] sm:$0xf]  ;;  %v4200_v7 = vor.u32 %v5513_v4, %v4197_v5  ;;  %v4589_v4 = vld [vmem:[#allocation2 + $0x330] sm:$0xf0] }
 0x1f6   :  { %v515_v50 = vsel %vm6325_vm6, %v6316_v0, %v511_v40  ;;  %v504_v0 = vld [vmem:[%s7371_s1] sm:$0x1]  ;;  %v4421_v40 = vld [vmem:[#allocation2 + $0x1e8] sm:$0xf0]  ;;  %v4264_v45 = vor.u32 %v5529_v42, %v4261_v43  ;;  %v4653_v42 = vld [vmem:[#allocation2 + $0x3b0] sm:$0xf0] }
 0x1f7   :  { %517 = vst [vmem:[#allocation1] sm:$0xff] %v515_v50  ;;  %1388 = vmatpush.bf16.msra.mxu3 %v4476_v20  ;;  %v4424_v49 = vor.u32 %v5569_v39, %v4421_v40  ;;  %v4387_v50 = vld [vmem:[#allocation2 + $0x188] sm:$0xf]  ;;  %v4581_v20 = vld [vmem:[#allocation2 + $0x328] sm:$0xf0] }
 0x1f8   :  { %v4388_v61 = vor.u32 %v5565_v51, %v4387_v50  ;;  %1460 = vmatpush.bf16.msrb.mxu1 %v4680_v53  ;;  %v5533_v39 = vld [vmem:[#allocation2 + $0xa4] sm:$0xf0] }
 0x1f9   :  { %1447 = vmatpush.bf16.msrb.mxu0 %v4424_v49  ;;  %v4515_v40 = vld [vmem:[#allocation2 + $0x288] sm:$0xf] }
 0x1fa   :  { %v4227_v49 = vld [vmem:[#allocation2 + $0x48] sm:$0xf] }
 0x1fb   :  { %1389 = vmatpush.bf16.msra.mxu3 %v4444_v41  ;;  %v5597_v41 = vld [vmem:[#allocation2 + $0x2a4] sm:$0xf0] }
 0x1fc   :  { %v4516_v44 = vor.u32 %v5597_v41, %v4515_v40  ;;  %v5525_v50 = vld [vmem:[#allocation2 + $0x64] sm:$0xf0]  ;;  %v5562_v40 = vld [vmem:[#allocation2 + $0x194] sm:$0xf] }
 0x1fd   :  { %1448 = vmatpush.bf16.msrb.mxu0 %v4392_v63  ;;  %v4483_v51 = vld [vmem:[#allocation2 + $0x248] sm:$0xf]  ;;  %v4228_v52 = vor.u32 %v5525_v50, %v4227_v49  ;;  %v5626_v41 = vld [vmem:[#allocation2 + $0x394] sm:$0xf]  ;;  %v4619_v49 = vld [vmem:[#allocation2 + $0x350] sm:$0xf] }
 0x1fe   :  { %v519_v14 = vld [vmem:[#allocation1 + $0x1] ss:$9 sm:$0xff]  ;;  %v5622_v50 = vld [vmem:[#allocation2 + $0x36c] sm:$0xf0] }
 0x1ff   :  { %v521_v17 = vmul.f32 %v519_v14, %v504_v0  ;;  %v4648_v0 = vor.u32 %v5625_v59, %v4645_v60  ;;  %v4579_v14 = vld [vmem:[#allocation2 + $0x308] sm:$0xf]  ;;  %v4232_v59 = vor.u32 %v5521_v56, %v4229_v57  ;;  %v5585_v60 = vld [vmem:[#allocation2 + $0x24c] sm:$0xf]  ;;  %v4621_v56 = vld [vmem:[#allocation2 + $0x370] sm:$0xf0] }
 0x200   :  { %v4580_v22 = vor.u32 %v5613_v16, %v4579_v14  ;;  %v5589_v53 = vld [vmem:[#allocation2 + $0x264] sm:$0xf0] }
 0x201   :  { %v523_v24 = vmul.f32 %v521_v17, %v6272_v33  ;;  %1461 = vmatpush.bf16.msrb.mxu1 %v4648_v0  ;;  %1449 = vmatpush.bf16.msrb.mxu0 %v4360_v11  ;;  %v4484_v58 = vor.u32 %v5589_v53, %v4483_v51  ;;  %v4195_v63 = vld [vmem:[#allocation2 + $0x8] sm:$0xf]  ;;  %v5554_v51 = vld [vmem:[#allocation2 + $0x154] sm:$0xf] }
 0x202   :  { %v4196_v3 = vor.u32 %v5517_v1, %v4195_v63  ;;  %v5581_v0 = vld [vmem:[#allocation2 + $0x224] sm:$0xf0]  ;;  %v5618_v53 = vld [vmem:[#allocation2 + $0x354] sm:$0xf]  ;;  %v4587_v63 = vld [vmem:[#allocation2 + $0x310] sm:$0xf] }
 0x203   :  { %v524_v32 = vsub.f32 %v522_v19, %v523_v24  ;;  %v5609_v19 = vld [vmem:[#allocation2 + $0x30c] sm:$0xf]  ;;  %v4291_v24 = vld [vmem:[#allocation2 + $0xc8] sm:$0xf]  ;;  %v4452_v6 = vor.u32 %v5581_v0, %v4451_v2  ;;  %v5614_v1 = vld [vmem:[#allocation2 + $0x32c] sm:$0xf0] }
 0x204   :  { %v4584_v27 = vor.u32 %v5609_v19, %v4581_v20  ;;  %v4292_v34 = vor.u32 %v5541_v25, %v4291_v24  ;;  %v5638_v24 = vld [vmem:[#allocation2 + $0x3ec] sm:$0xf0]  ;;  %v5570_v25 = vld [vmem:[#allocation2 + $0x1d4] sm:$0xf] }
 0x205   :  { %v526_v33 = vperm.slane %v524_v32, 0  ;;  %1462 = vmatpush.bf16.msrb.mxu1 %v4616_v15  ;;  %v4549_v32 = vld [vmem:[#allocation2 + $0x2e8] sm:$0xf0]  ;;  %v5546_v2 = vld [vmem:[#allocation2 + $0x114] sm:$0xf] }
 0x206   :  { %v4552_v37 = vor.u32 %v5601_v31, %v4549_v32  ;;  %v5610_v0 = vld [vmem:[#allocation2 + $0x314] sm:$0xf] }
 0x207   :  { %v528_v47 = vsel %vm276_vm1, %v521_v17, %v526_v33  ;;  %v5545_v17 = vld [vmem:[#allocation2 + $0x10c] sm:$0xf]  ;;  %v4260_v33 = vor.u32 %v5533_v39, %v4259_v38  ;;  %v4651_v38 = vld [vmem:[#allocation2 + $0x390] sm:$0xf] }
 0x208   :  { %4183 = vmatmul.msk.f32.vlgmr.msrb.gmra.mxu2 %vm545_vm7, %v528_v47  ;;  %4184 = vmatmul.msk.f32.vlgmr.msrb.gmra.mxu3 %vm545_vm7, %v528_v47  ;;  %v4328_v23 = vor.u32 %v5545_v17, %v4325_v18  ;;  %v4517_v47 = vld [vmem:[#allocation2 + $0x2a8] sm:$0xf0]  ;;  %v5630_v39 = vld [vmem:[#allocation2 + $0x3ac] sm:$0xf0] }
 0x209   :  { %1421 = vmatpush.bf16.msrb.mxu2 %v4420_v46  ;;  %1434 = vmatpush.bf16.msrb.mxu3 %v4676_v48  ;;  %v5593_v46 = vld [vmem:[#allocation2 + $0x28c] sm:$0xf] }
 0x20a   :  { %1450 = vmatpush.bf16.msrb.mxu0 %v4328_v23  ;;  %1463 = vmatpush.bf16.msrb.mxu1 %v4584_v27  ;;  %v4520_v48 = vor.u32 %v5593_v46, %v4517_v47  ;;  %v4683_v23 = vld [vmem:[#allocation2 + $0x3d0] sm:$0xf] }
 0x20b   :  { %v5558_v46 = vld [vmem:[#allocation2 + $0x16c] sm:$0xf0] }
 0x20d   :  { %1422 = vmatpush.bf16.msrb.mxu2 %v4388_v61  ;;  %1435 = vmatpush.bf16.msrb.mxu3 %v4644_v62  ;;  %v4485_v61 = vld [vmem:[#allocation2 + $0x268] sm:$0xf0] }
 0x20e   :  { %1451 = vmatpush.bf16.msrb.mxu0 %v4296_v36  ;;  %1464 = vmatpush.bf16.msrb.mxu1 %v4552_v37  ;;  %v4488_v62 = vor.u32 %v5585_v60, %v4485_v61  ;;  %v4432_v36 = vor.u32 %v5570_v25, %v4429_v26  ;;  %v4688_v37 = vor.u32 %v5634_v29, %v4685_v30  ;;  %v5550_v60 = vld [vmem:[#allocation2 + $0x12c] sm:$0xf0]  ;;  %v5530_v25 = vld [vmem:[#allocation2 + $0x94] sm:$0xf] }
 0x20f   :  { %v4269_v26 = vld [vmem:[#allocation2 + $0xb0] sm:$0xf0] }
 0x211   :  { %1423 = vmatpush.bf16.msrb.mxu2 %v4356_v9  ;;  %1436 = vmatpush.bf16.msrb.mxu3 %v4612_v10  ;;  %v4453_v9 = vld [vmem:[#allocation2 + $0x228] sm:$0xf0] }
 0x212   :  { %1452 = vmatpush.bf16.msrb.mxu0 %v4264_v45  ;;  %1465 = vmatpush.bf16.msrb.mxu1 %v4520_v48  ;;  %v4456_v10 = vor.u32 %v5577_v8, %v4453_v9  ;;  %v4363_v45 = vld [vmem:[#allocation2 + $0x150] sm:$0xf]  ;;  %v4656_v48 = vor.u32 %v5626_v41, %v4653_v42 }
 0x213   :  { %v4364_v57 = vor.u32 %v5558_v46, %v4363_v45  ;;  %v5542_v8 = vld [vmem:[#allocation2 + $0xec] sm:$0xf0] }
 0x214   :  { %v4203_v41 = vld [vmem:[#allocation2 + $0x10] sm:$0xf] }
 0x215   :  { %1424 = vmatpush.bf16.msrb.mxu2 %v4324_v21  ;;  %1437 = vmatpush.bf16.msrb.mxu3 %v4580_v22  ;;  %v4427_v21 = vld [vmem:[#allocation2 + $0x1d0] sm:$0xf] }
 0x216   :  { %1453 = vmatpush.bf16.msrb.mxu0 %v4232_v59  ;;  %1466 = vmatpush.bf16.msrb.mxu1 %v4488_v62  ;;  %v5574_v22 = vld [vmem:[#allocation2 + $0x1ec] sm:$0xf0]  ;;  %v4624_v62 = vor.u32 %v5618_v53, %v4621_v56  ;;  %v4435_v53 = vld [vmem:[#allocation2 + $0x1d8] sm:$0xf] }
 0x217   :  { %v4331_v59 = vld [vmem:[#allocation2 + $0x110] sm:$0xf]  ;;  %v5575_v56 = vld [vmem:[#allocation2 + $0x1f4] sm:$0xf0] }
 0x218   :  { %v4332_v5 = vor.u32 %v5550_v60, %v4331_v59  ;;  %v4459_v45 = vld [vmem:[#allocation2 + $0x210] sm:$0xf]  ;;  %v5571_v59 = vld [vmem:[#allocation2 + $0x1dc] sm:$0xf] }
 0x219   :  { %1425 = vmatpush.bf16.msrb.mxu2 %v4292_v34  ;;  %1438 = vmatpush.bf16.msrb.mxu3 %v4548_v35  ;;  %v4684_v34 = vor.u32 %v5638_v24, %v4683_v23  ;;  %v5566_v35 = vld [vmem:[#allocation2 + $0x1ac] sm:$0xf0] }
 0x21a   :  { %1454 = vmatpush.bf16.msrb.mxu0 %v4200_v7  ;;  %1467 = vmatpush.bf16.msrb.mxu1 %v4456_v10  ;;  %v4299_v7 = vld [vmem:[#allocation2 + $0xd0] sm:$0xf]  ;;  %v4592_v10 = vor.u32 %v5610_v0, %v4589_v4  ;;  %v4436_v0 = vor.u32 %v5575_v56, %v4435_v53  ;;  %v4275_v53 = vld [vmem:[#allocation2 + $0x98] sm:$0xf] }
 0x21b   :  { %v4523_v23 = vld [vmem:[#allocation2 + $0x290] sm:$0xf]  ;;  %v5535_v56 = vld [vmem:[#allocation2 + $0xb4] sm:$0xf0] }
 0x21c   :  { %v5598_v24 = vld [vmem:[#allocation2 + $0x2ac] sm:$0xf0] }
 0x21d   :  { %1426 = vmatpush.bf16.msrb.mxu2 %v4260_v33  ;;  %1439 = vmatpush.bf16.msrb.mxu3 %v4516_v44  ;;  %v4397_v33 = vld [vmem:[#allocation2 + $0x1b0] sm:$0xf0]  ;;  %v4652_v44 = vor.u32 %v5630_v39, %v4651_v38  ;;  %v4524_v30 = vor.u32 %v5598_v24, %v4523_v23  ;;  %v5582_v46 = vld [vmem:[#allocation2 + $0x22c] sm:$0xf0]  ;;  %v5555_v23 = vld [vmem:[#allocation2 + $0x15c] sm:$0xf] }
 0x21e   :  { %v4400_v47 = vor.u32 %v5562_v40, %v4397_v33  ;;  %v5522_v38 = vld [vmem:[#allocation2 + $0x54] sm:$0xf]  ;;  %v4373_v24 = vld [vmem:[#allocation2 + $0x178] sm:$0xf0] }
 0x21f   :  { %v4237_v39 = vld [vmem:[#allocation2 + $0x70] sm:$0xf0] }
 0x220   :  { %v5586_v40 = vld [vmem:[#allocation2 + $0x254] sm:$0xf] }
 0x221   :  { %1427 = vmatpush.bf16.msrb.mxu2 %v4228_v52  ;;  %1440 = vmatpush.bf16.msrb.mxu3 %v4484_v58  ;;  %v4365_v52 = vld [vmem:[#allocation2 + $0x170] sm:$0xf0]  ;;  %v4620_v58 = vor.u32 %v5622_v50, %v4619_v49 }
 0x222   :  { %v4368_v61 = vor.u32 %v5554_v51, %v4365_v52  ;;  %v4493_v33 = vld [vmem:[#allocation2 + $0x270] sm:$0xf0] }
 0x223   :  { %v5514_v49 = vld [vmem:[#allocation2 + $0x14] sm:$0xf] }
 0x224   :  { %v4205_v50 = vld [vmem:[#allocation2 + $0x30] sm:$0xf0] }
 0x225   :  { %1428 = vmatpush.bf16.msrb.mxu2 %v4196_v3  ;;  %1441 = vmatpush.bf16.msrb.mxu3 %v4452_v6  ;;  %v4333_v3 = vld [vmem:[#allocation2 + $0x130] sm:$0xf0]  ;;  %v4588_v6 = vor.u32 %v5614_v1, %v4587_v63  ;;  %v5635_v63 = vld [vmem:[#allocation2 + $0x3dc] sm:$0xf] }
 0x226   :  { %v4336_v9 = vor.u32 %v5546_v2, %v4333_v3  ;;  %v5578_v51 = vld [vmem:[#allocation2 + $0x214] sm:$0xf]  ;;  %v4693_v1 = vld [vmem:[#allocation2 + $0x3f8] sm:$0xf0]  ;;  %v4208_v2 = vor.u32 %v5514_v49, %v4205_v50 }
 0x227   :  { %v4461_v52 = vld [vmem:[#allocation2 + $0x230] sm:$0xf0]  ;;  %v5603_v49 = vld [vmem:[#allocation2 + $0x2dc] sm:$0xf] }
 0x228   :  { %v4464_v3 = vor.u32 %v5578_v51, %v4461_v52  ;;  %v4565_v50 = vld [vmem:[#allocation2 + $0x2f8] sm:$0xf0] }
 0x28b   :  { %v566_v11 = vpop.f32.mrf.mxu2  ;;  %v586_v12 = vpop.f32.mrf.mxu3 }
 0x28c   :  { %v589_v13 = vperm.slane %v566_v11, 0  ;;  %v590_v14 = vperm.slane %v586_v12, 0  ;;  %v593_v16 = vperm.slane %v566_v11, 1  ;;  %v594_v18 = vperm.slane %v586_v12, 1  ;;  %v4555_v11 = vld [vmem:[#allocation2 + $0x2d0] sm:$0xf] }
 0x28d   :  { %v5606_v12 = vld [vmem:[#allocation2 + $0x2ec] sm:$0xf0] }
 0x28e   :  { %v591_v15 = vmul.f32 %v589_v13, %v6244_v54  ;;  %v592_v17 = vmul.f32 %v590_v14, %v6246_v55  ;;  %v4428_v54 = vor.u32 %v5574_v22, %v4427_v21  ;;  %v4395_v55 = vld [vmem:[#allocation2 + $0x190] sm:$0xf]  ;;  %v5538_v13 = vld [vmem:[#allocation2 + $0xd4] sm:$0xf] }
 0x28f   :  { %v4396_v43 = vor.u32 %v5566_v35, %v4395_v55  ;;  %v4301_v14 = vld [vmem:[#allocation2 + $0xf0] sm:$0xf0]  ;;  %v4272_v55 = vor.u32 %v5530_v25, %v4269_v26  ;;  %v5619_v25 = vld [vmem:[#allocation2 + $0x35c] sm:$0xf] }
 0x290   :  { %v595_v19 = vadd.f32 %v593_v16, %v591_v15  ;;  %v596_v20 = vadd.f32 %v594_v18, %v592_v17  ;;  %v5602_v15 = vld [vmem:[#allocation2 + $0x2d4] sm:$0xf]  ;;  %v4300_v17 = vor.u32 %v5542_v8, %v4299_v7  ;;  %v4556_v18 = vor.u32 %v5606_v12, %v4555_v11  ;;  %v5563_v11 = vld [vmem:[#allocation2 + $0x19c] sm:$0xf] }
 0x291   :  { %v4557_v16 = vld [vmem:[#allocation2 + $0x2f0] sm:$0xf0]  ;;  %v4304_v21 = vor.u32 %v5538_v13, %v4301_v14  ;;  %v4696_v8 = vor.u32 %v5635_v63, %v4693_v1  ;;  %v4405_v12 = vld [vmem:[#allocation2 + $0x1b8] sm:$0xf0] }
 0x292   :  { %v597_v27 = vmax.f32 %v595_v19, 0.0  ;;  %v598_v28 = vmax.f32 %v596_v20, 0.0  ;;  %v4267_v19 = vld [vmem:[#allocation2 + $0x90] sm:$0xf]  ;;  %v4560_v22 = vor.u32 %v5602_v15, %v4557_v16  ;;  %v5627_v13 = vld [vmem:[#allocation2 + $0x39c] sm:$0xf] }
 0x293   :  { %v5534_v20 = vld [vmem:[#allocation2 + $0xac] sm:$0xf0]  ;;  %v4661_v14 = vld [vmem:[#allocation2 + $0x3b8] sm:$0xf0] }
 0x294   :  { %v6345_v31 = vpack.c.bf16 %v597_v27, %v597_v27  ;;  %v6347_v32 = vpack.c.bf16 %v598_v28, %v598_v28  ;;  %v5594_v27 = vld [vmem:[#allocation2 + $0x294] sm:$0xf]  ;;  %v4268_v29 = vor.u32 %v5534_v20, %v4267_v19  ;;  %v4408_v19 = vor.u32 %v5563_v11, %v4405_v12  ;;  %v4629_v26 = vld [vmem:[#allocation2 + $0x378] sm:$0xf0] }
 0x295   :  { %v4525_v28 = vld [vmem:[#allocation2 + $0x2b0] sm:$0xf0]  ;;  %v4664_v20 = vor.u32 %v5627_v13, %v4661_v14  ;;  %v5595_v63 = vld [vmem:[#allocation2 + $0x29c] sm:$0xf] }
 0x296   :  { %1377 = vmatmul.bf16.vlgmr.msra.gmra.mxu2 %v6345_v31  ;;  %1390 = vmatmul.bf16.vlgmr.msra.gmra.mxu3 %v6347_v32  ;;  %v4528_v35 = vor.u32 %v5594_v27, %v4525_v28  ;;  %v4533_v1 = vld [vmem:[#allocation2 + $0x2b8] sm:$0xf0] }
 0x297   :  { %1403 = vmatmul.bf16.vlgmr.msra.gmra.mxu0 %v6345_v31  ;;  %1416 = vmatmul.bf16.vlgmr.msra.gmra.mxu1 %v6347_v32  ;;  %v5587_v11 = vld [vmem:[#allocation2 + $0x25c] sm:$0xf] }
 0x298   :  { %1473 = vmatpush.bf16.msra.mxu2 %v4428_v54  ;;  %1486 = vmatpush.bf16.msra.mxu3 %v4684_v34  ;;  %v4235_v54 = vld [vmem:[#allocation2 + $0x50] sm:$0xf]  ;;  %v4501_v12 = vld [vmem:[#allocation2 + $0x278] sm:$0xf0] }
 0x299   :  { %1499 = vmatpush.bf16.msra.mxu0 %v4432_v36  ;;  %1512 = vmatpush.bf16.msra.mxu1 %v4688_v37  ;;  %v5526_v34 = vld [vmem:[#allocation2 + $0x6c] sm:$0xf0] }
 0x29a   :  { %v4491_v36 = vld [vmem:[#allocation2 + $0x250] sm:$0xf]  ;;  %v4236_v42 = vor.u32 %v5526_v34, %v4235_v54  ;;  %v4376_v54 = vor.u32 %v5555_v23, %v4373_v24  ;;  %v4632_v34 = vor.u32 %v5619_v25, %v4629_v26  ;;  %v5579_v23 = vld [vmem:[#allocation2 + $0x21c] sm:$0xf] }
 0x29b   :  { %v5590_v37 = vld [vmem:[#allocation2 + $0x26c] sm:$0xf0]  ;;  %v4469_v24 = vld [vmem:[#allocation2 + $0x238] sm:$0xf0] }
 0x29c   :  { %1474 = vmatpush.bf16.msra.mxu2 %v4396_v43  ;;  %1487 = vmatpush.bf16.msra.mxu3 %v4652_v44  ;;  %v4492_v43 = vor.u32 %v5590_v37, %v4491_v36  ;;  %v5518_v44 = vld [vmem:[#allocation2 + $0x2c] sm:$0xf0]  ;;  %v5547_v36 = vld [vmem:[#allocation2 + $0x11c] sm:$0xf] }
 0x29d   :  { %1500 = vmatpush.bf16.msra.mxu0 %v4400_v47  ;;  %1513 = vmatpush.bf16.msra.mxu1 %v4656_v48  ;;  %v4240_v47 = vor.u32 %v5522_v38, %v4237_v39  ;;  %v4496_v48 = vor.u32 %v5586_v40, %v4493_v33  ;;  %v4204_v60 = vor.u32 %v5518_v44, %v4203_v41  ;;  %v4341_v37 = vld [vmem:[#allocation2 + $0x138] sm:$0xf0]  ;;  %v4307_v41 = vld [vmem:[#allocation2 + $0xd8] sm:$0xf] }
 0x29e   :  { %v5611_v38 = vld [vmem:[#allocation2 + $0x31c] sm:$0xf] }
 0x29f   :  { %v4597_v39 = vld [vmem:[#allocation2 + $0x338] sm:$0xf0] }
 0x2a0   :  { %1475 = vmatpush.bf16.msra.mxu2 %v4364_v57  ;;  %1488 = vmatpush.bf16.msra.mxu3 %v4620_v58  ;;  %v4691_v57 = vld [vmem:[#allocation2 + $0x3d8] sm:$0xf]  ;;  %v4600_v44 = vor.u32 %v5611_v38, %v4597_v39 }
 0x2a1   :  { %1501 = vmatpush.bf16.msra.mxu0 %v4368_v61  ;;  %1514 = vmatpush.bf16.msra.mxu1 %v4624_v62  ;;  %v5639_v58 = vld [vmem:[#allocation2 + $0x3f4] sm:$0xf0]  ;;  %v4460_v61 = vor.u32 %v5582_v46, %v4459_v45  ;;  %v4437_v62 = vld [vmem:[#allocation2 + $0x1f8] sm:$0xf0] }
 0x2a2   :  { %v4692_v4 = vor.u32 %v5639_v58, %v4691_v57  ;;  %v4440_v7 = vor.u32 %v5571_v59, %v4437_v62  ;;  %v4563_v45 = vld [vmem:[#allocation2 + $0x2d8] sm:$0xf]  ;;  %v4568_v58 = vor.u32 %v5603_v49, %v4565_v50  ;;  %v4277_v62 = vld [vmem:[#allocation2 + $0xb8] sm:$0xf0] }
 0x2a3   :  { %v5607_v46 = vld [vmem:[#allocation2 + $0x2f4] sm:$0xf0] }
 0x2a4   :  { %1476 = vmatpush.bf16.msra.mxu2 %v4332_v5  ;;  %1489 = vmatpush.bf16.msra.mxu3 %v4588_v6  ;;  %v4403_v5 = vld [vmem:[#allocation2 + $0x198] sm:$0xf]  ;;  %v4564_v52 = vor.u32 %v5607_v46, %v4563_v45 }
 0x2a5   :  { %1502 = vmatpush.bf16.msra.mxu0 %v4336_v9  ;;  %1515 = vmatpush.bf16.msra.mxu1 %v4592_v10  ;;  %v5567_v6 = vld [vmem:[#allocation2 + $0x1b4] sm:$0xf0] }
 0x2a6   :  { %1429 = vmatmul.bf16.vlgmr.msrb.gmra.mxu2 %v6345_v31  ;;  %1442 = vmatmul.bf16.vlgmr.msrb.gmra.mxu3 %v6347_v32  ;;  %v4659_v9 = vld [vmem:[#allocation2 + $0x398] sm:$0xf]  ;;  %v4404_v15 = vor.u32 %v5567_v6, %v4403_v5  ;;  %v4536_v6 = vor.u32 %v5595_v63, %v4533_v1 }
 0x2a7   :  { %1455 = vmatmul.bf16.vlgmr.msrb.gmra.mxu0 %v6345_v31  ;;  %1468 = vmatmul.bf16.vlgmr.msrb.gmra.mxu1 %v6347_v32  ;;  %v5631_v10 = vld [vmem:[#allocation2 + $0x3b4] sm:$0xf0] }
 0x2a8   :  { %1477 = vmatpush.bf16.msra.mxu2 %v4300_v17  ;;  %1490 = vmatpush.bf16.msra.mxu3 %v4556_v18  ;;  %v4660_v16 = vor.u32 %v5631_v10, %v4659_v9  ;;  %v4371_v17 = vld [vmem:[#allocation2 + $0x158] sm:$0xf]  ;;  %v5523_v9 = vld [vmem:[#allocation2 + $0x5c] sm:$0xf] }
 0x2a9   :  { %1503 = vmatpush.bf16.msra.mxu0 %v4304_v21  ;;  %1516 = vmatpush.bf16.msra.mxu1 %v4560_v22  ;;  %v5559_v18 = vld [vmem:[#allocation2 + $0x174] sm:$0xf0]  ;;  %v4245_v10 = vld [vmem:[#allocation2 + $0x78] sm:$0xf0] }
 0x2aa   :  { %v4627_v21 = vld [vmem:[#allocation2 + $0x358] sm:$0xf]  ;;  %v4372_v27 = vor.u32 %v5559_v18, %v4371_v17  ;;  %v4248_v17 = vor.u32 %v5523_v9, %v4245_v10  ;;  %v4504_v18 = vor.u32 %v5587_v11, %v4501_v12 }
 0x2ab   :  { %v5623_v22 = vld [vmem:[#allocation2 + $0x374] sm:$0xf0] }
 0x2ac   :  { %1478 = vmatpush.bf16.msra.mxu2 %v4268_v29  ;;  %1491 = vmatpush.bf16.msra.mxu3 %v4524_v30  ;;  %v4628_v28 = vor.u32 %v5623_v22, %v4627_v21  ;;  %v4339_v29 = vld [vmem:[#allocation2 + $0x118] sm:$0xf]  ;;  %v5515_v21 = vld [vmem:[#allocation2 + $0x1c] sm:$0xf] }
 0x2ad   :  { %1504 = vmatpush.bf16.msra.mxu0 %v4272_v55  ;;  %1517 = vmatpush.bf16.msra.mxu1 %v4528_v35  ;;  %v5551_v30 = vld [vmem:[#allocation2 + $0x134] sm:$0xf0]  ;;  %v4213_v22 = vld [vmem:[#allocation2 + $0x38] sm:$0xf0] }
 0x2ae   :  { %v4595_v55 = vld [vmem:[#allocation2 + $0x318] sm:$0xf]  ;;  %v4340_v40 = vor.u32 %v5551_v30, %v4339_v29 }
 0x2af   :  { %v5615_v35 = vld [vmem:[#allocation2 + $0x334] sm:$0xf0] }
 0x2b0   :  { %1479 = vmatpush.bf16.msra.mxu2 %v4236_v42  ;;  %1492 = vmatpush.bf16.msra.mxu3 %v4492_v43  ;;  %v4596_v33 = vor.u32 %v5615_v35, %v4595_v55  ;;  %v5543_v42 = vld [vmem:[#allocation2 + $0xf4] sm:$0xf0]  ;;  %v4344_v43 = vor.u32 %v5547_v36, %v4341_v37 }
 0x2b1   :  { %1505 = vmatpush.bf16.msra.mxu0 %v4240_v47  ;;  %1518 = vmatpush.bf16.msra.mxu1 %v4496_v48  ;;  %v5539_v47 = vld [vmem:[#allocation2 + $0xdc] sm:$0xf]  ;;  %v4308_v51 = vor.u32 %v5543_v42, %v4307_v41  ;;  %v4531_v59 = vld [vmem:[#allocation2 + $0x298] sm:$0xf] }
 0x2b2   :  { %v4309_v48 = vld [vmem:[#allocation2 + $0xf8] sm:$0xf0]  ;;  %v4707_v46 = vld [vmem:[%s7338_s8] sm:$0xf] }
 0x2b3   :  { %v4312_v57 = vor.u32 %v5539_v47, %v4309_v48  ;;  %v5640_v47 = vld [vmem:[%s7338_s8] sm:$0x30] }
 0x2b4   :  { %1480 = vmatpush.bf16.msra.mxu2 %v4204_v60  ;;  %1493 = vmatpush.bf16.msra.mxu3 %v4460_v61  ;;  %v5599_v60 = vld [vmem:[#allocation2 + $0x2b4] sm:$0xf0]  ;;  %v5531_v61 = vld [vmem:[#allocation2 + $0x9c] sm:$0xf]  ;;  %v4708_v50 = vor.u32 %v5640_v47, %v4707_v46  ;;  %v1859_v46 = vld [vmem:[%s7339_s9 + $0xf0] sm:$0xff] }
 0x2b5   :  { %1506 = vmatpush.bf16.msra.mxu0 %v4208_v2  ;;  %1519 = vmatpush.bf16.msra.mxu1 %v4464_v3  ;;  %v4276_v2 = vor.u32 %v5535_v56, %v4275_v53  ;;  %v4532_v3 = vor.u32 %v5599_v60, %v4531_v59  ;;  %v4280_v5 = vor.u32 %v5531_v61, %v4277_v62  ;;  %v4701_v60 = vld [vmem:[%s7338_s8 + $0x8] sm:$0xf]  ;;  %v5641_v61 = vld [vmem:[%s7338_s8 + $0x8] sm:$0x30] }
 0x2b6   :  { %v1842_v47 = vld [vmem:[%s7339_s9 + $0x68] sm:$0xff] }
 0x2b7   :  { %1481 = vmatmul.bf16.vlgmr.msra.gmra.mxu2 %v6345_v31  ;;  %1494 = vmatmul.bf16.vlgmr.msra.gmra.mxu3 %v6347_v32 }
 0x2b8   :  { %1525 = vmatpush.bf16.msrb.mxu2 %v4436_v0  ;;  %1538 = vmatpush.bf16.msrb.mxu3 %v4692_v4  ;;  %v4243_v0 = vld [vmem:[#allocation2 + $0x58] sm:$0xf] }
 0x2b9   :  { %1551 = vmatpush.bf16.msrb.mxu0 %v4440_v7  ;;  %1564 = vmatpush.bf16.msrb.mxu1 %v4696_v8  ;;  %v5527_v4 = vld [vmem:[#allocation2 + $0x74] sm:$0xf0] }
 0x2ba   :  { %1507 = vmatmul.bf16.vlgmr.msra.gmra.mxu0 %v6345_v31  ;;  %1520 = vmatmul.bf16.vlgmr.msra.gmra.mxu1 %v6347_v32  ;;  %v4499_v7 = vld [vmem:[#allocation2 + $0x258] sm:$0xf]  ;;  %v4244_v13 = vor.u32 %v5527_v4, %v4243_v0  ;;  %v4702_v4 = vor.u32 %v5641_v61, %v4701_v60  ;;  %v1854_v60 = vld [vmem:[%s7339_s9 + $0xc8] sm:$0xff] }
 0x2bb   :  { %v5591_v8 = vld [vmem:[#allocation2 + $0x274] sm:$0xf0] }
 0x2bc   :  { %1526 = vmatpush.bf16.msrb.mxu2 %v4404_v15  ;;  %1539 = vmatpush.bf16.msrb.mxu3 %v4660_v16  ;;  %v4500_v14 = vor.u32 %v5591_v8, %v4499_v7  ;;  %v4211_v15 = vld [vmem:[#allocation2 + $0x18] sm:$0xf] }
 0x2bd   :  { %1552 = vmatpush.bf16.msrb.mxu0 %v4408_v19  ;;  %1565 = vmatpush.bf16.msrb.mxu1 %v4664_v20  ;;  %v5519_v16 = vld [vmem:[#allocation2 + $0x34] sm:$0xf0] }
 0x2be   :  { %v4467_v19 = vld [vmem:[#allocation2 + $0x218] sm:$0xf]  ;;  %v4212_v25 = vor.u32 %v5519_v16, %v4211_v15  ;;  %v4715_v16 = vld [vmem:[%s7338_s8 + $0x10] sm:$0xf] }
 0x2bf   :  { %v5583_v20 = vld [vmem:[#allocation2 + $0x234] sm:$0xf0] }
 0x2c0   :  { %1527 = vmatpush.bf16.msrb.mxu2 %v4372_v27  ;;  %1540 = vmatpush.bf16.msrb.mxu3 %v4628_v28  ;;  %v4468_v26 = vor.u32 %v5583_v20, %v4467_v19  ;;  %v4216_v27 = vor.u32 %v5515_v21, %v4213_v22  ;;  %v4472_v28 = vor.u32 %v5579_v23, %v4469_v24  ;;  %v1837_v61 = vld [vmem:[%s7339_s9 + $0x40] sm:$0xff] }
 0x2c1   :  { %1553 = vmatpush.bf16.msrb.mxu0 %v4376_v54  ;;  %1566 = vmatpush.bf16.msrb.mxu1 %v4632_v34 }
 0x2c4   :  { %1528 = vmatpush.bf16.msrb.mxu2 %v4340_v40  ;;  %1541 = vmatpush.bf16.msrb.mxu3 %v4596_v33 }
 0x2c5   :  { %1554 = vmatpush.bf16.msrb.mxu0 %v4344_v43  ;;  %1567 = vmatpush.bf16.msrb.mxu1 %v4600_v44 }
 0x2c8   :  { %1529 = vmatpush.bf16.msrb.mxu2 %v4308_v51  ;;  %1542 = vmatpush.bf16.msrb.mxu3 %v4564_v52 }
 0x2c9   :  { %1555 = vmatpush.bf16.msrb.mxu0 %v4312_v57  ;;  %1568 = vmatpush.bf16.msrb.mxu1 %v4568_v58 }
 0x2cc   :  { %1530 = vmatpush.bf16.msrb.mxu2 %v4276_v2  ;;  %1543 = vmatpush.bf16.msrb.mxu3 %v4532_v3 }
 0x2cd   :  { %1556 = vmatpush.bf16.msrb.mxu0 %v4280_v5  ;;  %1569 = vmatpush.bf16.msrb.mxu1 %v4536_v6 }
 0x2d0   :  { %1531 = vmatpush.bf16.msrb.mxu2 %v4244_v13  ;;  %1544 = vmatpush.bf16.msrb.mxu3 %v4500_v14 }
 0x2d1   :  { %1557 = vmatpush.bf16.msrb.mxu0 %v4248_v17  ;;  %1570 = vmatpush.bf16.msrb.mxu1 %v4504_v18  ;;  %v5642_v17 = vld [vmem:[%s7338_s8 + $0x10] sm:$0x30] }
 0x2d2   :  { %v4716_v24 = vor.u32 %v5642_v17, %v4715_v16  ;;  %v1830_v17 = vld [vmem:[%s7339_s9 + $0x8] sm:$0xff] }
 0x2d4   :  { %1532 = vmatpush.bf16.msrb.mxu2 %v4212_v25  ;;  %1545 = vmatpush.bf16.msrb.mxu3 %v4468_v26 }
 0x2d5   :  { %1558 = vmatpush.bf16.msrb.mxu0 %v4216_v27  ;;  %1571 = vmatpush.bf16.msrb.mxu1 %v4472_v28 }
 0x2d7   :  { %1533 = vmatmul.bf16.vlgmr.msrb.gmra.mxu2 %v6345_v31  ;;  %1546 = vmatmul.bf16.vlgmr.msrb.gmra.mxu3 %v6347_v32 }
 0x2d8   :  { %1559 = vmatmul.bf16.vlgmr.msrb.gmra.mxu0 %v6345_v31  ;;  %1572 = vmatmul.bf16.vlgmr.msrb.gmra.mxu1 %v6347_v32 }
 0x314   :  { %v1404_v29 = vpop.f32.mrf.mxu0  ;;  %v1417_v30 = vpop.f32.mrf.mxu1 }
 0x315   :  { %v1418_v55 = vadd.f32 %v1417_v30, %v1404_v29 }
 0x319   :  { %v1378_v54 = vpop.f32.mrf.mxu2  ;;  %v1391_v34 = vpop.f32.mrf.mxu3 }
 0x31a   :  { %v1392_v35 = vadd.f32 %v1391_v34, %v1378_v54 }
 0x31c   :  { %v1577_v36 = vpack.c.bf16 %v1418_v55, %v1392_v35  ;;  %v1406_v37 = vpop.f32.mrf.mxu0  ;;  %v1419_v38 = vpop.f32.mrf.mxu1 }
 0x31d   :  { %v4723_v37 = vld [vmem:[%s7338_s8 + $0x18] sm:$0xf]  ;;  %v5643_v38 = vld [vmem:[%s7338_s8 + $0x18] sm:$0x30] }
 0x31e   :  { %v1641_v39 = vunpack.c.l.b16 %v1577_v36  ;;  %v1642_v40 = vunpack.c.h.b16 %v1577_v36 }
 0x320   :  { %v1643_v33 = vpack.c.b16 %v1641_v39, %v1641_v39  ;;  %v1644_v41 = vpack.c.b16 %v1642_v40, %v1642_v40 }
 0x321   :  { %v1380_v42 = vpop.f32.mrf.mxu2  ;;  %v1393_v43 = vpop.f32.mrf.mxu3 }
 0x322   :  { %v1649_v31 = vsel %vm1600_vm8, %v1643_v33, 0  ;;  %v1652_v32 = vsel %vm1600_vm8, %v1644_v41, 0 }
 0x323   :  { %1661 = vmatpush.bf16.msra.mxu0 %v1649_v31  ;;  %1675 = vmatpush.bf16.msra.mxu1 %v1652_v32  ;;  %v4724_v31 = vor.u32 %v5643_v38, %v4723_v37  ;;  %v1844_v32 = vld [vmem:[%s7339_s9 + $0x78] sm:$0xff] }
 0x324   :  { %v1456_v44 = vpop.f32.mrf.mxu0  ;;  %v1469_v45 = vpop.f32.mrf.mxu1 }
 0x325   :  { %v1470_v51 = vadd.f32 %v1469_v45, %v1456_v44  ;;  %v1860_v44 = vld [vmem:[%s7339_s9 + $0xf8] sm:$0xff]  ;;  %v1843_v45 = vld [vmem:[%s7339_s9 + $0x70] sm:$0xff] }
 0x326   :  { %4709 = vmatmul.msk.bf16.vlgmr.msra.gmra.mxu0 %vm1596_vm9, %v4708_v50  ;;  %4710 = vmatmul.msk.bf16.vlgmr.msra.gmra.mxu1 %vm1596_vm9, %v4708_v50  ;;  %v1857_v50 = vld [vmem:[%s7339_s9 + $0xe0] sm:$0xff] }
 0x329   :  { %v1430_v48 = vpop.f32.mrf.mxu2  ;;  %v1443_v49 = vpop.f32.mrf.mxu3 }
 0x32a   :  { %v1444_v52 = vadd.f32 %v1443_v49, %v1430_v48  ;;  %v1858_v48 = vld [vmem:[%s7339_s9 + $0xe8] sm:$0xff]  ;;  %v1841_v49 = vld [vmem:[%s7339_s9 + $0x60] sm:$0xff] }
 0x32c   :  { %v1578_v53 = vpack.c.bf16 %v1470_v51, %v1444_v52  ;;  %v1458_v56 = vpop.f32.mrf.mxu0  ;;  %v1471_v57 = vpop.f32.mrf.mxu1  ;;  %v1840_v51 = vld [vmem:[%s7339_s9 + $0x58] sm:$0xff] }
 0x32d   :  { %v1856_v52 = vld [vmem:[%s7339_s9 + $0xd8] sm:$0xff]  ;;  %v1839_v57 = vld [vmem:[%s7339_s9 + $0x50] sm:$0xff] }
 0x32e   :  { %v1592_v58 = vunpack.c.l.b16 %v1578_v53  ;;  %v1593_v59 = vunpack.c.h.b16 %v1578_v53 }
 0x330   :  { %v1594_v62 = vpack.c.b16 %v1592_v58, %v1592_v58  ;;  %v1595_v63 = vpack.c.b16 %v1593_v59, %v1593_v59  ;;  %v1855_v58 = vld [vmem:[%s7339_s9 + $0xd0] sm:$0xff]  ;;  %v1838_v59 = vld [vmem:[%s7339_s9 + $0x48] sm:$0xff] }
 0x331   :  { %v1432_v1 = vpop.f32.mrf.mxu2  ;;  %v1445_v2 = vpop.f32.mrf.mxu3 }
 0x332   :  { %v1602_v3 = vsel %vm1600_vm8, %v1594_v62, 0  ;;  %v1605_v0 = vsel %vm1600_vm8, %v1595_v63, 0  ;;  %v1853_v62 = vld [vmem:[%s7339_s9 + $0xc0] sm:$0xff]  ;;  %v1836_v2 = vld [vmem:[%s7339_s9 + $0x38] sm:$0xff] }
 0x333   :  { %1614 = vmatpush.bf16.msra.mxu2 %v1602_v3  ;;  %1628 = vmatpush.bf16.msra.mxu3 %v1605_v0  ;;  %v1852_v3 = vld [vmem:[%s7339_s9 + $0xb8] sm:$0xff] }
 0x336   :  { %4703 = vmatmul.msk.bf16.vlgmr.msra.gmra.mxu2 %vm1596_vm9, %v4702_v4  ;;  %4704 = vmatmul.msk.bf16.vlgmr.msra.gmra.mxu3 %vm1596_vm9, %v4702_v4 }
 0x337   :  { %v1508_v5 = vpop.f32.mrf.mxu0  ;;  %v1521_v6 = vpop.f32.mrf.mxu1 }
 0x338   :  { %v1522_v9 = vadd.f32 %v1521_v6, %v1508_v5  ;;  %v1835_v5 = vld [vmem:[%s7339_s9 + $0x30] sm:$0xff] }
 0x339   :  { %v1851_v6 = vld [vmem:[%s7339_s9 + $0xb0] sm:$0xff] }
 0x33a   :  { %v1482_v7 = vpop.f32.mrf.mxu2  ;;  %v1495_v8 = vpop.f32.mrf.mxu3 }
 0x33b   :  { %v1496_v10 = vadd.f32 %v1495_v8, %v1482_v7  ;;  %v1834_v7 = vld [vmem:[%s7339_s9 + $0x28] sm:$0xff] }
 0x33c   :  { %v1850_v8 = vld [vmem:[%s7339_s9 + $0xa8] sm:$0xff] }
 0x33d   :  { %v1579_v11 = vpack.c.bf16 %v1522_v9, %v1496_v10  ;;  %v1833_v9 = vld [vmem:[%s7339_s9 + $0x20] sm:$0xff] }
 0x33e   :  { %v1849_v10 = vld [vmem:[%s7339_s9 + $0xa0] sm:$0xff] }
 0x33f   :  { %v1510_v12 = vpop.f32.mrf.mxu0  ;;  %v1523_v13 = vpop.f32.mrf.mxu1  ;;  %v1691_v14 = vunpack.c.l.b16 %v1579_v11  ;;  %v1692_v15 = vunpack.c.h.b16 %v1579_v11  ;;  %v1832_v11 = vld [vmem:[%s7339_s9 + $0x18] sm:$0xff] }
 0x340   :  { %v1848_v12 = vld [vmem:[%s7339_s9 + $0x98] sm:$0xff]  ;;  %v1831_v13 = vld [vmem:[%s7339_s9 + $0x10] sm:$0xff] }
 0x341   :  { %v1693_v18 = vpack.c.b16 %v1691_v14, %v1691_v14  ;;  %v1694_v19 = vpack.c.b16 %v1692_v15, %v1692_v15  ;;  %v1847_v14 = vld [vmem:[%s7339_s9 + $0x90] sm:$0xff] }
 0x342   :  { %v1484_v20 = vpop.f32.mrf.mxu2  ;;  %v1497_v21 = vpop.f32.mrf.mxu3 }
 0x343   :  { %v1699_v22 = vsel %vm1600_vm8, %v1693_v18, 0  ;;  %v1702_v23 = vsel %vm1600_vm8, %v1694_v19, 0  ;;  %v1846_v18 = vld [vmem:[%s7339_s9 + $0x88] sm:$0xff]  ;;  %v1829_v21 = vld [vmem:[%s7339_s9] sm:$0xff] }
 0x344   :  { %1711 = vmatpush.bf16.msrb.mxu2 %v1699_v22  ;;  %1725 = vmatpush.bf16.msrb.mxu3 %v1702_v23  ;;  %v1845_v22 = vld [vmem:[%s7339_s9 + $0x80] sm:$0xff]  ;;  %s5924_s9 = smov 8  }
 0x347   :  { %4717 = vmatmul.msk.bf16.vlgmr.msrb.gmra.mxu2 %vm1596_vm9, %v4716_v24  ;;  %4718 = vmatmul.msk.bf16.vlgmr.msrb.gmra.mxu3 %vm1596_vm9, %v4716_v24 }
 0x348   :  { %1861 = vmatpush.msra.mxu2 %v1844_v32  ;;  %1881 = vmatpush.msra.mxu3 %v1860_v44 }
 0x34a   :  { %1862 = vmatpush.msra.mxu2 %v1843_v45  ;;  %1882 = vmatpush.msra.mxu3 %v1859_v46 }
 0x34c   :  { %1863 = vmatpush.msra.mxu2 %v1842_v47  ;;  %1883 = vmatpush.msra.mxu3 %v1858_v48 }
 0x34e   :  { %1864 = vmatpush.msra.mxu2 %v1841_v49  ;;  %1884 = vmatpush.msra.mxu3 %v1857_v50 }
 0x350   :  { %1865 = vmatpush.msra.mxu2 %v1840_v51  ;;  %1885 = vmatpush.msra.mxu3 %v1856_v52 }
 0x352   :  { %1866 = vmatpush.msra.mxu2 %v1839_v57  ;;  %1886 = vmatpush.msra.mxu3 %v1855_v58 }
 0x354   :  { %1867 = vmatpush.msra.mxu2 %v1838_v59  ;;  %1887 = vmatpush.msra.mxu3 %v1854_v60 }
 0x355   :  { %v1560_v25 = vpop.f32.mrf.mxu0  ;;  %v1573_v26 = vpop.f32.mrf.mxu1 }
 0x356   :  { %v1574_v29 = vadd.f32 %v1573_v26, %v1560_v25  ;;  %1868 = vmatpush.msra.mxu2 %v1837_v61  ;;  %1888 = vmatpush.msra.mxu3 %v1853_v62 }
 0x358   :  { %1869 = vmatpush.msra.mxu2 %v1836_v2  ;;  %1889 = vmatpush.msra.mxu3 %v1852_v3 }
 0x35a   :  { %v1534_v27 = vpop.f32.mrf.mxu2  ;;  %v1547_v28 = vpop.f32.mrf.mxu3  ;;  %1870 = vmatpush.msra.mxu2 %v1835_v5  ;;  %1890 = vmatpush.msra.mxu3 %v1851_v6 }
 0x35b   :  { %v1548_v30 = vadd.f32 %v1547_v28, %v1534_v27 }
 0x35c   :  { %1871 = vmatpush.msra.mxu2 %v1834_v7  ;;  %1891 = vmatpush.msra.mxu3 %v1850_v8 }
 0x35d   :  { %v1580_v54 = vpack.c.bf16 %v1574_v29, %v1548_v30  ;;  %v1562_v34 = vpop.f32.mrf.mxu0  ;;  %v1575_v55 = vpop.f32.mrf.mxu1 }
 0x35e   :  { %1872 = vmatpush.msra.mxu2 %v1833_v9  ;;  %1892 = vmatpush.msra.mxu3 %v1849_v10 }
 0x35f   :  { %v1745_v35 = vunpack.c.l.b16 %v1580_v54  ;;  %v1746_v36 = vunpack.c.h.b16 %v1580_v54 }
 0x360   :  { %1873 = vmatpush.msra.mxu2 %v1832_v11  ;;  %1893 = vmatpush.msra.mxu3 %v1848_v12 }
 0x361   :  { %v1747_v39 = vpack.c.b16 %v1745_v35, %v1745_v35  ;;  %v1748_v40 = vpack.c.b16 %v1746_v36, %v1746_v36 }
 0x362   :  { %v1536_v33 = vpop.f32.mrf.mxu2  ;;  %v1549_v41 = vpop.f32.mrf.mxu3  ;;  %1874 = vmatpush.msra.mxu2 %v1831_v13  ;;  %1894 = vmatpush.msra.mxu3 %v1847_v14 }
 0x363   :  { %v1753_v42 = vsel %vm1600_vm8, %v1747_v39, 0  ;;  %v1756_v43 = vsel %vm1600_vm8, %v1748_v40, 0 }
 0x364   :  { %1765 = vmatpush.bf16.msrb.mxu0 %v1753_v42  ;;  %1779 = vmatpush.bf16.msrb.mxu1 %v1756_v43 }
 0x365   :  { %1875 = vmatpush.msra.mxu2 %v1830_v17  ;;  %1895 = vmatpush.msra.mxu3 %v1846_v18 }
 0x367   :  { %4725 = vmatmul.msk.bf16.vlgmr.msrb.gmra.mxu0 %vm1596_vm9, %v4724_v31  ;;  %4726 = vmatmul.msk.bf16.vlgmr.msrb.gmra.mxu1 %vm1596_vm9, %v4724_v31 }
 0x368   :  { %1876 = vmatpush.msra.mxu2 %v1829_v21  ;;  %1896 = vmatpush.msra.mxu3 %v1845_v22  ;;  %v1938_v22 = vld [vmem:[%s7340_s10 + $0x30] sm:$0xff] }
 0x369   :  { %1955 = vmatpush.msra.mxu0 %v1938_v22  ;;  %v5021_v22 = vld [vmem:[#allocation5 + $0x258] sm:$0xf0] }
 0x3a3   :  { %v1663_v63 = vpop.f32.mrf.mxu0  ;;  %v1677_v1 = vpop.f32.mrf.mxu1 }
 0x3ab   :  { %v1665_v15 = vpop.f32.mrf.mxu0  ;;  %v1679_v16 = vpop.f32.mrf.mxu1 }
 0x3b9   :  { %v1616_v53 = vpop.f32.mrf.mxu2  ;;  %v1630_v56 = vpop.f32.mrf.mxu3 }
 0x3ba   :  { %v1664_v25 = vadd.f32 %v1663_v63, %v1616_v53  ;;  %v1678_v26 = vadd.f32 %v1677_v1, %v1630_v56 }
 0x3c1   :  { %v1618_v0 = vpop.f32.mrf.mxu2  ;;  %v1632_v4 = vpop.f32.mrf.mxu3 }
 0x3c2   :  { %v1666_v29 = vadd.f32 %v1665_v15, %v1618_v0  ;;  %v1680_v30 = vadd.f32 %v1679_v16, %v1632_v4 }
 0x3ca   :  { %v1713_v19 = vpop.f32.mrf.mxu2  ;;  %v1727_v20 = vpop.f32.mrf.mxu3 }
 0x3cb   :  { %v1732_v54 = vadd.f32 %v1713_v19, %v1664_v25  ;;  %v1733_v34 = vadd.f32 %v1727_v20, %v1678_v26  ;;  %v1936_v25 = vld [vmem:[%s7340_s10 + $0x20] sm:$0xff]  ;;  %v1937_v26 = vld [vmem:[%s7340_s10 + $0x28] sm:$0xff] }
 0x3cc   :  { %1956 = vmatpush.msra.mxu0 %v1936_v25 }
 0x3d2   :  { %v1715_v27 = vpop.f32.mrf.mxu2  ;;  %v1729_v28 = vpop.f32.mrf.mxu3 }
 0x3d3   :  { %v1734_v55 = vadd.f32 %v1715_v27, %v1666_v29  ;;  %v1735_v35 = vadd.f32 %v1729_v28, %v1680_v30  ;;  %v1934_v27 = vld [vmem:[%s7340_s10 + $0x10] sm:$0xff]  ;;  %v1935_v28 = vld [vmem:[%s7340_s10 + $0x18] sm:$0xff]  ;;  %v1932_v29 = vld [vmem:[%s7340_s10] sm:$0xff] }
 0x3d4   :  { %1957 = vmatpush.msra.mxu0 %v1934_v27  ;;  %v1933_v30 = vld [vmem:[%s7340_s10 + $0x8] sm:$0xff]  ;;  %v4803_v27 = vld [vmem:[#allocation5 + $0x90] sm:$0xf] }
 0x3d6   :  { %1958 = vmatpush.msra.mxu0 %v1932_v29 }
 0x3e4   :  { %v1767_v23 = vpop.f32.mrf.mxu0  ;;  %v1781_v24 = vpop.f32.mrf.mxu1 }
 0x3e5   :  { %v6501_v36 = vadd.f32 %v1767_v23, %v1732_v54  ;;  %v6503_v37 = vadd.f32 %v1781_v24, %v1733_v34  ;;  %v1939_v23 = vld [vmem:[%s7340_s10 + $0x38] sm:$0xff]  ;;  %v5689_v34 = vld [vmem:[#allocation5 + $0x164] sm:$0xf0] }
 0x3e6   :  { %1975 = vmatpush.msra.mxu1 %v1939_v23  ;;  %v4899_v54 = vld [vmem:[#allocation5 + $0x150] sm:$0xf] }
 0x3e7   :  { %v1807_v32 = vmul.f32 %v6501_v36, %v6501_v36  ;;  %v1808_v44 = vmul.f32 %v6503_v37, %v6503_v37 }
 0x3e8   :  { %1976 = vmatpush.msra.mxu1 %v1937_v26 }
 0x3ea   :  { %1977 = vmatpush.msra.mxu1 %v1935_v28  ;;  %v4995_v28 = vld [vmem:[#allocation5 + $0x210] sm:$0xf] }
 0x3ec   :  { %v1769_v38 = vpop.f32.mrf.mxu0  ;;  %v1783_v39 = vpop.f32.mrf.mxu1  ;;  %1978 = vmatpush.msra.mxu1 %v1933_v30  ;;  %v5713_v30 = vld [vmem:[#allocation5 + $0x224] sm:$0xf0] }
 0x3ed   :  { %v6505_v40 = vadd.f32 %v1769_v38, %v1734_v55  ;;  %v6507_v33 = vadd.f32 %v1783_v39, %v1735_v35  ;;  %v5091_v55 = vld [vmem:[#allocation5 + $0x2d0] sm:$0xf]  ;;  %v4900_v35 = vor.u32 %v5689_v34, %v4899_v54  ;;  %v5737_v38 = vld [vmem:[#allocation5 + $0x2e4] sm:$0xf0]  ;;  %v5686_v39 = vld [vmem:[#allocation5 + $0x154] sm:$0xf] }
 0x3ee   :  { %v5662_v54 = vld [vmem:[#allocation5 + $0x94] sm:$0xf]  ;;  %v4805_v34 = vld [vmem:[#allocation5 + $0xa8] sm:$0xf0] }
 0x3ef   :  { %v1791_v41 = vsel %vm1790_vm10, %v6505_v40, 0.0  ;;  %v1809_v42 = vmul.f32 %v6505_v40, %v6505_v40  ;;  %v1799_v43 = vsel %vm1790_vm10, %v6507_v33, 0.0  ;;  %v1810_v31 = vmul.f32 %v6507_v33, %v6507_v33  ;;  %2577 = vmatpush.bf16.msrb.mxu0 %v4900_v35  ;;  %v5710_v35 = vld [vmem:[#allocation5 + $0x214] sm:$0xf] }
 0x3f0   :  { %v1792_v45 = vadd.f32 %v1791_v41, %v6501_v36  ;;  %v1800_v46 = vadd.f32 %v1799_v43, %v6503_v37  ;;  %v4901_v41 = vld [vmem:[#allocation5 + $0x168] sm:$0xf0] }
 0x3f1   :  { %v1811_v47 = vsel %vm1790_vm10, %v1809_v42, 0.0  ;;  %v1819_v48 = vsel %vm1790_vm10, %v1810_v31, 0.0  ;;  %v5092_v42 = vor.u32 %v5737_v38, %v5091_v55  ;;  %v4904_v43 = vor.u32 %v5686_v39, %v4901_v41  ;;  %v5734_v31 = vld [vmem:[#allocation5 + $0x2d4] sm:$0xf]  ;;  %v4997_v38 = vld [vmem:[#allocation5 + $0x228] sm:$0xf0] }
 0x3f2   :  { %v1793_v49 = vrot.slane %v1792_v45, 4  ;;  %v1812_v50 = vadd.f32 %v1811_v47, %v1807_v32  ;;  %v1801_v51 = vrot.slane %v1800_v46, 4  ;;  %v1820_v52 = vadd.f32 %v1819_v48, %v1808_v44  ;;  %v5093_v32 = vld [vmem:[#allocation5 + $0x2e8] sm:$0xf0]  ;;  %v4875_v44 = vld [vmem:[#allocation5 + $0x120] sm:$0xf] }
 0x3f3   :  { %v5683_v47 = vld [vmem:[#allocation5 + $0x134] sm:$0xf0]  ;;  %v5067_v48 = vld [vmem:[#allocation5 + $0x2a0] sm:$0xf]  ;;  %2591 = vmatpush.bf16.msrb.mxu1 %v5092_v42  ;;  %2605 = vmatpush.bf16.msrb.mxu2 %v4904_v43  ;;  %v4996_v41 = vor.u32 %v5713_v30, %v4995_v28  ;;  %v4808_v42 = vor.u32 %v5662_v54, %v4805_v34  ;;  %v5735_v28 = vld [vmem:[#allocation5 + $0x2dc] sm:$0xf] }
 0x3f4   :  { %v1794_v53 = vadd.f32 %v1793_v49, %v1792_v45  ;;  %v1813_v56 = vrot.slane %v1812_v50, 4  ;;  %v1802_v57 = vadd.f32 %v1801_v51, %v1800_v46  ;;  %v1821_v58 = vrot.slane %v1820_v52, 4  ;;  %v5731_v49 = vld [vmem:[#allocation5 + $0x2b4] sm:$0xf0]  ;;  %v4779_v43 = vld [vmem:[#allocation5 + $0x60] sm:$0xf] }
 0x3f5   :  { %v5096_v46 = vor.u32 %v5734_v31, %v5093_v32  ;;  %v4876_v51 = vor.u32 %v5683_v47, %v4875_v44  ;;  %v5659_v31 = vld [vmem:[#allocation5 + $0x74] sm:$0xf0]  ;;  %v4971_v32 = vld [vmem:[#allocation5 + $0x1e0] sm:$0xf]  ;;  %v5000_v44 = vor.u32 %v5710_v35, %v4997_v38  ;;  %v5656_v47 = vld [vmem:[#allocation5 + $0x64] sm:$0xf] }
 0x3f6   :  { %v1795_v59 = vrot.slane %v1794_v53, 2  ;;  %v1814_v60 = vadd.f32 %v1813_v56, %v1812_v50  ;;  %v1803_v61 = vrot.slane %v1802_v57, 2  ;;  %v1822_v62 = vadd.f32 %v1821_v58, %v1820_v52  ;;  %v4877_v56 = vld [vmem:[#allocation5 + $0x138] sm:$0xf0]  ;;  %v4883_v38 = vld [vmem:[#allocation5 + $0x128] sm:$0xf] }
 0x3f7   :  { %v5068_v52 = vor.u32 %v5731_v49, %v5067_v48  ;;  %2619 = vmatpush.bf16.msrb.mxu3 %v5096_v46  ;;  %2578 = vmatpush.bf16.msrb.mxu0 %v4876_v51  ;;  %v5707_v46 = vld [vmem:[#allocation5 + $0x1f4] sm:$0xf0]  ;;  %v4781_v48 = vld [vmem:[#allocation5 + $0x78] sm:$0xf0]  ;;  %v5704_v49 = vld [vmem:[#allocation5 + $0x1e4] sm:$0xf]  ;;  %v4780_v51 = vor.u32 %v5659_v31, %v4779_v43 }
 0x3f8   :  { %v1796_v63 = vadd.f32 %v1795_v59, %v1794_v53  ;;  %v1815_v1 = vrot.slane %v1814_v60, 2  ;;  %v1804_v2 = vadd.f32 %v1803_v61, %v1802_v57  ;;  %v1823_v3 = vrot.slane %v1822_v62, 2  ;;  %v5680_v53 = vld [vmem:[#allocation5 + $0x124] sm:$0xf]  ;;  %v5069_v59 = vld [vmem:[#allocation5 + $0x2b8] sm:$0xf0] }
 0x3f9   :  { %v5728_v57 = vld [vmem:[#allocation5 + $0x2a4] sm:$0xf]  ;;  %v4880_v58 = vor.u32 %v5680_v53, %v4877_v56  ;;  %2592 = vmatpush.bf16.msrb.mxu1 %v5068_v52  ;;  %v4972_v52 = vor.u32 %v5707_v46, %v4971_v32  ;;  %v4784_v53 = vor.u32 %v5656_v47, %v4781_v48  ;;  %v4755_v56 = vld [vmem:[#allocation5 + $0x30] sm:$0xf]  ;;  %v5732_v43 = vld [vmem:[#allocation5 + $0x2bc] sm:$0xf0] }
 0x3fa   :  { %v1797_v0 = vrot.slane %v1796_v63, 1  ;;  %v1816_v4 = vadd.f32 %v1815_v1, %v1814_v60  ;;  %v1805_v5 = vrot.slane %v1804_v2, 1  ;;  %v1824_v6 = vadd.f32 %v1823_v3, %v1822_v62  ;;  %v4851_v60 = vld [vmem:[#allocation5 + $0xf0] sm:$0xf]  ;;  %v5681_v31 = vld [vmem:[#allocation5 + $0x12c] sm:$0xf] }
 0x3fb   :  { %v5072_v62 = vor.u32 %v5728_v57, %v5069_v59  ;;  %v5043_v1 = vld [vmem:[#allocation5 + $0x270] sm:$0xf]  ;;  %2606 = vmatpush.bf16.msrb.mxu2 %v4880_v58  ;;  %v5653_v57 = vld [vmem:[#allocation5 + $0x44] sm:$0xf0]  ;;  %v4885_v32 = vld [vmem:[#allocation5 + $0x140] sm:$0xf0] }
 0x3fc   :  { %v1817_v7 = vrot.slane %v1816_v4, 1  ;;  %v1825_v8 = vrot.slane %v1824_v6, 1  ;;  %v1798_v9 = vadd.f32 %v1797_v0, %v1796_v63  ;;  %v1806_v11 = vadd.f32 %v1805_v5, %v1804_v2  ;;  %v5677_v63 = vld [vmem:[#allocation5 + $0x104] sm:$0xf0]  ;;  %v5674_v0 = vld [vmem:[#allocation5 + $0xf4] sm:$0xf] }
 0x3fd   :  { %v5725_v2 = vld [vmem:[#allocation5 + $0x284] sm:$0xf0]  ;;  %v4852_v3 = vor.u32 %v5677_v63, %v4851_v60  ;;  %v5722_v5 = vld [vmem:[#allocation5 + $0x274] sm:$0xf]  ;;  %2620 = vmatpush.bf16.msrb.mxu3 %v5072_v62  ;;  %v4947_v58 = vld [vmem:[#allocation5 + $0x1b0] sm:$0xf] }
 0x3fe   :  { %v1818_v10 = vadd.f32 %v1817_v7, %v1816_v4  ;;  %v1826_v12 = vadd.f32 %v1825_v8, %v1824_v6  ;;  %v4853_v4 = vld [vmem:[#allocation5 + $0x108] sm:$0xf0]  ;;  %v5044_v7 = vor.u32 %v5725_v2, %v5043_v1  ;;  %v5701_v60 = vld [vmem:[#allocation5 + $0x1c4] sm:$0xf0]  ;;  %v5698_v1 = vld [vmem:[#allocation5 + $0x1b4] sm:$0xf] }
 0x3ff   :  { %v4856_v8 = vor.u32 %v5674_v0, %v4853_v4  ;;  %2579 = vmatpush.bf16.msrb.mxu0 %v4852_v3  ;;  %v4757_v62 = vld [vmem:[#allocation5 + $0x48] sm:$0xf0]  ;;  %v4756_v0 = vor.u32 %v5653_v57, %v4755_v56  ;;  %v1925_v4 = vld [vmem:[%s7342_s12] sm:$0x1]  ;;  %v5077_v46 = vld [vmem:[#allocation5 + $0x2c0] sm:$0xf0] }
 0x400   :  { %v1827_v13 = vsel %vm276_vm1, %v1798_v9, %v1818_v10  ;;  %v1828_v14 = vsel %vm276_vm1, %v1806_v11, %v1826_v12  ;;  %v5045_v9 = vld [vmem:[#allocation5 + $0x288] sm:$0xf0]  ;;  %v4827_v10 = vld [vmem:[#allocation5 + $0xc0] sm:$0xf]  ;;  %v5671_v12 = vld [vmem:[#allocation5 + $0xd4] sm:$0xf0]  ;;  %2593 = vmatpush.bf16.msrb.mxu1 %v5044_v7 }
 0x401   :  { %1877 = vmatmul.f32.vlgmr.msra.gmra.mxu2 %v1827_v13  ;;  %1897 = vmatmul.f32.vlgmr.msra.gmra.mxu3 %v1828_v14  ;;  %v5048_v11 = vor.u32 %v5722_v5, %v5045_v9  ;;  %v5019_v13 = vld [vmem:[#allocation5 + $0x240] sm:$0xf]  ;;  %v5719_v14 = vld [vmem:[#allocation5 + $0x254] sm:$0xf0]  ;;  %v4949_v2 = vld [vmem:[#allocation5 + $0x1c8] sm:$0xf0]  ;;  %v4948_v5 = vor.u32 %v5701_v60, %v4947_v58 }
 0x402   :  { %2607 = vmatpush.bf16.msrb.mxu2 %v4856_v8  ;;  %v5020_v25 = vor.u32 %v5719_v14, %v5019_v13  ;;  %v4731_v7 = vld [vmem:[#allocation5] sm:$0xf]  ;;  %v5647_v8 = vld [vmem:[#allocation5 + $0x14] sm:$0xf0]  ;;  %v5644_v13 = vld [vmem:[#allocation5 + $0x4] sm:$0xf] }
 0x403   :  { %2621 = vmatpush.bf16.msrb.mxu3 %v5048_v11  ;;  %v4923_v11 = vld [vmem:[#allocation5 + $0x180] sm:$0xf]  ;;  %v4733_v14 = vld [vmem:[#allocation5 + $0x18] sm:$0xf0]  ;;  %v4861_v57 = vld [vmem:[#allocation5 + $0x110] sm:$0xf0] }
 0x404   :  { %2594 = vmatpush.bf16.msrb.mxu1 %v5020_v25  ;;  %v5687_v25 = vld [vmem:[#allocation5 + $0x15c] sm:$0xf]  ;;  %s4107_s12 = sshll.u32 %s7352_s22, 4  ;;  %s4108_s12 = int_to_ptr.hbm [resolvable:$true] %s4107_s12 }
 0x405   :  { %v5675_v56 = vld [vmem:[#allocation5 + $0xfc] sm:$0xf] }
 0x406   :  { %v5723_v58 = vld [vmem:[#allocation5 + $0x27c] sm:$0xf] }
 0x408   :  { %2595 = vmatpush.bf16.msrb.mxu1 %v4996_v41  ;;  %v5075_v41 = vld [vmem:[#allocation5 + $0x2a8] sm:$0xf] }
 0x409   :  { %v5076_v48 = vor.u32 %v5732_v43, %v5075_v41  ;;  %v5654_v41 = vld [vmem:[#allocation5 + $0x4c] sm:$0xf0] }
 0x40c   :  { %2596 = vmatpush.bf16.msrb.mxu1 %v4972_v52 }
 0x410   :  { %2597 = vmatpush.bf16.msrb.mxu1 %v4948_v5  ;;  %v4837_v5 = vld [vmem:[#allocation5 + $0xe0] sm:$0xf0] }
 0x484   :  { %v1878_v15 = vpop.f32.mrf.mxu2  ;;  %v1898_v16 = vpop.f32.mrf.mxu3 }
 0x485   :  { %v1899_v17 = vadd.f32 %v1898_v16, %v1878_v15  ;;  %v5668_v16 = vld [vmem:[#allocation5 + $0xc4] sm:$0xf] }
 0x487   :  { %v6523_v18 = vmul.f32 0.013888889, %v1899_v17  ;;  %v4829_v17 = vld [vmem:[#allocation5 + $0xd8] sm:$0xf0] }
 0x488   :  { %v4832_v26 = vor.u32 %v5668_v16, %v4829_v17  ;;  %v4925_v16 = vld [vmem:[#allocation5 + $0x198] sm:$0xf0] }
 0x489   :  { %v1902_v19 = vmul.f32 %v6523_v18, %v6523_v18 }
 0x48a   :  { %2608 = vmatpush.bf16.msrb.mxu2 %v4832_v26  ;;  %v4909_v26 = vld [vmem:[#allocation5 + $0x170] sm:$0xf0] }
 0x48b   :  { %v1904_v20 = vrot.slane %v1902_v19, 7  ;;  %v4732_v19 = vor.u32 %v5647_v8, %v4731_v7  ;;  %v4912_v35 = vor.u32 %v5687_v25, %v4909_v26  ;;  %v5029_v7 = vld [vmem:[#allocation5 + $0x260] sm:$0xf0]  ;;  %v4787_v26 = vld [vmem:[#allocation5 + $0x68] sm:$0xf] }
 0x48d   :  { %v1906_v21 = vsub.f32 %v6523_v18, %v1904_v20  ;;  %v4828_v20 = vor.u32 %v5671_v12, %v4827_v10  ;;  %v4952_v10 = vor.u32 %v5698_v1, %v4949_v2  ;;  %v5695_v12 = vld [vmem:[#allocation5 + $0x194] sm:$0xf0]  ;;  %v5672_v1 = vld [vmem:[#allocation5 + $0xdc] sm:$0xf0]  ;;  %v5027_v2 = vld [vmem:[#allocation5 + $0x248] sm:$0xf] }
 0x48e   :  { %2609 = vmatpush.bf16.msrb.mxu2 %v4808_v42 }
 0x48f   :  { %v6534_v24 = vadd.f32 1e-05, %v1906_v21  ;;  %v5716_v21 = vld [vmem:[#allocation5 + $0x244] sm:$0xf]  ;;  %2580 = vmatpush.bf16.msrb.mxu0 %v4828_v20  ;;  %v4907_v20 = vld [vmem:[#allocation5 + $0x158] sm:$0xf] }
 0x490   :  { %v5024_v29 = vor.u32 %v5716_v21, %v5021_v22  ;;  %v5690_v21 = vld [vmem:[#allocation5 + $0x16c] sm:$0xf0]  ;;  %v5099_v22 = vld [vmem:[#allocation5 + $0x2d8] sm:$0xf] }
 0x491   :  { %5834 = vrsqrt.f32 %v6534_v24  ;;  %vm1915_vm12 = vweird.f32 %v6534_v24  ;;  %v4908_v54 = vor.u32 %v5690_v21, %v4907_v20  ;;  %v5005_v20 = vld [vmem:[#allocation5 + $0x230] sm:$0xf0] }
 0x492   :  { %2622 = vmatpush.bf16.msrb.mxu3 %v5024_v29  ;;  %2610 = vmatpush.bf16.msrb.mxu2 %v4784_v53  ;;  %v5101_v29 = vld [vmem:[#allocation5 + $0x2f0] sm:$0xf0]  ;;  %v5726_v53 = vld [vmem:[#allocation5 + $0x28c] sm:$0xf0] }
 0x493   :  { %v5104_v42 = vor.u32 %v5735_v28, %v5101_v29  ;;  %v5708_v28 = vld [vmem:[#allocation5 + $0x1fc] sm:$0xf0]  ;;  %v5657_v29 = vld [vmem:[#allocation5 + $0x6c] sm:$0xf] }
 0x496   :  { %2623 = vmatpush.bf16.msrb.mxu3 %v5000_v44  ;;  %v5729_v44 = vld [vmem:[#allocation5 + $0x2ac] sm:$0xf] }
 0x497   :  { %v6555_v45 = vpop.eup %5834  ;;  %v5080_v52 = vor.u32 %v5729_v44, %v5077_v46  ;;  %v4765_v44 = vld [vmem:[#allocation5 + $0x50] sm:$0xf0] }
 0x498   :  { %v1910_v50 = vmul.f32 %v6555_v45, %v6534_v24  ;;  %vm1916_vm11 = vweird.f32 %v6555_v45  ;;  %v5665_v24 = vld [vmem:[#allocation5 + $0xa4] sm:$0xf0] }
 0x499   :  { %vm6564_vm13 = vmor %vm1915_vm12, %vm1916_vm11  ;;  %v4804_v39 = vor.u32 %v5665_v24, %v4803_v27  ;;  %v4924_v27 = vor.u32 %v5695_v12, %v4923_v11  ;;  %v4736_v24 = vor.u32 %v5644_v13, %v4733_v14  ;;  %v4811_v11 = vld [vmem:[#allocation5 + $0x98] sm:$0xf]  ;;  %v5666_v12 = vld [vmem:[#allocation5 + $0xac] sm:$0xf0] }
 0x49a   :  { %v1911_v61 = vmul.f32 %v6555_v45, %v1910_v50  ;;  %v4973_v50 = vld [vmem:[#allocation5 + $0x1f8] sm:$0xf0]  ;;  %v5003_v13 = vld [vmem:[#allocation5 + $0x218] sm:$0xf]  ;;  %v4812_v21 = vor.u32 %v5666_v12, %v4811_v11 }
 0x49b   :  { %2581 = vmatpush.bf16.msrb.mxu0 %v4804_v39  ;;  %v4976_v59 = vor.u32 %v5704_v49, %v4973_v50  ;;  %v5684_v39 = vld [vmem:[#allocation5 + $0x13c] sm:$0xf0]  ;;  %2598 = vmatpush.bf16.msrb.mxu1 %v4924_v27  ;;  %v4888_v49 = vor.u32 %v5681_v31, %v4885_v32  ;;  %v4859_v50 = vld [vmem:[#allocation5 + $0xf8] sm:$0xf]  ;;  %v4979_v27 = vld [vmem:[#allocation5 + $0x1e8] sm:$0xf] }
 0x49c   :  { %v1912_v6 = vmul.f32 0.5, %v1911_v61  ;;  %v5650_v61 = vld [vmem:[#allocation5 + $0x34] sm:$0xf]  ;;  %v4884_v47 = vor.u32 %v5684_v39, %v4883_v38  ;;  %v4763_v39 = vld [vmem:[#allocation5 + $0x38] sm:$0xf] }
 0x49d   :  { %2624 = vmatpush.bf16.msrb.mxu3 %v4976_v59  ;;  %v5053_v59 = vld [vmem:[#allocation5 + $0x290] sm:$0xf0]  ;;  %v4764_v43 = vor.u32 %v5654_v41, %v4763_v39  ;;  %v5702_v31 = vld [vmem:[#allocation5 + $0x1cc] sm:$0xf0]  ;;  %v5651_v32 = vld [vmem:[#allocation5 + $0x3c] sm:$0xf] }
 0x49e   :  { %v1913_v15 = vsub.f32 1.5, %v1912_v6  ;;  %v4760_v6 = vor.u32 %v5650_v61, %v4757_v62  ;;  %v4864_v62 = vor.u32 %v5675_v56, %v4861_v57  ;;  %v5696_v56 = vld [vmem:[#allocation5 + $0x19c] sm:$0xf0]  ;;  %v5645_v57 = vld [vmem:[#allocation5 + $0xc] sm:$0xf] }
 0x49f   :  { %2582 = vmatpush.bf16.msrb.mxu0 %v4780_v51  ;;  %v5051_v51 = vld [vmem:[#allocation5 + $0x278] sm:$0xf] }
 0x4a0   :  { %v1914_v23 = vmul.f32 %v6555_v45, %v1913_v15  ;;  %v5692_v15 = vld [vmem:[#allocation5 + $0x184] sm:$0xf]  ;;  %2611 = vmatpush.bf16.msrb.mxu2 %v4760_v6  ;;  %v5052_v61 = vor.u32 %v5726_v53, %v5051_v51  ;;  %v5717_v6 = vld [vmem:[#allocation5 + $0x24c] sm:$0xf]  ;;  %v5648_v51 = vld [vmem:[#allocation5 + $0x1c] sm:$0xf0] }
 0x4a1   :  { %2625 = vmatpush.bf16.msrb.mxu3 %v4952_v10  ;;  %v4928_v30 = vor.u32 %v5692_v15, %v4925_v16  ;;  %v5032_v14 = vor.u32 %v5717_v6, %v5029_v7  ;;  %v5714_v15 = vld [vmem:[#allocation5 + $0x22c] sm:$0xf0]  ;;  %v5663_v16 = vld [vmem:[#allocation5 + $0x9c] sm:$0xf] }
 0x4a2   :  { %v1918_v55 = vsel %vm6564_vm13, %v6555_v45, %v1914_v23  ;;  %v1907_v45 = vld [vmem:[%s7341_s11] sm:$0x1]  ;;  %v5738_v23 = vld [vmem:[#allocation5 + $0x2ec] sm:$0xf0] }
 0x4a3   :  { %1920 = vst [vmem:[#allocation1] sm:$0xff] %v1918_v55  ;;  %2583 = vmatpush.bf16.msrb.mxu0 %v4756_v0  ;;  %v5100_v55 = vor.u32 %v5738_v23, %v5099_v22  ;;  %v5720_v0 = vld [vmem:[#allocation5 + $0x25c] sm:$0xf0]  ;;  %v5004_v22 = vor.u32 %v5714_v15, %v5003_v13  ;;  %v5691_v15 = vld [vmem:[#allocation5 + $0x174] sm:$0xf0] }
 0x4a4   :  { %2612 = vmatpush.bf16.msrb.mxu2 %v4736_v24 }
 0x4a5   :  { %2626 = vmatpush.bf16.msrb.mxu3 %v4928_v30  ;;  %v4789_v30 = vld [vmem:[#allocation5 + $0x80] sm:$0xf0] }
 0x4a7   :  { %2584 = vmatpush.bf16.msrb.mxu0 %v4732_v19  ;;  %v5711_v19 = vld [vmem:[#allocation5 + $0x21c] sm:$0xf] }
 0x4a8   :  { %2661 = vmatpush.bf16.msra.mxu2 %v4912_v35  ;;  %v5008_v25 = vor.u32 %v5711_v19, %v5005_v20  ;;  %v4981_v35 = vld [vmem:[#allocation5 + $0x200] sm:$0xf0]  ;;  %v4917_v20 = vld [vmem:[#allocation5 + $0x178] sm:$0xf0] }
 0x4a9   :  { %2675 = vmatpush.bf16.msra.mxu3 %v5104_v42  ;;  %v4955_v42 = vld [vmem:[#allocation5 + $0x1b8] sm:$0xf]  ;;  %v5688_v19 = vld [vmem:[#allocation5 + $0x164] sm:$0xf] }
 0x4aa   :  { %v1922_v63 = vld [vmem:[#allocation1 + $0x1] ss:$9 sm:$0xff]  ;;  %v4956_v46 = vor.u32 %v5702_v31, %v4955_v42 }
 0x4ab   :  { %v1924_v3 = vmul.f32 %v1922_v63, %v1907_v45  ;;  %v5678_v45 = vld [vmem:[#allocation5 + $0x10c] sm:$0xf0]  ;;  %v4835_v63 = vld [vmem:[#allocation5 + $0xc8] sm:$0xf]  ;;  %v4867_v42 = vld [vmem:[#allocation5 + $0x100] sm:$0xf] }
 0x4ac   :  { %v4860_v60 = vor.u32 %v5678_v45, %v4859_v50  ;;  %2662 = vmatpush.bf16.msra.mxu2 %v4888_v49  ;;  %v4836_v8 = vor.u32 %v5672_v1, %v4835_v63  ;;  %v4957_v49 = vld [vmem:[#allocation5 + $0x1d0] sm:$0xf0]  ;;  %v4739_v45 = vld [vmem:[#allocation5 + $0x8] sm:$0xf] }
 0x4ad   :  { %v1926_v9 = vmul.f32 %v1924_v3, %v6523_v18  ;;  %2676 = vmatpush.bf16.msra.mxu3 %v5080_v52  ;;  %v4931_v52 = vld [vmem:[#allocation5 + $0x188] sm:$0xf]  ;;  %v4740_v53 = vor.u32 %v5648_v51, %v4739_v45 }
 0x4af   :  { %v1927_v17 = vsub.f32 %v1925_v4, %v1926_v9  ;;  %v5669_v4 = vld [vmem:[#allocation5 + $0xcc] sm:$0xf]  ;;  %v5028_v9 = vor.u32 %v5720_v0, %v5027_v2 }
 0x4b0   :  { %2663 = vmatpush.bf16.msra.mxu2 %v4864_v62  ;;  %v4840_v10 = vor.u32 %v5669_v4, %v4837_v5  ;;  %v4933_v62 = vld [vmem:[#allocation5 + $0x1a0] sm:$0xf0] }
 0x4b1   :  { %v1929_v18 = vperm.slane %v1927_v17, 0  ;;  %v4813_v17 = vld [vmem:[#allocation5 + $0xb0] sm:$0xf0] }
 0x4b2   :  { %v4816_v23 = vor.u32 %v5663_v16, %v4813_v17  ;;  %v5107_v16 = vld [vmem:[#allocation5 + $0x2e0] sm:$0xf]  ;;  %v5739_v17 = vld [vmem:[#allocation5 + $0x2f4] sm:$0xf0] }
 0x4b3   :  { %v1931_v34 = vsel %vm276_vm1, %v1924_v3, %v1929_v18  ;;  %v5056_v3 = vor.u32 %v5723_v58, %v5053_v59  ;;  %v5660_v18 = vld [vmem:[#allocation5 + $0x7c] sm:$0xf0]  ;;  %v4741_v58 = vld [vmem:[#allocation5 + $0x20] sm:$0xf0]  ;;  %v4932_v59 = vor.u32 %v5696_v56, %v4931_v52  ;;  %v4843_v52 = vld [vmem:[#allocation5 + $0xd0] sm:$0xf] }
 0x4b4   :  { %4727 = vmatmul.msk.f32.vlgmr.msra.gmra.mxu0 %vm179_vm0, %v1931_v34  ;;  %4728 = vmatmul.msk.f32.vlgmr.msra.gmra.mxu1 %vm179_vm0, %v1931_v34  ;;  %v4788_v24 = vor.u32 %v5660_v18, %v4787_v26  ;;  %v4792_v34 = vor.u32 %v5657_v29, %v4789_v30  ;;  %v5108_v18 = vor.u32 %v5739_v17, %v5107_v16  ;;  %v5083_v30 = vld [vmem:[#allocation5 + $0x2b0] sm:$0xf] }
 0x4b5   :  { %2633 = vmatpush.bf16.msra.mxu0 %v4908_v54  ;;  %2647 = vmatpush.bf16.msra.mxu1 %v5100_v55  ;;  %v4980_v54 = vor.u32 %v5708_v28, %v4979_v27  ;;  %v5705_v55 = vld [vmem:[#allocation5 + $0x1ec] sm:$0xf]  ;;  %v4891_v27 = vld [vmem:[#allocation5 + $0x130] sm:$0xf]  ;;  %v4920_v28 = vor.u32 %v5688_v19, %v4917_v20  ;;  %v5709_v20 = vld [vmem:[#allocation5 + $0x204] sm:$0xf0] }
 0x4b6   :  { %2677 = vmatpush.bf16.msra.mxu3 %v5056_v3  ;;  %2664 = vmatpush.bf16.msra.mxu2 %v4840_v10  ;;  %v4984_v38 = vor.u32 %v5705_v55, %v4981_v35  ;;  %v4915_v10 = vld [vmem:[#allocation5 + $0x160] sm:$0xf]  ;;  %v4893_v55 = vld [vmem:[#allocation5 + $0x148] sm:$0xf0]  ;;  %v5730_v35 = vld [vmem:[#allocation5 + $0x2b4] sm:$0xf] }
 0x4b7   :  { %v4987_v19 = vld [vmem:[#allocation5 + $0x1f0] sm:$0xf] }
 0x4b9   :  { %2634 = vmatpush.bf16.msra.mxu0 %v4884_v47  ;;  %2648 = vmatpush.bf16.msra.mxu1 %v5076_v48  ;;  %v4768_v47 = vor.u32 %v5651_v32, %v4765_v44  ;;  %v5699_v48 = vld [vmem:[#allocation5 + $0x1bc] sm:$0xf]  ;;  %v5059_v44 = vld [vmem:[#allocation5 + $0x280] sm:$0xf] }
 0x4ba   :  { %2678 = vmatpush.bf16.msra.mxu3 %v5032_v14  ;;  %2665 = vmatpush.bf16.msra.mxu2 %v4816_v23  ;;  %v4960_v50 = vor.u32 %v5699_v48, %v4957_v49  ;;  %v4869_v48 = vld [vmem:[#allocation5 + $0x118] sm:$0xf0]  ;;  %v5724_v49 = vld [vmem:[#allocation5 + $0x284] sm:$0xf] }
 0x4bd   :  { %2635 = vmatpush.bf16.msra.mxu0 %v4860_v60  ;;  %2649 = vmatpush.bf16.msra.mxu1 %v5052_v61  ;;  %v4744_v60 = vor.u32 %v5645_v57, %v4741_v58  ;;  %v5693_v61 = vld [vmem:[#allocation5 + $0x18c] sm:$0xf]  ;;  %v5035_v58 = vld [vmem:[#allocation5 + $0x250] sm:$0xf] }
 0x4be   :  { %2679 = vmatpush.bf16.msra.mxu3 %v5008_v25  ;;  %2666 = vmatpush.bf16.msra.mxu2 %v4792_v34  ;;  %v4936_v63 = vor.u32 %v5693_v61, %v4933_v62  ;;  %v5682_v34 = vld [vmem:[#allocation5 + $0x134] sm:$0xf]  ;;  %v4845_v61 = vld [vmem:[#allocation5 + $0xe8] sm:$0xf0] }
 0x4bf   :  { %v4896_v31 = vor.u32 %v5682_v34, %v4893_v55  ;;  %v5718_v62 = vld [vmem:[#allocation5 + $0x254] sm:$0xf]  ;;  %v5700_v34 = vld [vmem:[#allocation5 + $0x1c4] sm:$0xf]  ;;  %v4965_v55 = vld [vmem:[#allocation5 + $0x1d8] sm:$0xf0] }
 0x4c1   :  { %2636 = vmatpush.bf16.msra.mxu0 %v4836_v8  ;;  %2650 = vmatpush.bf16.msra.mxu1 %v5028_v9 }
 0x4c2   :  { %2680 = vmatpush.bf16.msra.mxu3 %v4984_v38  ;;  %2667 = vmatpush.bf16.msra.mxu2 %v4768_v47  ;;  %v5085_v38 = vld [vmem:[#allocation5 + $0x2c8] sm:$0xf0]  ;;  %v5676_v47 = vld [vmem:[#allocation5 + $0x104] sm:$0xf] }
 0x4c3   :  { %v5088_v32 = vor.u32 %v5730_v35, %v5085_v38  ;;  %v4872_v56 = vor.u32 %v5676_v47, %v4869_v48  ;;  %v5694_v47 = vld [vmem:[#allocation5 + $0x194] sm:$0xf]  ;;  %v4941_v48 = vld [vmem:[#allocation5 + $0x1a8] sm:$0xf0] }
 0x4c5   :  { %2637 = vmatpush.bf16.msra.mxu0 %v4812_v21  ;;  %2651 = vmatpush.bf16.msra.mxu1 %v5004_v22  ;;  %v5736_v21 = vld [vmem:[#allocation5 + $0x2e4] sm:$0xf] }
 0x4c6   :  { %2681 = vmatpush.bf16.msra.mxu3 %v4960_v50  ;;  %2668 = vmatpush.bf16.msra.mxu2 %v4744_v60  ;;  %v5061_v50 = vld [vmem:[#allocation5 + $0x298] sm:$0xf0]  ;;  %v5670_v60 = vld [vmem:[#allocation5 + $0xd4] sm:$0xf] }
 0x4c7   :  { %v5064_v57 = vor.u32 %v5724_v49, %v5061_v50 }
 0x4c9   :  { %2638 = vmatpush.bf16.msra.mxu0 %v4788_v24  ;;  %2652 = vmatpush.bf16.msra.mxu1 %v4980_v54  ;;  %v5685_v24 = vld [vmem:[#allocation5 + $0x144] sm:$0xf0] }
 0x4ca   :  { %2682 = vmatpush.bf16.msra.mxu3 %v4936_v63  ;;  %v5733_v54 = vld [vmem:[#allocation5 + $0x2c4] sm:$0xf0]  ;;  %v4892_v39 = vor.u32 %v5685_v24, %v4891_v27  ;;  %v5037_v63 = vld [vmem:[#allocation5 + $0x268] sm:$0xf0] }
 0x4cb   :  { %v5084_v41 = vor.u32 %v5733_v54, %v5083_v30  ;;  %v5652_v30 = vld [vmem:[#allocation5 + $0x44] sm:$0xf]  ;;  %v4773_v54 = vld [vmem:[#allocation5 + $0x58] sm:$0xf0] }
 0x4cd   :  { %2639 = vmatpush.bf16.msra.mxu0 %v4764_v43  ;;  %2653 = vmatpush.bf16.msra.mxu1 %v4956_v46  ;;  %v5679_v43 = vld [vmem:[#allocation5 + $0x114] sm:$0xf0] }
 0x4ce   :  { %v5727_v46 = vld [vmem:[#allocation5 + $0x294] sm:$0xf0]  ;;  %v4868_v45 = vor.u32 %v5679_v43, %v4867_v42  ;;  %v4776_v42 = vor.u32 %v5652_v30, %v4773_v54  ;;  %v4968_v43 = vor.u32 %v5700_v34, %v4965_v55  ;;  %v5135_v54 = vld [vmem:[%s7344_s14 + $0x8] sm:$0xf]  ;;  %v5741_v34 = vld [vmem:[%s7344_s14 + $0x8] sm:$0x10] }
 0x4cf   :  { %v5060_v51 = vor.u32 %v5727_v46, %v5059_v44  ;;  %v5646_v44 = vld [vmem:[#allocation5 + $0x14] sm:$0xf]  ;;  %v4749_v46 = vld [vmem:[#allocation5 + $0x28] sm:$0xf0] }
 0x4d1   :  { %2640 = vmatpush.bf16.msra.mxu0 %v4740_v53  ;;  %2654 = vmatpush.bf16.msra.mxu1 %v4932_v59  ;;  %v5673_v53 = vld [vmem:[#allocation5 + $0xe4] sm:$0xf0] }
 0x4d2   :  { %v5721_v59 = vld [vmem:[#allocation5 + $0x264] sm:$0xf0] }
 0x531   :  { %v1960_v1 = vpop.f32.mrf.mxu0  ;;  %v1980_v2 = vpop.f32.mrf.mxu1 }
 0x532   :  { %v1983_v3 = vperm.slane %v1960_v1, 0  ;;  %v1984_v0 = vperm.slane %v1980_v2, 0  ;;  %v1989_v4 = vperm.slane %v1960_v1, 1  ;;  %v1990_v5 = vperm.slane %v1980_v2, 1 }
 0x533   :  { %v4844_v1 = vor.u32 %v5673_v53, %v4843_v52  ;;  %v5036_v2 = vor.u32 %v5721_v59, %v5035_v58 }
 0x534   :  { %v1985_v6 = vmul.f32 %v1983_v3, %v6501_v36  ;;  %v1987_v7 = vmul.f32 %v1983_v3, %v6505_v40  ;;  %v1986_v8 = vmul.f32 %v1984_v0, %v6503_v37  ;;  %v1988_v9 = vmul.f32 %v1984_v0, %v6507_v33  ;;  %v5109_v40 = vld [vmem:[#allocation5 + $0x2f8] sm:$0xf0]  ;;  %v4819_v3 = vld [vmem:[#allocation5 + $0xa0] sm:$0xf]  ;;  %v5667_v0 = vld [vmem:[#allocation5 + $0xb4] sm:$0xf0] }
 0x535   :  { %v4916_v33 = vor.u32 %v5691_v15, %v4915_v10  ;;  %v5112_v29 = vor.u32 %v5736_v21, %v5109_v40  ;;  %v5712_v10 = vld [vmem:[#allocation5 + $0x224] sm:$0xf]  ;;  %v5661_v15 = vld [vmem:[#allocation5 + $0x84] sm:$0xf0]  ;;  %v5658_v21 = vld [vmem:[#allocation5 + $0x74] sm:$0xf]  ;;  %v4988_v40 = vor.u32 %v5709_v20, %v4987_v19 }
 0x536   :  { %v1991_v11 = vadd.f32 %v1989_v4, %v1985_v6  ;;  %v1993_v12 = vadd.f32 %v1989_v4, %v1987_v7  ;;  %v1992_v13 = vadd.f32 %v1990_v5, %v1986_v8  ;;  %v1994_v14 = vadd.f32 %v1990_v5, %v1988_v9  ;;  %v5011_v6 = vld [vmem:[#allocation5 + $0x220] sm:$0xf]  ;;  %v5715_v7 = vld [vmem:[#allocation5 + $0x234] sm:$0xf0]  ;;  %v5664_v8 = vld [vmem:[#allocation5 + $0xa4] sm:$0xf] }
 0x537   :  { %v4848_v4 = vor.u32 %v5670_v60, %v4845_v61  ;;  %v5040_v5 = vor.u32 %v5718_v62, %v5037_v63  ;;  %v4821_v9 = vld [vmem:[#allocation5 + $0xb8] sm:$0xf0] }
 0x538   :  { %v1995_v22 = vmax.f32 %v1991_v11, 0.0  ;;  %v1997_v23 = vmax.f32 %v1993_v12, 0.0  ;;  %v1996_v36 = vmax.f32 %v1992_v13, 0.0  ;;  %v1998_v25 = vmax.f32 %v1994_v14, 0.0  ;;  %v5013_v11 = vld [vmem:[#allocation5 + $0x238] sm:$0xf0] }
 0x539   :  { %v4820_v12 = vor.u32 %v5667_v0, %v4819_v3  ;;  %v5012_v13 = vor.u32 %v5715_v7, %v5011_v6  ;;  %v4795_v14 = vld [vmem:[#allocation5 + $0x70] sm:$0xf]  ;;  %v4824_v16 = vor.u32 %v5664_v8, %v4821_v9  ;;  %v5016_v17 = vor.u32 %v5712_v10, %v5013_v11 }
 0x53a   :  { %v6586_v26 = vpack.c.bf16 %v1997_v23, %v1995_v22  ;;  %v6588_v37 = vpack.c.bf16 %v1998_v25, %v1996_v36  ;;  %v4797_v22 = vld [vmem:[#allocation5 + $0x88] sm:$0xf0]  ;;  %v5706_v23 = vld [vmem:[#allocation5 + $0x1f4] sm:$0xf]  ;;  %v4796_v25 = vor.u32 %v5661_v15, %v4795_v14  ;;  %v5740_v14 = vld [vmem:[%s7344_s14] sm:$0xff] }
 0x53b   :  { %v4989_v36 = vld [vmem:[#allocation5 + $0x208] sm:$0xf0]  ;;  %v4800_v27 = vor.u32 %v5658_v21, %v4797_v22 }
 0x53c   :  { %2585 = vmatmul.bf16.vlgmr.msrb.gmra.mxu0 %v6586_v26  ;;  %2599 = vmatmul.bf16.vlgmr.msrb.gmra.mxu1 %v6588_v37  ;;  %v4992_v24 = vor.u32 %v5706_v23, %v4989_v36 }
 0x53d   :  { %2613 = vmatmul.bf16.vlgmr.msrb.gmra.mxu2 %v6586_v26  ;;  %2627 = vmatmul.bf16.vlgmr.msrb.gmra.mxu3 %v6588_v37 }
 0x53e   :  { %2689 = vmatpush.bf16.msrb.mxu0 %v4916_v33  ;;  %2703 = vmatpush.bf16.msrb.mxu1 %v5108_v18  ;;  %v4771_v33 = vld [vmem:[#allocation5 + $0x40] sm:$0xf]  ;;  %v5655_v18 = vld [vmem:[#allocation5 + $0x54] sm:$0xf0] }
 0x53f   :  { %2717 = vmatpush.bf16.msrb.mxu2 %v4920_v28  ;;  %2731 = vmatpush.bf16.msrb.mxu3 %v5112_v29  ;;  %v4963_v28 = vld [vmem:[#allocation5 + $0x1c0] sm:$0xf]  ;;  %v5703_v29 = vld [vmem:[#allocation5 + $0x1d4] sm:$0xf0]  ;;  %v4772_v35 = vor.u32 %v5655_v18, %v4771_v33 }
 0x540   :  { %v4964_v38 = vor.u32 %v5703_v29, %v4963_v28 }
 0x542   :  { %2690 = vmatpush.bf16.msrb.mxu0 %v4892_v39  ;;  %2704 = vmatpush.bf16.msrb.mxu1 %v5084_v41  ;;  %v4747_v39 = vld [vmem:[#allocation5 + $0x10] sm:$0xf]  ;;  %v5649_v41 = vld [vmem:[#allocation5 + $0x24] sm:$0xf0] }
 0x543   :  { %2718 = vmatpush.bf16.msrb.mxu2 %v4896_v31  ;;  %2732 = vmatpush.bf16.msrb.mxu3 %v5088_v32  ;;  %v4939_v31 = vld [vmem:[#allocation5 + $0x190] sm:$0xf]  ;;  %v5697_v32 = vld [vmem:[#allocation5 + $0x1a4] sm:$0xf0]  ;;  %v4748_v49 = vor.u32 %v5649_v41, %v4747_v39 }
 0x544   :  { %v4940_v50 = vor.u32 %v5697_v32, %v4939_v31  ;;  %v5742_v41 = vld [vmem:[%s7344_s14 + $0x10] sm:$0xff] }
 0x546   :  { %2691 = vmatpush.bf16.msrb.mxu0 %v4868_v45  ;;  %2705 = vmatpush.bf16.msrb.mxu1 %v5060_v51  ;;  %v4752_v45 = vor.u32 %v5646_v44, %v4749_v46  ;;  %v4944_v51 = vor.u32 %v5694_v47, %v4941_v48 }
 0x547   :  { %2719 = vmatpush.bf16.msrb.mxu2 %v4872_v56  ;;  %2733 = vmatpush.bf16.msrb.mxu3 %v5064_v57 }
 0x54a   :  { %2692 = vmatpush.bf16.msrb.mxu0 %v4844_v1  ;;  %2706 = vmatpush.bf16.msrb.mxu1 %v5036_v2 }
 0x54b   :  { %2720 = vmatpush.bf16.msrb.mxu2 %v4848_v4  ;;  %2734 = vmatpush.bf16.msrb.mxu3 %v5040_v5 }
 0x54c   :  { %2641 = vmatmul.bf16.vlgmr.msra.gmra.mxu0 %v6586_v26  ;;  %2655 = vmatmul.bf16.vlgmr.msra.gmra.mxu1 %v6588_v37 }
 0x54d   :  { %2669 = vmatmul.bf16.vlgmr.msra.gmra.mxu2 %v6586_v26  ;;  %2683 = vmatmul.bf16.vlgmr.msra.gmra.mxu3 %v6588_v37 }
 0x54e   :  { %2693 = vmatpush.bf16.msrb.mxu0 %v4820_v12  ;;  %2707 = vmatpush.bf16.msrb.mxu1 %v5012_v13 }
 0x54f   :  { %2721 = vmatpush.bf16.msrb.mxu2 %v4824_v16  ;;  %2735 = vmatpush.bf16.msrb.mxu3 %v5016_v17 }
 0x552   :  { %2694 = vmatpush.bf16.msrb.mxu0 %v4796_v25  ;;  %2708 = vmatpush.bf16.msrb.mxu1 %v4988_v40 }
 0x553   :  { %2722 = vmatpush.bf16.msrb.mxu2 %v4800_v27  ;;  %2736 = vmatpush.bf16.msrb.mxu3 %v4992_v24 }
 0x556   :  { %2695 = vmatpush.bf16.msrb.mxu0 %v4772_v35  ;;  %2709 = vmatpush.bf16.msrb.mxu1 %v4964_v38 }
 0x557   :  { %2723 = vmatpush.bf16.msrb.mxu2 %v4776_v42  ;;  %2737 = vmatpush.bf16.msrb.mxu3 %v4968_v43  ;;  %v5136_v42 = vor.u32 %v5741_v34, %v5135_v54  ;;  %v3035_v34 = vld [vmem:[%s7345_s15 + $0x30] sm:$0xff] }
 0x55a   :  { %2696 = vmatpush.bf16.msrb.mxu0 %v4748_v49  ;;  %2710 = vmatpush.bf16.msrb.mxu1 %v4940_v50 }
 0x55b   :  { %2724 = vmatpush.bf16.msrb.mxu2 %v4752_v45  ;;  %2738 = vmatpush.bf16.msrb.mxu3 %v4944_v51 }
 0x55d   :  { %2697 = vmatmul.bf16.vlgmr.msrb.gmra.mxu0 %v6586_v26  ;;  %2711 = vmatmul.bf16.vlgmr.msrb.gmra.mxu1 %v6588_v37 }
 0x55e   :  { %2725 = vmatmul.bf16.vlgmr.msrb.gmra.mxu2 %v6586_v26  ;;  %2739 = vmatmul.bf16.vlgmr.msrb.gmra.mxu3 %v6588_v37 }
 0x5b9   :  { %v2586_v52 = vpop.f32.mrf.mxu0  ;;  %v2600_v53 = vpop.f32.mrf.mxu1 }
 0x5ba   :  { %v2601_v61 = vadd.f32 %v2600_v53, %v2586_v52 }
 0x5c0   :  { %v2614_v56 = vpop.f32.mrf.mxu2  ;;  %v2628_v57 = vpop.f32.mrf.mxu3 }
 0x5c1   :  { %v2588_v58 = vpop.f32.mrf.mxu0  ;;  %v2602_v59 = vpop.f32.mrf.mxu1  ;;  %v2629_v60 = vadd.f32 %v2628_v57, %v2614_v56  ;;  %v5123_v57 = vld [vmem:[%s7344_s14 + $0x18] sm:$0xf] }
 0x5c2   :  { %v2603_v2 = vadd.f32 %v2602_v59, %v2588_v58  ;;  %v5743_v58 = vld [vmem:[%s7344_s14 + $0x18] sm:$0x10] }
 0x5c3   :  { %v2745_v1 = vpack.c.bf16 %v2629_v60, %v2601_v61  ;;  %v5124_v61 = vor.u32 %v5743_v58, %v5123_v57 }
 0x5c5   :  { %v2841_v6 = vunpack.c.l.b16 %v2745_v1  ;;  %v2842_v26 = vunpack.c.h.b16 %v2745_v1  ;;  %v5744_v1 = vld [vmem:[%s7344_s14 + $0x20] sm:$0xff] }
 0x5c8   :  { %v2616_v62 = vpop.f32.mrf.mxu2  ;;  %v2630_v63 = vpop.f32.mrf.mxu3 }
 0x5c9   :  { %v2631_v3 = vadd.f32 %v2630_v63, %v2616_v62  ;;  %v2642_v0 = vpop.f32.mrf.mxu0  ;;  %v2656_v4 = vpop.f32.mrf.mxu1 }
 0x5ca   :  { %v2657_v19 = vadd.f32 %v2656_v4, %v2642_v0 }
 0x5cb   :  { %v2748_v5 = vpack.c.bf16 %v2631_v3, %v2603_v2  ;;  %v5151_v2 = vld [vmem:[%s7344_s14 + $0x28] sm:$0xf]  ;;  %v5745_v3 = vld [vmem:[%s7344_s14 + $0x28] sm:$0x10] }
 0x5cc   :  { %v5152_v0 = vor.u32 %v5745_v3, %v5151_v2 }
 0x5cd   :  { %v2843_v7 = vunpack.c.l.b16 %v2748_v5  ;;  %v2844_v37 = vunpack.c.h.b16 %v2748_v5 }
 0x5cf   :  { %v2845_v8 = vpack.c.b16 %v2843_v7, %v2841_v6  ;;  %v2846_v9 = vpack.c.b16 %v2844_v37, %v2842_v26  ;;  %v3044_v7 = vld [vmem:[%s7345_s15 + $0x78] sm:$0xff] }
 0x5d0   :  { %v2670_v10 = vpop.f32.mrf.mxu2  ;;  %v2684_v11 = vpop.f32.mrf.mxu3  ;;  %v3060_v37 = vld [vmem:[%s7345_s15 + $0xf8] sm:$0xff] }
 0x5d1   :  { %v2854_v12 = vsel %vm393_vm3, %v2845_v8, 0  ;;  %v2857_v13 = vsel %vm393_vm3, %v2846_v9, 0  ;;  %v2644_v15 = vpop.f32.mrf.mxu0  ;;  %v2658_v16 = vpop.f32.mrf.mxu1  ;;  %v2685_v17 = vadd.f32 %v2684_v11, %v2670_v10  ;;  %v3043_v10 = vld [vmem:[%s7345_s15 + $0x70] sm:$0xff] }
 0x5d2   :  { %2866 = vmatpush.bf16.msra.mxu2 %v2854_v12  ;;  %2885 = vmatpush.bf16.msra.mxu3 %v2857_v13  ;;  %v2659_v23 = vadd.f32 %v2658_v16, %v2644_v15  ;;  %v3059_v11 = vld [vmem:[%s7345_s15 + $0xf0] sm:$0xff]  ;;  %v3042_v12 = vld [vmem:[%s7345_s15 + $0x68] sm:$0xff]  ;;  %v3057_v15 = vld [vmem:[%s7345_s15 + $0xe0] sm:$0xff] }
 0x5d3   :  { %v2746_v22 = vpack.c.bf16 %v2685_v17, %v2657_v19  ;;  %v3058_v13 = vld [vmem:[%s7345_s15 + $0xe8] sm:$0xff]  ;;  %v3040_v19 = vld [vmem:[%s7345_s15 + $0x58] sm:$0xff] }
 0x5d5   :  { %5137 = vmatmul.msk.bf16.vlgmr.msra.gmra.mxu2 %vm2778_vm14, %v5740_v14  ;;  %5139 = vmatmul.msk.bf16.vlgmr.msra.gmra.mxu3 %vm2778_vm14, %v5740_v14  ;;  %v2772_v40 = vunpack.c.l.b16 %v2746_v22  ;;  %v2773_v33 = vunpack.c.h.b16 %v2746_v22  ;;  %v3041_v14 = vld [vmem:[%s7345_s15 + $0x60] sm:$0xff] }
 0x5d6   :  { %3061 = vmatpush.msrb.mxu2 %v3044_v7  ;;  %3081 = vmatpush.msrb.mxu3 %v3060_v37 }
 0x5d8   :  { %v2672_v20 = vpop.f32.mrf.mxu2  ;;  %v2686_v21 = vpop.f32.mrf.mxu3  ;;  %3062 = vmatpush.msrb.mxu2 %v3043_v10  ;;  %3082 = vmatpush.msrb.mxu3 %v3059_v11 }
 0x5d9   :  { %v2687_v36 = vadd.f32 %v2686_v21, %v2672_v20  ;;  %v3056_v20 = vld [vmem:[%s7345_s15 + $0xd8] sm:$0xff] }
 0x5da   :  { %v2698_v24 = vpop.f32.mrf.mxu0  ;;  %v2712_v28 = vpop.f32.mrf.mxu1  ;;  %3063 = vmatpush.msrb.mxu2 %v3042_v12  ;;  %3083 = vmatpush.msrb.mxu3 %v3058_v13 }
 0x5db   :  { %v2749_v25 = vpack.c.bf16 %v2687_v36, %v2659_v23  ;;  %v2713_v44 = vadd.f32 %v2712_v28, %v2698_v24  ;;  %v3039_v23 = vld [vmem:[%s7345_s15 + $0x50] sm:$0xff]  ;;  %v3052_v24 = vld [vmem:[%s7345_s15 + $0xb8] sm:$0xff] }
 0x5dc   :  { %3064 = vmatpush.msrb.mxu2 %v3041_v14  ;;  %3084 = vmatpush.msrb.mxu3 %v3057_v15  ;;  %v3055_v36 = vld [vmem:[%s7345_s15 + $0xd0] sm:$0xff] }
 0x5dd   :  { %v2774_v18 = vunpack.c.l.b16 %v2749_v25  ;;  %v2775_v27 = vunpack.c.h.b16 %v2749_v25  ;;  %v3038_v25 = vld [vmem:[%s7345_s15 + $0x48] sm:$0xff] }
 0x5de   :  { %3065 = vmatpush.msrb.mxu2 %v3040_v19  ;;  %3085 = vmatpush.msrb.mxu3 %v3056_v20 }
 0x5df   :  { %v2776_v29 = vpack.c.b16 %v2774_v18, %v2772_v40  ;;  %v2777_v30 = vpack.c.b16 %v2775_v27, %v2773_v33  ;;  %v3054_v40 = vld [vmem:[%s7345_s15 + $0xc8] sm:$0xff]  ;;  %v3037_v33 = vld [vmem:[%s7345_s15 + $0x40] sm:$0xff]  ;;  %v3036_v27 = vld [vmem:[%s7345_s15 + $0x38] sm:$0xff] }
 0x5e0   :  { %3066 = vmatpush.msrb.mxu2 %v3039_v23  ;;  %3086 = vmatpush.msrb.mxu3 %v3055_v36  ;;  %v3053_v18 = vld [vmem:[%s7345_s15 + $0xc0] sm:$0xff] }
 0x5e1   :  { %v2726_v55 = vpop.f32.mrf.mxu2  ;;  %v2740_v35 = vpop.f32.mrf.mxu3  ;;  %v2786_v38 = vsel %vm393_vm3, %v2776_v29, 0  ;;  %v2789_v39 = vsel %vm393_vm3, %v2777_v30, 0 }
 0x5e2   :  { %2798 = vmatpush.bf16.msra.mxu0 %v2786_v38  ;;  %2817 = vmatpush.bf16.msra.mxu1 %v2789_v39  ;;  %v2741_v43 = vadd.f32 %v2740_v35, %v2726_v55  ;;  %v2700_v31 = vpop.f32.mrf.mxu0  ;;  %v2714_v32 = vpop.f32.mrf.mxu1  ;;  %v3051_v55 = vld [vmem:[%s7345_s15 + $0xb0] sm:$0xff]  ;;  %v3034_v35 = vld [vmem:[%s7345_s15 + $0x28] sm:$0xff]  ;;  %v3033_v39 = vld [vmem:[%s7345_s15 + $0x20] sm:$0xff] }
 0x5e3   :  { %v2715_v49 = vadd.f32 %v2714_v32, %v2700_v31  ;;  %3067 = vmatpush.msrb.mxu2 %v3038_v25  ;;  %3087 = vmatpush.msrb.mxu3 %v3054_v40  ;;  %v3050_v38 = vld [vmem:[%s7345_s15 + $0xa8] sm:$0xff]  ;;  %v3031_v31 = vld [vmem:[%s7345_s15 + $0x10] sm:$0xff] }
 0x5e4   :  { %v2747_v48 = vpack.c.bf16 %v2741_v43, %v2713_v44  ;;  %v3048_v43 = vld [vmem:[%s7345_s15 + $0x98] sm:$0xff]  ;;  %v3047_v32 = vld [vmem:[%s7345_s15 + $0x90] sm:$0xff] }
 0x5e5   :  { %5125 = vmatmul.msk.bf16.vlgmr.msra.gmra.mxu0 %vm2778_vm14, %v5742_v41  ;;  %5127 = vmatmul.msk.bf16.vlgmr.msra.gmra.mxu1 %vm2778_vm14, %v5742_v41  ;;  %v3049_v41 = vld [vmem:[%s7345_s15 + $0xa0] sm:$0xff] }
 0x5e6   :  { %5138 = vmatmul.msk.bf16.gmra.mxu2 %vm2778_vm14, %v5136_v42  ;;  %5140 = vmatmul.msk.bf16.gmra.mxu3 %vm2778_vm14, %v5136_v42  ;;  %v2914_v51 = vunpack.c.l.b16 %v2747_v48  ;;  %v2915_v52 = vunpack.c.h.b16 %v2747_v48  ;;  %v3032_v42 = vld [vmem:[%s7345_s15 + $0x18] sm:$0xff] }
 0x5e7   :  { %3068 = vmatpush.msrb.mxu2 %v3037_v33  ;;  %3088 = vmatpush.msrb.mxu3 %v3053_v18 }
 0x5e9   :  { %v2728_v46 = vpop.f32.mrf.mxu2  ;;  %v2742_v47 = vpop.f32.mrf.mxu3  ;;  %3069 = vmatpush.msrb.mxu2 %v3036_v27  ;;  %3089 = vmatpush.msrb.mxu3 %v3052_v24 }
 0x5ea   :  { %v2743_v50 = vadd.f32 %v2742_v47, %v2728_v46  ;;  %v3030_v47 = vld [vmem:[%s7345_s15 + $0x8] sm:$0xff] }
 0x5eb   :  { %3070 = vmatpush.msrb.mxu2 %v3035_v34  ;;  %3090 = vmatpush.msrb.mxu3 %v3051_v55 }
 0x5ec   :  { %v2750_v45 = vpack.c.bf16 %v2743_v50, %v2715_v49  ;;  %v3046_v49 = vld [vmem:[%s7345_s15 + $0x88] sm:$0xff] }
 0x5ed   :  { %3071 = vmatpush.msrb.mxu2 %v3034_v35  ;;  %3091 = vmatpush.msrb.mxu3 %v3050_v38 }
 0x5ee   :  { %v2916_v53 = vunpack.c.l.b16 %v2750_v45  ;;  %v2917_v56 = vunpack.c.h.b16 %v2750_v45  ;;  %v3029_v45 = vld [vmem:[%s7345_s15] sm:$0xff] }
 0x5ef   :  { %3072 = vmatpush.msrb.mxu2 %v3033_v39  ;;  %3092 = vmatpush.msrb.mxu3 %v3049_v41 }
 0x5f0   :  { %v2918_v59 = vpack.c.b16 %v2916_v53, %v2914_v51  ;;  %v2919_v60 = vpack.c.b16 %v2917_v56, %v2915_v52  ;;  %v3045_v51 = vld [vmem:[%s7345_s15 + $0x80] sm:$0xff] }
 0x5f1   :  { %3073 = vmatpush.msrb.mxu2 %v3032_v42  ;;  %3093 = vmatpush.msrb.mxu3 %v3048_v43 }
 0x5f2   :  { %v2927_v62 = vsel %vm393_vm3, %v2918_v59, 0  ;;  %v2930_v63 = vsel %vm393_vm3, %v2919_v60, 0 }
 0x5f3   :  { %2939 = vmatpush.bf16.msrb.mxu0 %v2927_v62  ;;  %2958 = vmatpush.bf16.msrb.mxu1 %v2930_v63 }
 0x5f4   :  { %3074 = vmatpush.msrb.mxu2 %v3031_v31  ;;  %3094 = vmatpush.msrb.mxu3 %v3047_v32 }
 0x5f5   :  { %5126 = vmatmul.msk.bf16.gmra.mxu0 %vm2778_vm14, %v5124_v61  ;;  %5128 = vmatmul.msk.bf16.gmra.mxu1 %vm2778_vm14, %v5124_v61 }
 0x5f6   :  { %3075 = vmatpush.msrb.mxu2 %v3030_v47  ;;  %3095 = vmatpush.msrb.mxu3 %v3046_v49 }
 0x5f8   :  { %3076 = vmatpush.msrb.mxu2 %v3029_v45  ;;  %3096 = vmatpush.msrb.mxu3 %v3045_v51 }
 0x605   :  { %5153 = vmatmul.msk.bf16.vlgmr.msrb.gmra.mxu0 %vm2778_vm14, %v5744_v1  ;;  %5155 = vmatmul.msk.bf16.vlgmr.msrb.gmra.mxu1 %vm2778_vm14, %v5744_v1 }
 0x615   :  { %5154 = vmatmul.msk.bf16.gmra.mxu0 %vm2778_vm14, %v5152_v0  ;;  %5156 = vmatmul.msk.bf16.gmra.mxu1 %vm2778_vm14, %v5152_v0 }
 0x658   :  { %v6683_v16 = vpop.f32.mrf.mxu2  ;;  %v6685_v17 = vpop.f32.mrf.mxu3 }
 0x660   :  { %v2870_v28 = vpop.f32.mrf.mxu2  ;;  %v2889_v29 = vpop.f32.mrf.mxu3 }
 0x662   :  { %v6647_v4 = vpop.f32.mrf.mxu0  ;;  %v6649_v5 = vpop.f32.mrf.mxu1 }
 0x663   :  { %v2869_v58 = vadd.f32 %v6683_v16, %v6647_v4  ;;  %v2888_v59 = vadd.f32 %v6685_v17, %v6649_v5 }
 0x669   :  { %v2873_v48 = vpop.f32.mrf.mxu2  ;;  %v2892_v50 = vpop.f32.mrf.mxu3 }
 0x66a   :  { %v6651_v6 = vpop.f32.mrf.mxu0  ;;  %v6653_v26 = vpop.f32.mrf.mxu1 }
 0x66b   :  { %v2871_v52 = vadd.f32 %v2870_v28, %v6651_v6  ;;  %v2890_v53 = vadd.f32 %v2889_v29, %v6653_v26 }
 0x671   :  { %v2875_v1 = vpop.f32.mrf.mxu2  ;;  %v2894_v0 = vpop.f32.mrf.mxu3 }
 0x672   :  { %v6661_v8 = vpop.f32.mrf.mxu0  ;;  %v6663_v9 = vpop.f32.mrf.mxu1 }
 0x673   :  { %v2874_v60 = vadd.f32 %v2873_v48, %v6661_v8  ;;  %v2893_v61 = vadd.f32 %v2892_v50, %v6663_v9 }
 0x67a   :  { %v6693_v21 = vpop.f32.mrf.mxu0  ;;  %v6695_v22 = vpop.f32.mrf.mxu1 }
 0x67b   :  { %v2876_v5 = vadd.f32 %v2875_v1, %v6693_v21  ;;  %v2895_v37 = vadd.f32 %v2894_v0, %v6695_v22 }
 0x682   :  { %v2941_v30 = vpop.f32.mrf.mxu0  ;;  %v2960_v54 = vpop.f32.mrf.mxu1 }
 0x683   :  { %v6775_v2 = vadd.f32 %v2941_v30, %v2869_v58  ;;  %v6777_v3 = vadd.f32 %v2960_v54, %v2888_v59 }
 0x685   :  { %v2999_v8 = vmul.f32 %v6775_v2, %v6775_v2  ;;  %v3000_v9 = vmul.f32 %v6777_v3, %v6777_v3 }
 0x68a   :  { %v2943_v44 = vpop.f32.mrf.mxu0  ;;  %v2962_v46 = vpop.f32.mrf.mxu1 }
 0x68b   :  { %v6771_v62 = vadd.f32 %v2943_v44, %v2871_v52  ;;  %v6773_v63 = vadd.f32 %v2962_v46, %v2890_v53 }
 0x68d   :  { %v3001_v26 = vmul.f32 %v6771_v62, %v6771_v62  ;;  %v3002_v7 = vmul.f32 %v6773_v63, %v6773_v63  ;;  %v2978_v10 = vadd.f32 %v6771_v62, %v6775_v2  ;;  %v2989_v11 = vadd.f32 %v6773_v63, %v6777_v3 }
 0x68f   :  { %v3007_v19 = vadd.f32 %v3001_v26, %v2999_v8  ;;  %v3017_v20 = vadd.f32 %v3002_v7, %v3000_v9 }
 0x692   :  { %v2946_v56 = vpop.f32.mrf.mxu0  ;;  %v2965_v57 = vpop.f32.mrf.mxu1 }
 0x693   :  { %v6779_v6 = vadd.f32 %v2946_v56, %v2874_v60  ;;  %v6781_v4 = vadd.f32 %v2965_v57, %v2893_v61 }
 0x695   :  { %v3003_v12 = vmul.f32 %v6779_v6, %v6779_v6  ;;  %v3004_v13 = vmul.f32 %v6781_v4, %v6781_v4  ;;  %v2979_v21 = vadd.f32 %v2978_v10, %v6779_v6  ;;  %v2990_v22 = vadd.f32 %v2989_v11, %v6781_v4  ;;  %v3134_v10 = vld [vmem:[%s7346_s16 + $0x10] sm:$0xff]  ;;  %v3135_v11 = vld [vmem:[%s7346_s16 + $0x18] sm:$0xff] }
 0x696   :  { %3154 = vmatpush.msra.mxu2 %v3134_v10  ;;  %3174 = vmatpush.msra.mxu3 %v3135_v11 }
 0x697   :  { %v3008_v33 = vadd.f32 %v3007_v19, %v3003_v12  ;;  %v3018_v18 = vadd.f32 %v3017_v20, %v3004_v13  ;;  %v3132_v12 = vld [vmem:[%s7346_s16] sm:$0xff]  ;;  %v3133_v13 = vld [vmem:[%s7346_s16 + $0x8] sm:$0xff] }
 0x698   :  { %3155 = vmatpush.msra.mxu2 %v3132_v12  ;;  %3175 = vmatpush.msra.mxu3 %v3133_v13  ;;  %v5401_v19 = vld [vmem:[%s7349_s19 + $0x1e0] sm:$0xf] }
 0x699   :  { %v5209_v13 = vld [vmem:[%s7349_s19 + $0x60] sm:$0xf] }
 0x69a   :  { %v2948_v14 = vpop.f32.mrf.mxu0  ;;  %v2967_v15 = vpop.f32.mrf.mxu1 }
 0x69b   :  { %v6801_v16 = vadd.f32 %v2948_v14, %v2876_v5  ;;  %v6803_v17 = vadd.f32 %v2967_v15, %v2895_v37  ;;  %v5273_v14 = vld [vmem:[%s7349_s19 + $0xe0] sm:$0xf]  ;;  %v5776_v15 = vld [vmem:[%s7349_s19 + $0xec] sm:$0xf0] }
 0x69c   :  { %v5274_v20 = vor.u32 %v5776_v15, %v5273_v14  ;;  %v5760_v14 = vld [vmem:[%s7349_s19 + $0x6c] sm:$0xf0]  ;;  %v5337_v15 = vld [vmem:[%s7349_s19 + $0x160] sm:$0xf] }
 0x69d   :  { %v2981_v23 = vsel %vm2980_vm15, %v6801_v16, 0.0  ;;  %v3005_v36 = vmul.f32 %v6801_v16, %v6801_v16  ;;  %v2991_v25 = vsel %vm2980_vm15, %v6803_v17, 0.0  ;;  %v3006_v40 = vmul.f32 %v6803_v17, %v6803_v17 }
 0x69e   :  { %v2982_v27 = vadd.f32 %v2981_v23, %v2979_v21  ;;  %v2992_v24 = vadd.f32 %v2991_v25, %v2990_v22  ;;  %v5808_v21 = vld [vmem:[%s7349_s19 + $0x1ec] sm:$0xf0]  ;;  %v5774_v22 = vld [vmem:[%s7349_s19 + $0xe4] sm:$0xf]  ;;  %v5275_v23 = vld [vmem:[%s7349_s19 + $0xf0] sm:$0xf0]  ;;  %3596 = vmatpush.bf16.msra.mxu0 %v5274_v20 }
 0x69f   :  { %v3009_v28 = vsel %vm2980_vm15, %v3005_v36, 0.0  ;;  %v3019_v29 = vsel %vm2980_vm15, %v3006_v40, 0.0  ;;  %v5402_v36 = vor.u32 %v5808_v21, %v5401_v19  ;;  %v5278_v25 = vor.u32 %v5774_v22, %v5275_v23  ;;  %v5806_v40 = vld [vmem:[%s7349_s19 + $0x1e4] sm:$0xf]  ;;  %v5792_v20 = vld [vmem:[%s7349_s19 + $0x16c] sm:$0xf0] }
 0x6a0   :  { %v2983_v30 = vrot.slane %v2982_v27, 4  ;;  %v3010_v54 = vadd.f32 %v3009_v28, %v3008_v33  ;;  %v2993_v34 = vrot.slane %v2992_v24, 4  ;;  %v3020_v55 = vadd.f32 %v3019_v29, %v3018_v18  ;;  %v5403_v33 = vld [vmem:[%s7349_s19 + $0x1f0] sm:$0xf0]  ;;  %v5257_v18 = vld [vmem:[%s7349_s19 + $0xc0] sm:$0xf] }
 0x6a1   :  { %v5772_v28 = vld [vmem:[%s7349_s19 + $0xcc] sm:$0xf0]  ;;  %v5385_v29 = vld [vmem:[%s7349_s19 + $0x1c0] sm:$0xf]  ;;  %3615 = vmatpush.bf16.msra.mxu1 %v5402_v36  ;;  %v5758_v21 = vld [vmem:[%s7349_s19 + $0x64] sm:$0xf] }
 0x6a2   :  { %v2984_v35 = vadd.f32 %v2983_v30, %v2982_v27  ;;  %v3011_v38 = vrot.slane %v3010_v54, 4  ;;  %v2994_v39 = vadd.f32 %v2993_v34, %v2992_v24  ;;  %v3021_v41 = vrot.slane %v3020_v55, 4  ;;  %v5804_v30 = vld [vmem:[%s7349_s19 + $0x1cc] sm:$0xf0]  ;;  %v5211_v22 = vld [vmem:[%s7349_s19 + $0x70] sm:$0xf0] }
 0x6a3   :  { %v5406_v24 = vor.u32 %v5806_v40, %v5403_v33  ;;  %v5258_v34 = vor.u32 %v5772_v28, %v5257_v18  ;;  %v5790_v36 = vld [vmem:[%s7349_s19 + $0x164] sm:$0xf]  ;;  %v5210_v40 = vor.u32 %v5760_v14, %v5209_v13  ;;  %v5338_v33 = vor.u32 %v5792_v20, %v5337_v15  ;;  %v5291_v13 = vld [vmem:[%s7349_s19 + $0x110] sm:$0xf0]  ;;  %v5281_v15 = vld [vmem:[%s7349_s19 + $0xe8] sm:$0xf] }
 0x6a4   :  { %v2985_v42 = vrot.slane %v2984_v35, 2  ;;  %v3012_v43 = vadd.f32 %v3011_v38, %v3010_v54  ;;  %v2995_v31 = vrot.slane %v2994_v39, 2  ;;  %v3022_v32 = vadd.f32 %v3021_v41, %v3020_v55  ;;  %v5259_v38 = vld [vmem:[%s7349_s19 + $0xd0] sm:$0xf0]  ;;  %v5409_v20 = vld [vmem:[%s7349_s19 + $0x1e8] sm:$0xf] }
 0x6a5   :  { %v5386_v55 = vor.u32 %v5804_v30, %v5385_v29  ;;  %3597 = vmatpush.bf16.msra.mxu0 %v5258_v34  ;;  %v5214_v18 = vor.u32 %v5758_v21, %v5211_v22  ;;  %v3125_v30 = vld [vmem:[%s7348_s18] sm:$0x1]  ;;  %v5809_v22 = vld [vmem:[%s7349_s19 + $0x1f4] sm:$0xf0] }
 0x6a6   :  { %v2986_v44 = vadd.f32 %v2985_v42, %v2984_v35  ;;  %v3013_v46 = vrot.slane %v3012_v43, 2  ;;  %v2996_v47 = vadd.f32 %v2995_v31, %v2994_v39  ;;  %v3023_v48 = vrot.slane %v3022_v32, 2  ;;  %v5770_v35 = vld [vmem:[%s7349_s19 + $0xc4] sm:$0xf]  ;;  %v5387_v42 = vld [vmem:[%s7349_s19 + $0x1d0] sm:$0xf0] }
 0x6a7   :  { %v5802_v39 = vld [vmem:[%s7349_s19 + $0x1c4] sm:$0xf]  ;;  %v5262_v41 = vor.u32 %v5770_v35, %v5259_v38  ;;  %3616 = vmatpush.bf16.msra.mxu1 %v5386_v55  ;;  %v5193_v38 = vld [vmem:[%s7349_s19 + $0x40] sm:$0xf] }
 0x6a8   :  { %v2987_v49 = vrot.slane %v2986_v44, 1  ;;  %v3014_v50 = vadd.f32 %v3013_v46, %v3012_v43  ;;  %v2997_v45 = vrot.slane %v2996_v47, 1  ;;  %v3024_v51 = vadd.f32 %v3023_v48, %v3022_v32  ;;  %v5241_v43 = vld [vmem:[%s7349_s19 + $0xa0] sm:$0xf] }
 0x6a9   :  { %v5390_v32 = vor.u32 %v5802_v39, %v5387_v42  ;;  %v5369_v46 = vld [vmem:[%s7349_s19 + $0x1a0] sm:$0xf]  ;;  %v5756_v39 = vld [vmem:[%s7349_s19 + $0x4c] sm:$0xf0] }
 0x6aa   :  { %v3015_v52 = vrot.slane %v3014_v50, 1  ;;  %v3025_v53 = vrot.slane %v3024_v51, 1  ;;  %v2988_v56 = vadd.f32 %v2987_v49, %v2986_v44  ;;  %v2998_v58 = vadd.f32 %v2997_v45, %v2996_v47  ;;  %v5768_v44 = vld [vmem:[%s7349_s19 + $0xac] sm:$0xf0]  ;;  %v5766_v49 = vld [vmem:[%s7349_s19 + $0xa4] sm:$0xf] }
 0x6ab   :  { %v5800_v47 = vld [vmem:[%s7349_s19 + $0x1ac] sm:$0xf0]  ;;  %v5242_v48 = vor.u32 %v5768_v44, %v5241_v43  ;;  %v5798_v45 = vld [vmem:[%s7349_s19 + $0x1a4] sm:$0xf] }
 0x6ac   :  { %v3016_v57 = vadd.f32 %v3015_v52, %v3014_v50  ;;  %v3026_v59 = vadd.f32 %v3025_v53, %v3024_v51  ;;  %v5243_v50 = vld [vmem:[%s7349_s19 + $0xb0] sm:$0xf0]  ;;  %v5370_v52 = vor.u32 %v5800_v47, %v5369_v46  ;;  %v5788_v42 = vld [vmem:[%s7349_s19 + $0x14c] sm:$0xf0]  ;;  %v5754_v43 = vld [vmem:[%s7349_s19 + $0x44] sm:$0xf] }
 0x6ad   :  { %v5246_v53 = vor.u32 %v5766_v49, %v5243_v50  ;;  %3598 = vmatpush.bf16.msra.mxu0 %v5242_v48  ;;  %v5786_v46 = vld [vmem:[%s7349_s19 + $0x144] sm:$0xf]  ;;  %v5323_v47 = vld [vmem:[%s7349_s19 + $0x150] sm:$0xf0]  ;;  %v5177_v49 = vld [vmem:[%s7349_s19 + $0x20] sm:$0xf] }
 0x6ae   :  { %v3027_v60 = vsel %vm276_vm1, %v2988_v56, %v3016_v57  ;;  %v3028_v61 = vsel %vm276_vm1, %v2998_v58, %v3026_v59  ;;  %v5371_v56 = vld [vmem:[%s7349_s19 + $0x1b0] sm:$0xf0]  ;;  %v5225_v57 = vld [vmem:[%s7349_s19 + $0x80] sm:$0xf]  ;;  %v5764_v59 = vld [vmem:[%s7349_s19 + $0x8c] sm:$0xf0]  ;;  %3617 = vmatpush.bf16.msra.mxu1 %v5370_v52  ;;  %v5326_v48 = vor.u32 %v5786_v46, %v5323_v47 }
 0x6af   :  { %3077 = vmatmul.f32.vlgmr.msrb.gmra.mxu2 %v3027_v60  ;;  %3097 = vmatmul.f32.vlgmr.msrb.gmra.mxu3 %v3028_v61  ;;  %v5374_v58 = vor.u32 %v5798_v45, %v5371_v56  ;;  %v5353_v60 = vld [vmem:[%s7349_s19 + $0x180] sm:$0xf]  ;;  %v5796_v61 = vld [vmem:[%s7349_s19 + $0x18c] sm:$0xf0]  ;;  %v5179_v56 = vld [vmem:[%s7349_s19 + $0x30] sm:$0xf0] }
 0x6b0   :  { %3634 = vmatpush.bf16.msrb.mxu2 %v5278_v25  ;;  %3653 = vmatpush.bf16.msrb.mxu3 %v5406_v24  ;;  %v5354_v11 = vor.u32 %v5796_v61, %v5353_v60  ;;  %v5339_v25 = vld [vmem:[%s7349_s19 + $0x170] sm:$0xf0]  ;;  %v5752_v50 = vld [vmem:[%s7349_s19 + $0x2c] sm:$0xf0]  ;;  %v5305_v45 = vld [vmem:[%s7349_s19 + $0x120] sm:$0xf] }
 0x6b1   :  { %v5342_v24 = vor.u32 %v5790_v36, %v5339_v25  ;;  %v5784_v52 = vld [vmem:[%s7349_s19 + $0x12c] sm:$0xf0]  ;;  %v5307_v60 = vld [vmem:[%s7349_s19 + $0x130] sm:$0xf0]  ;;  %v5283_v36 = vld [vmem:[%s7349_s19 + $0xf8] sm:$0xf0]  ;;  %v5410_v25 = vor.u32 %v5809_v22, %v5409_v20 }
 0x6b2   :  { %3618 = vmatpush.bf16.msra.mxu1 %v5354_v11  ;;  %v5251_v47 = vld [vmem:[%s7349_s19 + $0xb8] sm:$0xf0] }
 0x6b3   :  { %v5347_v20 = vld [vmem:[%s7349_s19 + $0x178] sm:$0xf0] }
 0x6b4   :  { %3635 = vmatpush.bf16.msrb.mxu2 %v5262_v41  ;;  %3654 = vmatpush.bf16.msrb.mxu3 %v5390_v32  ;;  %v5321_v41 = vld [vmem:[%s7349_s19 + $0x140] sm:$0xf] }
 0x6b5   :  { %v5322_v32 = vor.u32 %v5788_v42, %v5321_v41  ;;  %v5395_v41 = vld [vmem:[%s7349_s19 + $0x1d8] sm:$0xf0]  ;;  %v5769_v42 = vld [vmem:[%s7349_s19 + $0xb4] sm:$0xf0] }
 0x6b6   :  { %3619 = vmatpush.bf16.msra.mxu1 %v5338_v33  ;;  %v5807_v33 = vld [vmem:[%s7349_s19 + $0x1ec] sm:$0xf] }
 0x6b8   :  { %3636 = vmatpush.bf16.msrb.mxu2 %v5246_v53  ;;  %3655 = vmatpush.bf16.msrb.mxu3 %v5374_v58  ;;  %v5750_v53 = vld [vmem:[%s7349_s19 + $0x24] sm:$0xf] }
 0x6b9   :  { %v5182_v58 = vor.u32 %v5750_v53, %v5179_v56  ;;  %v5361_v53 = vld [vmem:[%s7349_s19 + $0x188] sm:$0xf] }
 0x6ba   :  { %3620 = vmatpush.bf16.msra.mxu1 %v5322_v32  ;;  %v5801_v32 = vld [vmem:[%s7349_s19 + $0x1b4] sm:$0xf0] }
 0x732   :  { %v3078_v1 = vpop.f32.mrf.mxu2  ;;  %v3098_v0 = vpop.f32.mrf.mxu3 }
 0x733   :  { %v3099_v5 = vadd.f32 %v3098_v0, %v3078_v1  ;;  %v5762_v0 = vld [vmem:[%s7349_s19 + $0x84] sm:$0xf] }
 0x735   :  { %v6819_v26 = vmul.f32 0.00295858, %v3099_v5  ;;  %v5227_v5 = vld [vmem:[%s7349_s19 + $0x90] sm:$0xf0] }
 0x736   :  { %v5230_v12 = vor.u32 %v5762_v0, %v5227_v5  ;;  %v5748_v0 = vld [vmem:[%s7349_s19 + $0xc] sm:$0xf0]  ;;  %v5289_v5 = vld [vmem:[%s7349_s19 + $0x100] sm:$0xf] }
 0x737   :  { %v3102_v7 = vmul.f32 %v6819_v26, %v6819_v26 }
 0x738   :  { %3637 = vmatpush.bf16.msrb.mxu2 %v5230_v12  ;;  %v5778_v12 = vld [vmem:[%s7349_s19 + $0x104] sm:$0xf] }
 0x739   :  { %v3104_v37 = vrot.slane %v3102_v7, 7  ;;  %v5294_v14 = vor.u32 %v5778_v12, %v5291_v13  ;;  %v5759_v12 = vld [vmem:[%s7349_s19 + $0x6c] sm:$0xf]  ;;  %v5219_v13 = vld [vmem:[%s7349_s19 + $0x78] sm:$0xf0] }
 0x73b   :  { %v3106_v8 = vsub.f32 %v6819_v26, %v3104_v37  ;;  %v5226_v37 = vor.u32 %v5764_v59, %v5225_v57  ;;  %v5306_v57 = vor.u32 %v5784_v52, %v5305_v45  ;;  %v5782_v59 = vld [vmem:[%s7349_s19 + $0x124] sm:$0xf]  ;;  %v5765_v52 = vld [vmem:[%s7349_s19 + $0x94] sm:$0xf0] }
 0x73c   :  { %3638 = vmatpush.bf16.msrb.mxu2 %v5214_v18  ;;  %v5310_v61 = vor.u32 %v5782_v59, %v5307_v60  ;;  %v5411_v18 = vld [vmem:[%s7349_s19 + $0x1f8] sm:$0xf0]  ;;  %v5795_v60 = vld [vmem:[%s7349_s19 + $0x18c] sm:$0xf] }
 0x73d   :  { %v6824_v9 = vadd.f32 1e-05, %v3106_v8  ;;  %v5794_v8 = vld [vmem:[%s7349_s19 + $0x184] sm:$0xf]  ;;  %3599 = vmatpush.bf16.msra.mxu0 %v5226_v37  ;;  %3621 = vmatpush.bf16.msra.mxu1 %v5306_v57  ;;  %v5780_v37 = vld [vmem:[%s7349_s19 + $0x10c] sm:$0xf0] }
 0x73e   :  { %v5797_v57 = vld [vmem:[%s7349_s19 + $0x194] sm:$0xf0]  ;;  %v5235_v59 = vld [vmem:[%s7349_s19 + $0x98] sm:$0xf0] }
 0x73f   :  { %5836 = vrsqrt.f32 %v6824_v9  ;;  %vm3115_vm2 = vweird.f32 %v6824_v9 }
 0x741   :  { %3600 = vmatpush.bf16.msra.mxu0 %v5210_v40 }
 0x745   :  { %v6866_v27 = vpop.eup %5836 }
 0x746   :  { %v3110_v54 = vmul.f32 %v6866_v27, %v6824_v9  ;;  %vm3116_vm0 = vweird.f32 %v6866_v27  ;;  %v5355_v9 = vld [vmem:[%s7349_s19 + $0x190] sm:$0xf0] }
 0x747   :  { %vm6938_vm3 = vmor %vm3115_vm2, %vm3116_vm0  ;;  %v5358_v19 = vor.u32 %v5794_v8, %v5355_v9  ;;  %v5746_v8 = vld [vmem:[%s7349_s19 + $0x4] sm:$0xf]  ;;  %v5163_v9 = vld [vmem:[%s7349_s19 + $0x10] sm:$0xf0] }
 0x748   :  { %v3111_v31 = vmul.f32 %v6866_v27, %v3110_v54  ;;  %v5166_v11 = vor.u32 %v5746_v8, %v5163_v9  ;;  %v5761_v8 = vld [vmem:[%s7349_s19 + $0x74] sm:$0xf0]  ;;  %v5345_v9 = vld [vmem:[%s7349_s19 + $0x168] sm:$0xf] }
 0x749   :  { %3656 = vmatpush.bf16.msrb.mxu3 %v5358_v19  ;;  %v5777_v19 = vld [vmem:[%s7349_s19 + $0xf4] sm:$0xf0] }
 0x74a   :  { %v3112_v51 = vmul.f32 0.5, %v3111_v31  ;;  %v5195_v31 = vld [vmem:[%s7349_s19 + $0x50] sm:$0xf0]  ;;  %v5282_v21 = vor.u32 %v5777_v19, %v5281_v15  ;;  %v5222_v15 = vor.u32 %v5759_v12, %v5219_v13  ;;  %v5791_v19 = vld [vmem:[%s7349_s19 + $0x16c] sm:$0xf] }
 0x74b   :  { %v5198_v44 = vor.u32 %v5754_v43, %v5195_v31  ;;  %v5377_v31 = vld [vmem:[%s7349_s19 + $0x1a8] sm:$0xf]  ;;  %v5350_v22 = vor.u32 %v5791_v19, %v5347_v20  ;;  %v5779_v12 = vld [vmem:[%s7349_s19 + $0x10c] sm:$0xf]  ;;  %v5299_v13 = vld [vmem:[%s7349_s19 + $0x118] sm:$0xf0] }
 0x74c   :  { %v3113_v1 = vsub.f32 1.5, %v3112_v51  ;;  %v5178_v51 = vor.u32 %v5752_v50, %v5177_v49  ;;  %v5379_v49 = vld [vmem:[%s7349_s19 + $0x1b8] sm:$0xf0]  ;;  %v5378_v50 = vor.u32 %v5801_v32, %v5377_v31  ;;  %v5302_v19 = vor.u32 %v5779_v12, %v5299_v13 }
 0x74d   :  { %3657 = vmatpush.bf16.msrb.mxu3 %v5342_v24  ;;  %3639 = vmatpush.bf16.msrb.mxu2 %v5198_v44  ;;  %v5265_v24 = vld [vmem:[%s7349_s19 + $0xc8] sm:$0xf]  ;;  %v5767_v44 = vld [vmem:[%s7349_s19 + $0xac] sm:$0xf]  ;;  %v5187_v31 = vld [vmem:[%s7349_s19 + $0x38] sm:$0xf0] }
 0x74e   :  { %v3114_v10 = vmul.f32 %v6866_v27, %v3113_v1  ;;  %v5161_v1 = vld [vmem:[%s7349_s19] sm:$0xf]  ;;  %v5254_v45 = vor.u32 %v5767_v44, %v5251_v47 }
 0x74f   :  { %v5162_v7 = vor.u32 %v5748_v0, %v5161_v1  ;;  %v5362_v0 = vor.u32 %v5797_v57, %v5361_v53  ;;  %v5783_v53 = vld [vmem:[%s7349_s19 + $0x12c] sm:$0xf]  ;;  %v5297_v57 = vld [vmem:[%s7349_s19 + $0x108] sm:$0xf]  ;;  %v5813_v13 = vld [vmem:[%s7350_s20 + $0x1c] sm:$0xff] }
 0x750   :  { %v3118_v23 = vsel %vm6938_vm3, %v6866_v27, %v3114_v10  ;;  %v3107_v27 = vld [vmem:[%s7347_s17] sm:$0x1]  ;;  %v5290_v10 = vor.u32 %v5780_v37, %v5289_v5  ;;  %v5217_v37 = vld [vmem:[%s7349_s19 + $0x68] sm:$0xf] }
 0x751   :  { %3120 = vst [vmem:[#allocation1] sm:$0xff] %v3118_v23  ;;  %3658 = vmatpush.bf16.msrb.mxu3 %v5326_v48  ;;  %3640 = vmatpush.bf16.msrb.mxu2 %v5182_v58  ;;  %v5775_v23 = vld [vmem:[%s7349_s19 + $0xec] sm:$0xf] }
 0x752   :  { %3622 = vmatpush.bf16.msra.mxu1 %v5290_v10  ;;  %v5286_v40 = vor.u32 %v5775_v23, %v5283_v36  ;;  %v5799_v48 = vld [vmem:[%s7349_s19 + $0x1ac] sm:$0xf]  ;;  %v5218_v10 = vor.u32 %v5761_v8, %v5217_v37  ;;  %v5757_v23 = vld [vmem:[%s7349_s19 + $0x54] sm:$0xf0]  ;;  %v5329_v36 = vld [vmem:[%s7349_s19 + $0x148] sm:$0xf] }
 0x753   :  { %v5382_v56 = vor.u32 %v5799_v48, %v5379_v49  ;;  %v5763_v58 = vld [vmem:[%s7349_s19 + $0x8c] sm:$0xf] }
 0x754   :  { %v5238_v5 = vor.u32 %v5763_v58, %v5235_v59  ;;  %v5781_v58 = vld [vmem:[%s7349_s19 + $0x114] sm:$0xf0] }
 0x755   :  { %3659 = vmatpush.bf16.msrb.mxu3 %v5310_v61  ;;  %3641 = vmatpush.bf16.msrb.mxu2 %v5166_v11  ;;  %v5363_v61 = vld [vmem:[%s7349_s19 + $0x198] sm:$0xf0]  ;;  %v5793_v11 = vld [vmem:[%s7349_s19 + $0x174] sm:$0xf0] }
 0x756   :  { %3691 = vmatpush.bf16.msrb.mxu1 %v5410_v25  ;;  %v5789_v25 = vld [vmem:[%s7349_s19 + $0x154] sm:$0xf0] }
 0x758   :  { %v3122_v28 = vld [vmem:[#allocation1 + $0x1] ss:$9 sm:$0xff] }
 0x759   :  { %v3124_v29 = vmul.f32 %v3122_v28, %v3107_v27  ;;  %3660 = vmatpush.bf16.msrb.mxu3 %v5294_v14  ;;  %v5414_v27 = vor.u32 %v5807_v33, %v5411_v18  ;;  %v5773_v28 = vld [vmem:[%s7349_s19 + $0xd4] sm:$0xf0]  ;;  %v5346_v14 = vor.u32 %v5793_v11, %v5345_v9  ;;  %v5330_v33 = vor.u32 %v5789_v25, %v5329_v36  ;;  %v5755_v18 = vld [vmem:[%s7349_s19 + $0x4c] sm:$0xf] }
 0x75b   :  { %v3126_v54 = vmul.f32 %v3124_v29, %v6819_v26  ;;  %v5194_v26 = vor.u32 %v5756_v39, %v5193_v38  ;;  %v5803_v38 = vld [vmem:[%s7349_s19 + $0x1cc] sm:$0xf] }
 0x75c   :  { %v5398_v43 = vor.u32 %v5803_v38, %v5395_v41  ;;  %v5313_v38 = vld [vmem:[%s7349_s19 + $0x128] sm:$0xf]  ;;  %v5751_v41 = vld [vmem:[%s7349_s19 + $0x2c] sm:$0xf] }
 0x75d   :  { %v3127_v34 = vsub.f32 %v3125_v30, %v3126_v54  ;;  %3601 = vmatpush.bf16.msra.mxu0 %v5194_v26  ;;  %v5805_v30 = vld [vmem:[%s7349_s19 + $0x1d4] sm:$0xf0]  ;;  %v5266_v54 = vor.u32 %v5773_v28, %v5265_v24  ;;  %v5249_v26 = vld [vmem:[%s7349_s19 + $0xa8] sm:$0xf]  ;;  %v5203_v24 = vld [vmem:[%s7349_s19 + $0x58] sm:$0xf0]  ;;  %v5190_v48 = vor.u32 %v5751_v41, %v5187_v31 }
 0x75e   :  { %v5250_v46 = vor.u32 %v5769_v42, %v5249_v26  ;;  %v5206_v28 = vor.u32 %v5755_v18, %v5203_v24 }
 0x75f   :  { %v3129_v55 = vperm.slane %v3127_v34, 0 }
 0x761   :  { %v3131_v35 = vsel %vm276_vm1, %v3124_v29, %v3129_v55  ;;  %3602 = vmatpush.bf16.msra.mxu0 %v5178_v51  ;;  %v5393_v29 = vld [vmem:[%s7349_s19 + $0x1c8] sm:$0xf]  ;;  %v5771_v55 = vld [vmem:[%s7349_s19 + $0xcc] sm:$0xf]  ;;  %vm3813_vm1 = vcmask 1044480  }
 0x762   :  { %5157 = vmatmul.msk.f32.vlgmr.msra.gmra.mxu2 %vm3136_vm4, %v3131_v35  ;;  %5158 = vmatmul.msk.f32.vlgmr.msra.gmra.mxu3 %vm3136_vm4, %v3131_v35  ;;  %v5394_v34 = vor.u32 %v5805_v30, %v5393_v29  ;;  %v5267_v35 = vld [vmem:[%s7349_s19 + $0xd8] sm:$0xf0]  ;;  %v5233_v51 = vld [vmem:[%s7349_s19 + $0x88] sm:$0xf] }
 0x763   :  { %3710 = vmatpush.bf16.msra.mxu2 %v5286_v40  ;;  %3729 = vmatpush.bf16.msra.mxu3 %v5414_v27  ;;  %v5270_v39 = vor.u32 %v5771_v55, %v5267_v35  ;;  %v5234_v1 = vor.u32 %v5765_v52, %v5233_v51  ;;  %v5787_v27 = vld [vmem:[%s7349_s19 + $0x14c] sm:$0xf]  ;;  %v5331_v29 = vld [vmem:[%s7349_s19 + $0x158] sm:$0xf0]  ;;  %v5185_v30 = vld [vmem:[%s7349_s19 + $0x28] sm:$0xf] }
 0x764   :  { %3692 = vmatpush.bf16.msrb.mxu1 %v5394_v34  ;;  %v5334_v35 = vor.u32 %v5787_v27, %v5331_v29 }
 0x765   :  { %3603 = vmatpush.bf16.msra.mxu0 %v5162_v7  ;;  %v5366_v7 = vor.u32 %v5795_v60, %v5363_v61  ;;  %v5747_v61 = vld [vmem:[%s7349_s19 + $0xc] sm:$0xf] }
 0x767   :  { %3711 = vmatpush.bf16.msra.mxu2 %v5270_v39  ;;  %3730 = vmatpush.bf16.msra.mxu3 %v5398_v43  ;;  %v5785_v39 = vld [vmem:[%s7349_s19 + $0x134] sm:$0xf0] }
 0x768   :  { %3693 = vmatpush.bf16.msrb.mxu1 %v5378_v50  ;;  %v5314_v32 = vor.u32 %v5785_v39, %v5313_v38 }
 0x769   :  { %3672 = vmatpush.bf16.msrb.mxu0 %v5282_v21  ;;  %v5201_v21 = vld [vmem:[%s7349_s19 + $0x48] sm:$0xf] }
 0x76a   :  { %v5202_v40 = vor.u32 %v5757_v23, %v5201_v21 }
 0x76b   :  { %3712 = vmatpush.bf16.msra.mxu2 %v5254_v45  ;;  %3731 = vmatpush.bf16.msra.mxu3 %v5382_v56 }
 0x76c   :  { %3694 = vmatpush.bf16.msrb.mxu1 %v5362_v0 }
 0x76d   :  { %3673 = vmatpush.bf16.msrb.mxu0 %v5266_v54  ;;  %v5753_v54 = vld [vmem:[%s7349_s19 + $0x34] sm:$0xf0] }
 0x76e   :  { %v5186_v43 = vor.u32 %v5753_v54, %v5185_v30 }
 0x76f   :  { %3713 = vmatpush.bf16.msra.mxu2 %v5238_v5  ;;  %3732 = vmatpush.bf16.msra.mxu3 %v5366_v7 }
 0x770   :  { %3695 = vmatpush.bf16.msrb.mxu1 %v5346_v14 }
 0x771   :  { %3674 = vmatpush.bf16.msrb.mxu0 %v5250_v46 }
 0x773   :  { %3714 = vmatpush.bf16.msra.mxu2 %v5222_v15  ;;  %3733 = vmatpush.bf16.msra.mxu3 %v5350_v22 }
 0x774   :  { %3696 = vmatpush.bf16.msrb.mxu1 %v5330_v33 }
 0x775   :  { %3675 = vmatpush.bf16.msrb.mxu0 %v5234_v1  ;;  %v5171_v1 = vld [vmem:[%s7349_s19 + $0x18] sm:$0xf0] }
 0x776   :  { %v5174_v11 = vor.u32 %v5747_v61, %v5171_v1 }
 0x777   :  { %3715 = vmatpush.bf16.msra.mxu2 %v5206_v28  ;;  %3734 = vmatpush.bf16.msra.mxu3 %v5334_v35 }
 0x778   :  { %3697 = vmatpush.bf16.msrb.mxu1 %v5314_v32 }
 0x779   :  { %3676 = vmatpush.bf16.msrb.mxu0 %v5218_v10  ;;  %v5298_v10 = vor.u32 %v5781_v58, %v5297_v57 }
 0x77b   :  { %3716 = vmatpush.bf16.msra.mxu2 %v5190_v48 }
 0x77c   :  { %3698 = vmatpush.bf16.msrb.mxu1 %v5298_v10 }
 0x77d   :  { %3677 = vmatpush.bf16.msrb.mxu0 %v5202_v40 }
 0x77f   :  { %3717 = vmatpush.bf16.msra.mxu2 %v5174_v11 }
 0x781   :  { %3678 = vmatpush.bf16.msrb.mxu0 %v5186_v43 }
 0x7e5   :  { %v3157_v34 = vpop.f32.mrf.mxu2  ;;  %v3177_v55 = vpop.f32.mrf.mxu3 }
 0x7e6   :  { %v3180_v26 = vperm.slane %v3157_v34, 0  ;;  %v3181_v42 = vperm.slane %v3177_v55, 0  ;;  %v3190_v47 = vperm.slane %v3157_v34, 1  ;;  %v3191_v45 = vperm.slane %v3177_v55, 1 }
 0x7e8   :  { %v3182_v44 = vmul.f32 %v3180_v26, %v6775_v2  ;;  %v3184_v46 = vmul.f32 %v3180_v26, %v6771_v62  ;;  %v3183_v49 = vmul.f32 %v3181_v42, %v6777_v3  ;;  %v3185_v50 = vmul.f32 %v3181_v42, %v6773_v63  ;;  %v5315_v2 = vld [vmem:[%s7349_s19 + $0x138] sm:$0xf0]  ;;  %v5169_v62 = vld [vmem:[%s7349_s19 + $0x8] sm:$0xf]  ;;  %v5749_v63 = vld [vmem:[%s7349_s19 + $0x14] sm:$0xf0] }
 0x7e9   :  { %v5318_v37 = vor.u32 %v5783_v53, %v5315_v2  ;;  %v5170_v8 = vor.u32 %v5749_v63, %v5169_v62  ;;  %v3186_v14 = vmul.f32 %v3180_v26, %v6779_v6  ;;  %v3188_v15 = vmul.f32 %v3180_v26, %v6801_v16 }
 0x7ea   :  { %v3192_v51 = vadd.f32 %v3190_v47, %v3182_v44  ;;  %v3194_v52 = vadd.f32 %v3190_v47, %v3184_v46  ;;  %v3193_v56 = vadd.f32 %v3191_v45, %v3183_v49  ;;  %v3195_v3 = vadd.f32 %v3191_v45, %v3185_v50 }
 0x7eb   :  { %3735 = vmatpush.bf16.msra.mxu3 %v5318_v37  ;;  %3679 = vmatpush.bf16.msrb.mxu0 %v5170_v8  ;;  %v3187_v20 = vmul.f32 %v3181_v42, %v6781_v4  ;;  %v3189_v21 = vmul.f32 %v3181_v42, %v6803_v17  ;;  %v3196_v22 = vadd.f32 %v3190_v47, %v3186_v14  ;;  %v5810_v14 = vld [vmem:[%s7350_s20] sm:$0xff] }
 0x7ec   :  { %v3200_v59 = vmax.f32 %v3192_v51, 0.0  ;;  %v3202_v60 = vmax.f32 %v3194_v52, 0.0  ;;  %v3201_v0 = vmax.f32 %v3193_v56, 0.0  ;;  %v3203_v5 = vmax.f32 %v3195_v3, 0.0 }
 0x7ed   :  { %v3198_v23 = vadd.f32 %v3190_v47, %v3188_v15  ;;  %v3197_v36 = vadd.f32 %v3191_v45, %v3187_v20  ;;  %v3199_v25 = vadd.f32 %v3191_v45, %v3189_v21  ;;  %v3204_v40 = vmax.f32 %v3196_v22, 0.0 }
 0x7ee   :  { %v3208_v7 = vpack.c.bf16 %v3202_v60, %v3200_v59  ;;  %v3209_v9 = vpack.c.bf16 %v3203_v5, %v3201_v0 }
 0x7ef   :  { %3736 = vmatpush.bf16.msra.mxu3 %v5302_v19  ;;  %v3206_v33 = vmax.f32 %v3198_v23, 0.0  ;;  %v3205_v18 = vmax.f32 %v3197_v36, 0.0  ;;  %v3207_v6 = vmax.f32 %v3199_v25, 0.0  ;;  %v5814_v25 = vld [vmem:[%s7350_s20 + $0x24] sm:$0xff] }
 0x7f0   :  { %3604 = vmatmul.bf16.vlgmr.msra.gmra.mxu0 %v3208_v7  ;;  %3642 = vmatmul.bf16.vlgmr.msrb.gmra.mxu2 %v3208_v7 }
 0x7f1   :  { %3623 = vmatmul.bf16.vlgmr.msra.gmra.mxu1 %v3209_v9  ;;  %3661 = vmatmul.bf16.vlgmr.msrb.gmra.mxu3 %v3209_v9  ;;  %v3210_v24 = vpack.c.bf16 %v3206_v33, %v3204_v40  ;;  %v3211_v16 = vpack.c.bf16 %v3207_v6, %v3205_v18  ;;  %v5811_v40 = vld [vmem:[%s7350_s20 + $0x8] sm:$0xff] }
 0x800   :  { %3609 = vmatmul.bf16.gmra.mxu0 %v3210_v24  ;;  %3647 = vmatmul.bf16.gmra.mxu2 %v3210_v24 }
 0x801   :  { %3628 = vmatmul.bf16.gmra.mxu1 %v3211_v16  ;;  %3666 = vmatmul.bf16.gmra.mxu3 %v3211_v16 }
 0x810   :  { %3680 = vmatmul.bf16.vlgmr.msrb.gmra.mxu0 %v3208_v7  ;;  %3718 = vmatmul.bf16.vlgmr.msra.gmra.mxu2 %v3208_v7 }
 0x811   :  { %3699 = vmatmul.bf16.vlgmr.msrb.gmra.mxu1 %v3209_v9  ;;  %3737 = vmatmul.bf16.vlgmr.msra.gmra.mxu3 %v3209_v9 }
 0x820   :  { %3685 = vmatmul.bf16.gmra.mxu0 %v3210_v24  ;;  %3723 = vmatmul.bf16.gmra.mxu2 %v3210_v24 }
 0x821   :  { %3704 = vmatmul.bf16.gmra.mxu1 %v3211_v16  ;;  %3742 = vmatmul.bf16.gmra.mxu3 %v3211_v16 }
 0x86d   :  { %v3605_v4 = vpop.f32.mrf.mxu0 }
 0x86e   :  { %v3624_v17 = vpop.f32.mrf.mxu1 }
 0x86f   :  { %v3625_v53 = vadd.f32 %v3624_v17, %v3605_v4 }
 0x873   :  { %v3643_v27 = vpop.f32.mrf.mxu2 }
 0x874   :  { %v3662_v28 = vpop.f32.mrf.mxu3 }
 0x875   :  { %v3607_v29 = vpop.f32.mrf.mxu0  ;;  %v3663_v50 = vadd.f32 %v3662_v28, %v3643_v27 }
 0x876   :  { %v3626_v30 = vpop.f32.mrf.mxu1 }
 0x877   :  { %v3627_v45 = vadd.f32 %v3626_v30, %v3607_v29  ;;  %v3748_v57 = vpack.c.bf16 %v3663_v50, %v3625_v53  ;;  %v5812_v53 = vld [vmem:[%s7350_s20 + $0x10] sm:$0xff] }
 0x879   :  { %v3793_v37 = vunpack.c.h.b16 %v3748_v57  ;;  %v3863_v8 = vunpack.c.l.b16 %v3748_v57  ;;  %v5820_v57 = vld [vmem:[%s7350_s20 + $0x5c] sm:$0xff] }
 0x87b   :  { %v3645_v54 = vpop.f32.mrf.mxu2 }
 0x87c   :  { %v3664_v34 = vpop.f32.mrf.mxu3 }
 0x87d   :  { %v3610_v55 = vpop.f32.mrf.mxu0  ;;  %v3665_v32 = vadd.f32 %v3664_v34, %v3645_v54 }
 0x87e   :  { %v3629_v35 = vpop.f32.mrf.mxu1 }
 0x87f   :  { %v3630_v43 = vadd.f32 %v3629_v35, %v3610_v55  ;;  %v3750_v2 = vpack.c.bf16 %v3665_v32, %v3627_v45  ;;  %v5816_v45 = vld [vmem:[%s7350_s20 + $0x38] sm:$0xff] }
 0x881   :  { %v3794_v61 = vunpack.c.h.b16 %v3750_v2  ;;  %v3864_v1 = vunpack.c.l.b16 %v3750_v2  ;;  %v5421_v2 = vld [vmem:[%s7350_s20 + $0x34] sm:$0xf] }
 0x883   :  { %v3648_v38 = vpop.f32.mrf.mxu2  ;;  %v3797_v11 = vpack.c.b16 %v3794_v61, %v3793_v37  ;;  %v3867_v12 = vpack.c.b16 %v3864_v1, %v3863_v8  ;;  %v5821_v61 = vld [vmem:[%s7350_s20 + $0x64] sm:$0xff]  ;;  %v5460_v1 = vld [vmem:[%s7350_s20 + $0x50] sm:$0xf] }
 0x884   :  { %v3667_v39 = vpop.f32.mrf.mxu3 }
 0x885   :  { %v3612_v41 = vpop.f32.mrf.mxu0  ;;  %v3668_v42 = vadd.f32 %v3667_v39, %v3648_v38 }
 0x886   :  { %v3631_v26 = vpop.f32.mrf.mxu1 }
 0x887   :  { %v3752_v46 = vpack.c.bf16 %v3668_v42, %v3630_v43  ;;  %v3632_v47 = vadd.f32 %v3631_v26, %v3612_v41 }
 0x889   :  { %v3795_v62 = vunpack.c.h.b16 %v3752_v46  ;;  %v3865_v56 = vunpack.c.l.b16 %v3752_v46 }
 0x88b   :  { %v3650_v31 = vpop.f32.mrf.mxu2 }
 0x88c   :  { %v3669_v44 = vpop.f32.mrf.mxu3 }
 0x88d   :  { %v3670_v48 = vadd.f32 %v3669_v44, %v3650_v31  ;;  %v3681_v49 = vpop.f32.mrf.mxu0 }
 0x88e   :  { %v3700_v51 = vpop.f32.mrf.mxu1 }
 0x88f   :  { %v3754_v52 = vpack.c.bf16 %v3670_v48, %v3632_v47  ;;  %v3701_v34 = vadd.f32 %v3700_v51, %v3681_v49  ;;  %v5819_v51 = vld [vmem:[%s7350_s20 + $0x54] sm:$0xff] }
 0x891   :  { %v3796_v3 = vunpack.c.h.b16 %v3754_v52  ;;  %v3866_v63 = vunpack.c.l.b16 %v3754_v52  ;;  %v5815_v52 = vld [vmem:[%s7350_s20 + $0x2c] sm:$0xff] }
 0x893   :  { %v3719_v58 = vpop.f32.mrf.mxu2  ;;  %v3798_v59 = vpack.c.b16 %v3796_v3, %v3795_v62  ;;  %v3868_v60 = vpack.c.b16 %v3866_v63, %v3865_v56  ;;  %v3762_v62 = vld [vmem:[%s7350_s20 + $0x18] sm:$0xf]  ;;  %v3784_v56 = vunpack.c.l.b16 %v5421_v2  ;;  %v5817_v63 = vld [vmem:[%s7350_s20 + $0x40] sm:$0xff] }
 0x894   :  { %v3738_v0 = vpop.f32.mrf.mxu3  ;;  %v3858_v3 = vunpack.c.l.b16 %v3762_v62 }
 0x895   :  { %v3815_v5 = vsel %vm3813_vm1, %v3798_v59, 0  ;;  %v3883_v7 = vsel %vm3813_vm1, %v3868_v60, 0  ;;  %v3683_v9 = vpop.f32.mrf.mxu0  ;;  %v3739_v29 = vadd.f32 %v3738_v0, %v3719_v58  ;;  %v3788_v58 = vpack.c.b16 %v3784_v56, %v3784_v56  ;;  %v5818_v60 = vld [vmem:[%s7350_s20 + $0x48] sm:$0xff] }
 0x896   :  { %v3702_v10 = vpop.f32.mrf.mxu1  ;;  %3823 = vmatpush.bf16.msra.mxu0 %v3815_v5  ;;  %3891 = vmatpush.bf16.msra.mxu1 %v3883_v7  ;;  %v3862_v59 = vpack.c.b16 %v3858_v3, %v3858_v3  ;;  %v5483_v0 = vld [vmem:[%s7350_s20 + $0x6c] sm:$0xf]  ;;  %v3934_v5 = vunpack.c.l.b16 %v5460_v1 }
 0x897   :  { %v3703_v30 = vadd.f32 %v3702_v10, %v3683_v9  ;;  %v3749_v26 = vpack.c.bf16 %v3739_v29, %v3701_v34  ;;  %v4021_v7 = vunpack.c.l.b16 %v5483_v0 }
 0x898   :  { %v3938_v37 = vpack.c.b16 %v3934_v5, %v3934_v5 }
 0x899   :  { %v3943_v47 = vunpack.c.l.b16 %v3749_v26  ;;  %v4026_v48 = vunpack.c.h.b16 %v3749_v26  ;;  %v4025_v8 = vpack.c.b16 %v4021_v7, %v4021_v7 }
 0x89a   :  { %3824 = vmatpush.bf16.msra.mxu0 %v3797_v11  ;;  %3892 = vmatpush.bf16.msra.mxu1 %v3867_v12 }
 0x89b   :  { %v3721_v15 = vpop.f32.mrf.mxu2 }
 0x89c   :  { %v3740_v19 = vpop.f32.mrf.mxu3 }
 0x89d   :  { %5434 = vmatmul.msk.bf16.vlgmr.msra.gmra.mxu0 %vm3800_vm5, %v5813_v13  ;;  %5450 = vmatmul.msk.bf16.vlgmr.msra.gmra.mxu1 %vm3800_vm5, %v5810_v14  ;;  %v3686_v20 = vpop.f32.mrf.mxu0  ;;  %v3741_v16 = vadd.f32 %v3740_v19, %v3721_v15 }
 0x89e   :  { %v3705_v21 = vpop.f32.mrf.mxu1 }
 0x89f   :  { %v3706_v6 = vadd.f32 %v3705_v21, %v3686_v20  ;;  %v3751_v55 = vpack.c.bf16 %v3741_v16, %v3703_v30 }
 0x8a1   :  { %v3944_v31 = vunpack.c.l.b16 %v3751_v55  ;;  %v4027_v32 = vunpack.c.h.b16 %v3751_v55 }
 0x8a3   :  { %v3724_v22 = vpop.f32.mrf.mxu2  ;;  %v3947_v50 = vpack.c.b16 %v3944_v31, %v3943_v47  ;;  %v4030_v49 = vpack.c.b16 %v4027_v32, %v4026_v48 }
 0x8a4   :  { %v3743_v23 = vpop.f32.mrf.mxu3 }
 0x8a5   :  { %v3744_v36 = vadd.f32 %v3743_v23, %v3724_v22  ;;  %v3688_v33 = vpop.f32.mrf.mxu0 }
 0x8a6   :  { %v3707_v18 = vpop.f32.mrf.mxu1 }
 0x8a7   :  { %v3753_v17 = vpack.c.bf16 %v3744_v36, %v3706_v6  ;;  %v3708_v27 = vadd.f32 %v3707_v18, %v3688_v33 }
 0x8a9   :  { %v3945_v35 = vunpack.c.l.b16 %v3753_v17  ;;  %v4028_v38 = vunpack.c.h.b16 %v3753_v17 }
 0x8ab   :  { %v3726_v24 = vpop.f32.mrf.mxu2 }
 0x8ac   :  { %v3745_v4 = vpop.f32.mrf.mxu3 }
 0x8ad   :  { %v3746_v28 = vadd.f32 %v3745_v4, %v3726_v24  ;;  %5435 = vmatmul.msk.bf16.gmra.mxu0 %vm3800_vm5, %v5814_v25  ;;  %5451 = vmatmul.msk.bf16.gmra.mxu1 %vm3800_vm5, %v5811_v40  ;;  %v5831_v40 = vld [vmem:[%s7351_s21] ss:$0 sm:$0xff]  ;;  %s5922_s21 = smov [#allocation7]  }
 0x8ae   :  { %s4105_s11 = sshll.u32 %s5922_s21, 4  ;;  %s4106_s11 = int_to_ptr.vmem [resolvable:$true] %s4105_s11 }
 0x8af   :  { %v3755_v54 = vpack.c.bf16 %v3746_v28, %v3708_v27 }
 0x8b1   :  { %v3946_v39 = vunpack.c.l.b16 %v3755_v54  ;;  %v4029_v41 = vunpack.c.h.b16 %v3755_v54 }
 0x8b3   :  { %v3948_v42 = vpack.c.b16 %v3946_v39, %v3945_v35  ;;  %v4031_v43 = vpack.c.b16 %v4029_v41, %v4028_v38 }
 0x8b5   :  { %v3963_v44 = vsel %vm3813_vm1, %v3948_v42, 0  ;;  %v4046_v46 = vsel %vm3813_vm1, %v4031_v43, 0 }
 0x8b6   :  { %3971 = vmatpush.bf16.msrb.mxu2 %v3963_v44  ;;  %4054 = vmatpush.bf16.msrb.mxu3 %v4046_v46 }
 0x8ba   :  { %3972 = vmatpush.bf16.msrb.mxu2 %v3947_v50  ;;  %4055 = vmatpush.bf16.msrb.mxu3 %v4030_v49 }
 0x8bd   :  { %5473 = vmatmul.msk.bf16.vlgmr.msrb.gmra.mxu2 %vm3800_vm5, %v5816_v45  ;;  %5496 = vmatmul.msk.bf16.vlgmr.msrb.gmra.mxu3 %vm3800_vm5, %v5819_v51 }
 0x8be   :  { %5436 = vmatmul.msk.bf16.gmra.mxu0 %vm3800_vm5, %v5815_v52  ;;  %5452 = vmatmul.msk.bf16.gmra.mxu1 %vm3800_vm5, %v5812_v53 }
 0x8cd   :  { %5474 = vmatmul.msk.bf16.gmra.mxu2 %vm3800_vm5, %v5817_v63  ;;  %5497 = vmatmul.msk.bf16.gmra.mxu3 %vm3800_vm5, %v5820_v57 }
 0x8ce   :  { %5437 = vmatmul.msk.bf16.gmra.mxu0 %vm3800_vm5, %v3788_v58  ;;  %5453 = vmatmul.msk.bf16.gmra.mxu1 %vm3800_vm5, %v3862_v59 }
 0x8dd   :  { %5475 = vmatmul.msk.bf16.gmra.mxu2 %vm3800_vm5, %v5818_v60  ;;  %5498 = vmatmul.msk.bf16.gmra.mxu3 %vm3800_vm5, %v5821_v61 }
 0x8ed   :  { %5476 = vmatmul.msk.bf16.gmra.mxu2 %vm3800_vm5, %v3938_v37  ;;  %5499 = vmatmul.msk.bf16.gmra.mxu3 %vm3800_vm5, %v4025_v8 }
 0x91a   :  { %v3826_v9 = vpop.f32.mrf.mxu0  ;;  %v3894_v10 = vpop.f32.mrf.mxu1 }
 0x91b   :  { %v3895_v22 = vadd.f32 %v3894_v10, %v3826_v9 }
 0x922   :  { %v3828_v11 = vpop.f32.mrf.mxu0  ;;  %v3896_v12 = vpop.f32.mrf.mxu1 }
 0x923   :  { %v3897_v16 = vadd.f32 %v3896_v12, %v3828_v11 }
 0x92a   :  { %v3831_v13 = vpop.f32.mrf.mxu0  ;;  %v3899_v14 = vpop.f32.mrf.mxu1 }
 0x92b   :  { %v3900_v34 = vadd.f32 %v3899_v14, %v3831_v13 }
 0x932   :  { %v3833_v15 = vpop.f32.mrf.mxu0  ;;  %v3901_v19 = vpop.f32.mrf.mxu1 }
 0x933   :  { %v3902_v43 = vadd.f32 %v3901_v19, %v3833_v15 }
 0x93b   :  { %v3836_v20 = vpop.f32.mrf.mxu0  ;;  %v3904_v21 = vpop.f32.mrf.mxu1 }
 0x93c   :  { %v3905_v48 = vadd.f32 %v3904_v21, %v3836_v20 }
 0x940   :  { %v3974_v23 = vpop.f32.mrf.mxu2  ;;  %v4057_v36 = vpop.f32.mrf.mxu3 }
 0x941   :  { %v3993_v25 = vadd.f32 %v3974_v23, %v3895_v22 }
 0x943   :  { %v4076_v33 = vadd.f32 %v4057_v36, %v3993_v25  ;;  %v3838_v18 = vpop.f32.mrf.mxu0  ;;  %v3906_v6 = vpop.f32.mrf.mxu1 }
 0x944   :  { %v3907_v53 = vadd.f32 %v3906_v6, %v3838_v18 }
 0x945   :  { %v4087_v24 = vadd.f32 %v5831_v40, %v4076_v33 }
 0x947   :  { %4094 = vst [vmem:[#allocation7] sm:$0xff] %v4087_v24 }
 0x948   :  { %v3976_v4 = vpop.f32.mrf.mxu2  ;;  %v4059_v17 = vpop.f32.mrf.mxu3 }
 0x949   :  { %v3994_v27 = vadd.f32 %v3976_v4, %v3897_v16 }
 0x94b   :  { %v4077_v28 = vadd.f32 %v4059_v17, %v3994_v27  ;;  %v3841_v29 = vpop.f32.mrf.mxu0  ;;  %v3909_v30 = vpop.f32.mrf.mxu1 }
 0x94c   :  { %v3910_v57 = vadd.f32 %v3909_v30, %v3841_v29 }
 0x94d   :  { %v4088_v54 = vadd.f32 %v5831_v40, %v4077_v28 }
 0x94f   :  { %4095 = vst [vmem:[#allocation7 + $0x8] sm:$0xff] %v4088_v54 }
 0x950   :  { %v3979_v55 = vpop.f32.mrf.mxu2  ;;  %v4062_v35 = vpop.f32.mrf.mxu3 }
 0x951   :  { %v3995_v38 = vadd.f32 %v3979_v55, %v3900_v34 }
 0x953   :  { %v4078_v39 = vadd.f32 %v4062_v35, %v3995_v38  ;;  %v3843_v41 = vpop.f32.mrf.mxu0  ;;  %v3911_v26 = vpop.f32.mrf.mxu1 }
 0x955   :  { %v4089_v42 = vadd.f32 %v5831_v40, %v4078_v39 }
 0x957   :  { %4096 = vst [vmem:[#allocation7 + $0x10] sm:$0xff] %v4089_v42 }
 0x958   :  { %v3981_v31 = vpop.f32.mrf.mxu2  ;;  %v4064_v32 = vpop.f32.mrf.mxu3 }
 0x959   :  { %v3996_v44 = vadd.f32 %v3981_v31, %v3902_v43 }
 0x95b   :  { %v4079_v46 = vadd.f32 %v4064_v32, %v3996_v44 }
 0x95d   :  { %v4090_v47 = vadd.f32 %v5831_v40, %v4079_v46 }
 0x95f   :  { %4097 = vst [vmem:[#allocation7 + $0x18] sm:$0xff] %v4090_v47 }
 0x960   :  { %v3984_v50 = vpop.f32.mrf.mxu2  ;;  %v4067_v49 = vpop.f32.mrf.mxu3 }
 0x961   :  { %v3997_v45 = vadd.f32 %v3984_v50, %v3905_v48 }
 0x963   :  { %v4080_v51 = vadd.f32 %v4067_v49, %v3997_v45 }
 0x965   :  { %v4091_v52 = vadd.f32 %v5831_v40, %v4080_v51 }
 0x967   :  { %4098 = vst [vmem:[#allocation7 + $0x20] sm:$0xff] %v4091_v52 }
 0x968   :  { %v3986_v2 = vpop.f32.mrf.mxu2  ;;  %v4069_v62 = vpop.f32.mrf.mxu3 }
 0x969   :  { %v3998_v56 = vadd.f32 %v3986_v2, %v3907_v53 }
 0x96b   :  { %v4081_v3 = vadd.f32 %v4069_v62, %v3998_v56 }
 0x96d   :  { %v4092_v63 = vadd.f32 %v5831_v40, %v4081_v3 }
 0x96f   :  { %4099 = vst [vmem:[#allocation7 + $0x28] sm:$0xff] %v4092_v63 }
 0x970   :  { %v3989_v58 = vpop.f32.mrf.mxu2  ;;  %v4072_v59 = vpop.f32.mrf.mxu3 }
 0x971   :  { %v3999_v60 = vadd.f32 %v3989_v58, %v3910_v57 }
 0x973   :  { %v4082_v61 = vadd.f32 %v4072_v59, %v3999_v60 }
 0x975   :  { %v4093_v1 = vadd.f32 %v5831_v40, %v4082_v61 }
 0x977   :  { %4100 = vst [vmem:[#allocation7 + $0x30] sm:$0xff] %v4093_v1 }
 0x978   :  { %v3991_v0 = vpop.f32.mrf.mxu2  ;;  %v4074_v5 = vpop.f32.mrf.mxu3  ;;  %4113 = dma.vmem_to_hbm [thread:$0]  %s4106_s11, 896, %s4108_s12, [#allocation4], %s5923_s30, %s5923_s30, %s5924_s9  }
 0x979   :  { %5914 = dma.done.wait [#allocation4], 896  }
 0x97a   :  { %5915 = vsyncadd [#allocation4], 4294966400 }
 0x97b   :  { %4118 = vsyncpa [#allocation3], 1 }
 0x97c   :  { %4119 = vsyncpa [#allocation6], 1 }
 0x97d   :  { %4120 = vsyncpa [#allocation4], 1 }

</bundles_post_ra>
